<compile_context>
chip_gen: v7x
topology: tpu7x:2x2x1
jax: 0.10.0
libtpu: 0.0.40
codegen_flags: <defaults>
</compile_context>

<pallas_src>
import functools

import jax
import jax.numpy as jnp
from jax.experimental import pallas as pl
from jax.experimental.pallas import tpu as pltpu


# ----------------------------- parameters -----------------------------------

def _layer_dims(origin_dim, latent_dim):
    enc = [(origin_dim, 128), (128, 64), (64, 32), (32, latent_dim)]
    dec = [(latent_dim, 32), (32, 64), (64, 128), (128, origin_dim)]
    return enc + dec


def init_params(origin_dim, latent_dim, key, dtype=jnp.float32):
    """Mimics torch.nn.Linear default init: U(-1/sqrt(fan_in), 1/sqrt(fan_in))."""
    params = []
    for (fan_in, fan_out) in _layer_dims(origin_dim, latent_dim):
        key, kw, kb = jax.random.split(key, 3)
        bound = 1.0 / (fan_in ** 0.5)
        w = jax.random.uniform(kw, (fan_in, fan_out), dtype, minval=-bound, maxval=bound)
        b = jax.random.uniform(kb, (1, fan_out), dtype, minval=-bound, maxval=bound)
        params += [w, b]
    return params


def prepare_kernel_params(params, compute_dtype=jnp.bfloat16):
    """Fuse layers 3 & 4 (no tanh between them -> exact) and cast weights to bf16.

    Input:  flat [w0, b0, ..., w7, b7] in f32 (PyTorch-equivalent parameters).
    Output: flat [w0, b0, ..., w6, b6] with 7 layers; weights in `compute_dtype`,
            biases in f32. Tanh is applied after every fused layer except the last.
    """
    n = len(params) // 2
    ws = [params[2 * i] for i in range(n)]
    bs = [params[2 * i + 1] for i in range(n)]
    # encoder L3 (32->latent) followed directly by decoder L4 (latent->32): exact fusion in f32.
    w34 = ws[3] @ ws[4]
    b34 = bs[3] @ ws[4] + bs[4]
    ws_f = ws[:3] + [w34] + ws[5:]
    bs_f = bs[:3] + [b34] + bs[5:]
    out = []
    for w, b in zip(ws_f, bs_f):
        out += [w.astype(compute_dtype), b.astype(jnp.float32)]
    return out
    # TODO(synk): if the latent code itself is ever needed, expose it as a second output
    # instead of fusing layers 3 & 4.


# ------------------------------- kernel --------------------------------------

def autoencoder_kernel(x_ref, *refs, act_dtype):
    """refs = (w0, b0, w1, b1, ..., w6, b6, out_ref). Tanh after all layers but the last.

    Matmuls: bf16 inputs -> f32 MXU accumulation. Bias add in f32. Tanh + inter-layer
    activations in `act_dtype` (bf16 on v6e/v7x; pass f32 for v5e's f32-only VPU/EUP).
    """
    out_ref = refs[-1]
    params = refs[:-1]
    n_layers = len(params) // 2

    h = x_ref[...]                                     # bf16 tile, feeds layer-0 MXU directly
    for i in range(n_layers):
        w = params[2 * i][...]                         # bf16 (MXU input)
        b = params[2 * i + 1][...]                     # f32
        acc = jnp.dot(h.astype(w.dtype), w, preferred_element_type=jnp.float32) + b
        if i != n_layers - 1:
            h = jnp.tanh(acc.astype(act_dtype))        # bf16 EUP/VPU on v6e/v7x
        else:
            h = acc
    out_ref[...] = h.astype(out_ref.dtype)


# ------------------------------- wrapper --------------------------------------

def _select_tile_b(batch, tile_cap):
    """Largest tb (multiple of 8, <= tile_cap) that divides batch; prefer an EVEN
    tile count >= 2 (v7x has 2 TensorCores sharded by the parallel grid axis).
    Falls back to one full-batch block (no padding ever needed)."""
    cap = min(tile_cap, batch)
    best = None
    tb = (cap // 8) * 8
    while tb >= 8:
        if batch % tb == 0:
            n = batch // tb
            if n >= 2 and n % 2 == 0:
                return tb                  # even tile count: best case
            if best is None and n >= 2:
                best = tb                  # odd-but-multiple fallback
        tb -= 8
    return best if best is not None else batch


@functools.partial(jax.jit, static_argnames=("tile_b", "act_dtype"))
def autoencoder_forward(x, kernel_params, *, tile_b=1024, act_dtype=jnp.bfloat16):
    """x: [batch, origin_dim] (bf16 recommended); kernel_params from prepare_kernel_params()."""
    batch, origin_dim = x.shape
    tb = _select_tile_b(batch, tile_b)
    n_tiles = batch // tb                              # tb always divides batch: no pad/slice

    io_spec = pl.BlockSpec((tb, origin_dim), lambda i: (i, 0))
    # Full-block, constant index_map: parameters are DMA'd once and stay VMEM-resident
    # across all batch tiles (Pallas skips DMAs whose block index does not change).
    param_specs = [pl.BlockSpec(p.shape, lambda i: (0, 0)) for p in kernel_params]

    return pl.pallas_call(
        functools.partial(autoencoder_kernel, act_dtype=act_dtype),
        out_shape=jax.ShapeDtypeStruct((batch, origin_dim), x.dtype),
        grid=(n_tiles,),
        in_specs=[io_spec] + param_specs,
        out_specs=io_spec,
        compiler_params=pltpu.CompilerParams(
            dimension_semantics=("parallel",),         # shard batch tiles across TCs (v7x)
            vmem_limit_bytes=32 * 1024 * 1024,         # tiles+params are ~3 MB; ample headroom
        ),
    )(x, *kernel_params)


# ------------------------------ references ------------------------------------

def reference_forward_fused(x, kernel_params, act_dtype=jnp.bfloat16):
    """Pure-JAX reference using the SAME fused/bf16 computation as the kernel."""
    h = x
    n_layers = len(kernel_params) // 2
    for i in range(n_layers):
        w = kernel_params[2 * i]
        b = kernel_params[2 * i + 1]
        acc = jnp.dot(h.astype(w.dtype), w, preferred_element_type=jnp.float32) + b
        h = jnp.tanh(acc.astype(act_dtype)) if i != n_layers - 1 else acc
    return h.astype(x.dtype)


def reference_forward_f32(x, params):
    """Pure-f32, unfused reference matching the original PyTorch Sequential exactly."""
    h = x.astype(jnp.float32)
    n_layers = len(params) // 2
    for i in range(n_layers):
        h = h @ params[2 * i] + params[2 * i + 1]
        if i not in (n_layers // 2 - 1, n_layers - 1):   # no tanh after layers 3 and 7
            h = jnp.tanh(h)
    return h


# --------------------------------- main ----------------------------------------

if __name__ == "__main__":
    origin_dim = 256
    latent_dim = 8
    batch = 1024            # tile selector picks tb=512 -> 2 even tiles (both TCs on v7x)

    key = jax.random.PRNGKey(0)
    key, kx = jax.random.split(key)
    x_f32 = jax.random.normal(kx, (batch, origin_dim), jnp.float32)
    x = x_f32.astype(jnp.bfloat16)                        # bf16 I/O end-to-end

    params = init_params(origin_dim, latent_dim, key)     # f32, PyTorch-style
    kparams = prepare_kernel_params(params, compute_dtype=jnp.bfloat16)

    out = autoencoder_forward(x, kparams, tile_b=1024, act_dtype=jnp.bfloat16)
    out = jax.block_until_ready(out)
    assert out.shape == (batch, origin_dim), out.shape
    assert out.dtype == jnp.bfloat16, out.dtype

    # Tight check vs. a reference that performs the identical fused/bf16 computation.
    ref = reference_forward_fused(x, kparams, act_dtype=jnp.bfloat16)
    diff = jnp.max(jnp.abs(out.astype(jnp.float32) - ref.astype(jnp.float32)))
    assert jnp.allclose(out.astype(jnp.float32), ref.astype(jnp.float32),
                        atol=2e-2, rtol=2e-2), float(diff)

    # Loose sanity check vs. the exact f32, unfused PyTorch-equivalent forward
    # (difference is purely bf16 quantization of weights, activations and I/O).
    ref_f32 = reference_forward_f32(x_f32, params)
    diff32 = jnp.max(jnp.abs(out.astype(jnp.float32) - ref_f32))
    assert jnp.allclose(out.astype(jnp.float32), ref_f32,
                        atol=2.5e-1, rtol=2.5e-1), float(diff32)

    print("KERNEL_OK")
</pallas_src>

<mosaic_0001>
module attributes {stable_mosaic.version = 11 : i64} {
  func.func @autoencoder_kernel(%arg0: i32, %arg1: memref<512x256xbf16, #tpu.memory_space<vmem>>, %arg2: memref<256x128xbf16, #tpu.memory_space<vmem>>, %arg3: memref<1x128xf32, #tpu.memory_space<vmem>>, %arg4: memref<128x64xbf16, #tpu.memory_space<vmem>>, %arg5: memref<1x64xf32, #tpu.memory_space<vmem>>, %arg6: memref<64x32xbf16, #tpu.memory_space<vmem>>, %arg7: memref<1x32xf32, #tpu.memory_space<vmem>>, %arg8: memref<32x32xbf16, #tpu.memory_space<vmem>>, %arg9: memref<1x32xf32, #tpu.memory_space<vmem>>, %arg10: memref<32x64xbf16, #tpu.memory_space<vmem>>, %arg11: memref<1x64xf32, #tpu.memory_space<vmem>>, %arg12: memref<64x128xbf16, #tpu.memory_space<vmem>>, %arg13: memref<1x128xf32, #tpu.memory_space<vmem>>, %arg14: memref<128x256xbf16, #tpu.memory_space<vmem>>, %arg15: memref<1x256xf32, #tpu.memory_space<vmem>>, %arg16: memref<512x256xbf16, #tpu.memory_space<vmem>>) attributes {dimension_semantics = [#tpu.dimension_semantics<parallel>], iteration_bounds = array<i64: 2>, scalar_prefetch = 0 : i64, scratch_operands = 0 : i64, tpu.core_type = #tpu.core_type<tc>, window_params = [{transform_indices = @transform_0, window_bounds = array<i64: 512, 256>}, {pipeline_mode = #tpu.pipeline_mode<synchronous>, transform_indices = @transform_1, window_bounds = array<i64: 256, 128>}, {pipeline_mode = #tpu.pipeline_mode<synchronous>, transform_indices = @transform_2, window_bounds = array<i64: 1, 128>}, {pipeline_mode = #tpu.pipeline_mode<synchronous>, transform_indices = @transform_3, window_bounds = array<i64: 128, 64>}, {pipeline_mode = #tpu.pipeline_mode<synchronous>, transform_indices = @transform_4, window_bounds = array<i64: 1, 64>}, {pipeline_mode = #tpu.pipeline_mode<synchronous>, transform_indices = @transform_5, window_bounds = array<i64: 64, 32>}, {pipeline_mode = #tpu.pipeline_mode<synchronous>, transform_indices = @transform_6, window_bounds = array<i64: 1, 32>}, {pipeline_mode = #tpu.pipeline_mode<synchronous>, transform_indices = @transform_7, window_bounds = array<i64: 32, 32>}, {pipeline_mode = #tpu.pipeline_mode<synchronous>, transform_indices = @transform_8, window_bounds = array<i64: 1, 32>}, {pipeline_mode = #tpu.pipeline_mode<synchronous>, transform_indices = @transform_9, window_bounds = array<i64: 32, 64>}, {pipeline_mode = #tpu.pipeline_mode<synchronous>, transform_indices = @transform_10, window_bounds = array<i64: 1, 64>}, {pipeline_mode = #tpu.pipeline_mode<synchronous>, transform_indices = @transform_11, window_bounds = array<i64: 64, 128>}, {pipeline_mode = #tpu.pipeline_mode<synchronous>, transform_indices = @transform_12, window_bounds = array<i64: 1, 128>}, {pipeline_mode = #tpu.pipeline_mode<synchronous>, transform_indices = @transform_13, window_bounds = array<i64: 128, 256>}, {pipeline_mode = #tpu.pipeline_mode<synchronous>, transform_indices = @transform_14, window_bounds = array<i64: 1, 256>}, {transform_indices = @transform_15, window_bounds = array<i64: 512, 256>}]} {
    %c0 = arith.constant 0 : index
    %c0_0 = arith.constant 0 : index
    %0 = vector.load %arg1[%c0, %c0_0] : memref<512x256xbf16, #tpu.memory_space<vmem>>, vector<512x256xbf16>
    %c0_1 = arith.constant 0 : index
    %c0_2 = arith.constant 0 : index
    %1 = vector.load %arg2[%c0_1, %c0_2] : memref<256x128xbf16, #tpu.memory_space<vmem>>, vector<256x128xbf16>
    %c0_3 = arith.constant 0 : index
    %c0_4 = arith.constant 0 : index
    %2 = vector.load %arg3[%c0_3, %c0_4] : memref<1x128xf32, #tpu.memory_space<vmem>>, vector<1x128xf32>
    %cst = arith.constant dense<0.000000e+00> : vector<512x128xf32>
    %3 = tpu.matmul %0, %1, %cst {dimension_numbers = #tpu.dot_dimension_numbers<[1], [0], [0], [1], [0, 0, 1, 1], [], []>} : vector<512x256xbf16>, vector<256x128xbf16>, vector<512x128xf32> -> vector<512x128xf32>
    %4 = vector.broadcast %2 : vector<1x128xf32> to vector<512x128xf32>
    %5 = arith.addf %3, %4 : vector<512x128xf32>
    %6 = arith.truncf %5 : vector<512x128xf32> to vector<512x128xbf16>
    %7 = math.tanh %6 : vector<512x128xbf16>
    %c0_5 = arith.constant 0 : index
    %c0_6 = arith.constant 0 : index
    %8 = vector.load %arg4[%c0_5, %c0_6] : memref<128x64xbf16, #tpu.memory_space<vmem>>, vector<128x64xbf16>
    %c0_7 = arith.constant 0 : index
    %c0_8 = arith.constant 0 : index
    %9 = vector.load %arg5[%c0_7, %c0_8] : memref<1x64xf32, #tpu.memory_space<vmem>>, vector<1x64xf32>
    %cst_9 = arith.constant dense<0.000000e+00> : vector<512x64xf32>
    %10 = tpu.matmul %7, %8, %cst_9 {dimension_numbers = #tpu.dot_dimension_numbers<[1], [0], [0], [1], [0, 0, 1, 1], [], []>} : vector<512x128xbf16>, vector<128x64xbf16>, vector<512x64xf32> -> vector<512x64xf32>
    %11 = vector.broadcast %9 : vector<1x64xf32> to vector<512x64xf32>
    %12 = arith.addf %10, %11 : vector<512x64xf32>
    %13 = arith.truncf %12 : vector<512x64xf32> to vector<512x64xbf16>
    %14 = math.tanh %13 : vector<512x64xbf16>
    %c0_10 = arith.constant 0 : index
    %c0_11 = arith.constant 0 : index
    %15 = vector.load %arg6[%c0_10, %c0_11] : memref<64x32xbf16, #tpu.memory_space<vmem>>, vector<64x32xbf16>
    %c0_12 = arith.constant 0 : index
    %c0_13 = arith.constant 0 : index
    %16 = vector.load %arg7[%c0_12, %c0_13] : memref<1x32xf32, #tpu.memory_space<vmem>>, vector<1x32xf32>
    %cst_14 = arith.constant dense<0.000000e+00> : vector<512x32xf32>
    %17 = tpu.matmul %14, %15, %cst_14 {dimension_numbers = #tpu.dot_dimension_numbers<[1], [0], [0], [1], [0, 0, 1, 1], [], []>} : vector<512x64xbf16>, vector<64x32xbf16>, vector<512x32xf32> -> vector<512x32xf32>
    %18 = vector.broadcast %16 : vector<1x32xf32> to vector<512x32xf32>
    %19 = arith.addf %17, %18 : vector<512x32xf32>
    %20 = arith.truncf %19 : vector<512x32xf32> to vector<512x32xbf16>
    %21 = math.tanh %20 : vector<512x32xbf16>
    %c0_15 = arith.constant 0 : index
    %c0_16 = arith.constant 0 : index
    %22 = vector.load %arg8[%c0_15, %c0_16] : memref<32x32xbf16, #tpu.memory_space<vmem>>, vector<32x32xbf16>
    %c0_17 = arith.constant 0 : index
    %c0_18 = arith.constant 0 : index
    %23 = vector.load %arg9[%c0_17, %c0_18] : memref<1x32xf32, #tpu.memory_space<vmem>>, vector<1x32xf32>
    %cst_19 = arith.constant dense<0.000000e+00> : vector<512x32xf32>
    %24 = tpu.matmul %21, %22, %cst_19 {dimension_numbers = #tpu.dot_dimension_numbers<[1], [0], [0], [1], [0, 0, 1, 1], [], []>} : vector<512x32xbf16>, vector<32x32xbf16>, vector<512x32xf32> -> vector<512x32xf32>
    %25 = vector.broadcast %23 : vector<1x32xf32> to vector<512x32xf32>
    %26 = arith.addf %24, %25 : vector<512x32xf32>
    %27 = arith.truncf %26 : vector<512x32xf32> to vector<512x32xbf16>
    %28 = math.tanh %27 : vector<512x32xbf16>
    %c0_20 = arith.constant 0 : index
    %c0_21 = arith.constant 0 : index
    %29 = vector.load %arg10[%c0_20, %c0_21] : memref<32x64xbf16, #tpu.memory_space<vmem>>, vector<32x64xbf16>
    %c0_22 = arith.constant 0 : index
    %c0_23 = arith.constant 0 : index
    %30 = vector.load %arg11[%c0_22, %c0_23] : memref<1x64xf32, #tpu.memory_space<vmem>>, vector<1x64xf32>
    %cst_24 = arith.constant dense<0.000000e+00> : vector<512x64xf32>
    %31 = tpu.matmul %28, %29, %cst_24 {dimension_numbers = #tpu.dot_dimension_numbers<[1], [0], [0], [1], [0, 0, 1, 1], [], []>} : vector<512x32xbf16>, vector<32x64xbf16>, vector<512x64xf32> -> vector<512x64xf32>
    %32 = vector.broadcast %30 : vector<1x64xf32> to vector<512x64xf32>
    %33 = arith.addf %31, %32 : vector<512x64xf32>
    %34 = arith.truncf %33 : vector<512x64xf32> to vector<512x64xbf16>
    %35 = math.tanh %34 : vector<512x64xbf16>
    %c0_25 = arith.constant 0 : index
    %c0_26 = arith.constant 0 : index
    %36 = vector.load %arg12[%c0_25, %c0_26] : memref<64x128xbf16, #tpu.memory_space<vmem>>, vector<64x128xbf16>
    %c0_27 = arith.constant 0 : index
    %c0_28 = arith.constant 0 : index
    %37 = vector.load %arg13[%c0_27, %c0_28] : memref<1x128xf32, #tpu.memory_space<vmem>>, vector<1x128xf32>
    %cst_29 = arith.constant dense<0.000000e+00> : vector<512x128xf32>
    %38 = tpu.matmul %35, %36, %cst_29 {dimension_numbers = #tpu.dot_dimension_numbers<[1], [0], [0], [1], [0, 0, 1, 1], [], []>} : vector<512x64xbf16>, vector<64x128xbf16>, vector<512x128xf32> -> vector<512x128xf32>
    %39 = vector.broadcast %37 : vector<1x128xf32> to vector<512x128xf32>
    %40 = arith.addf %38, %39 : vector<512x128xf32>
    %41 = arith.truncf %40 : vector<512x128xf32> to vector<512x128xbf16>
    %42 = math.tanh %41 : vector<512x128xbf16>
    %c0_30 = arith.constant 0 : index
    %c0_31 = arith.constant 0 : index
    %43 = vector.load %arg14[%c0_30, %c0_31] : memref<128x256xbf16, #tpu.memory_space<vmem>>, vector<128x256xbf16>
    %c0_32 = arith.constant 0 : index
    %c0_33 = arith.constant 0 : index
    %44 = vector.load %arg15[%c0_32, %c0_33] : memref<1x256xf32, #tpu.memory_space<vmem>>, vector<1x256xf32>
    %cst_34 = arith.constant dense<0.000000e+00> : vector<512x256xf32>
    %45 = tpu.matmul %42, %43, %cst_34 {dimension_numbers = #tpu.dot_dimension_numbers<[1], [0], [0], [1], [0, 0, 1, 1], [], []>} : vector<512x128xbf16>, vector<128x256xbf16>, vector<512x256xf32> -> vector<512x256xf32>
    %46 = vector.broadcast %44 : vector<1x256xf32> to vector<512x256xf32>
    %47 = arith.addf %45, %46 : vector<512x256xf32>
    %48 = arith.truncf %47 : vector<512x256xf32> to vector<512x256xbf16>
    %c0_35 = arith.constant 0 : index
    %c0_36 = arith.constant 0 : index
    %49 = vector.load %arg16[%c0_35, %c0_36] : memref<512x256xbf16, #tpu.memory_space<vmem>>, vector<512x256xbf16>
    tpu.vector_store %arg16[%c0_35, %c0_36], %48 {strides = array<i32>} : memref<512x256xbf16, #tpu.memory_space<vmem>>, vector<512x256xbf16>,
    return
  }
  func.func @transform_0(%arg0: i32) -> (i32, i32) {
    %c0_i32 = arith.constant 0 : i32
    %c0_i32_0 = arith.constant 0 : i32
    return %arg0, %c0_i32 : i32, i32
  }
  func.func @transform_1(%arg0: i32) -> (i32, i32) {
    %c0_i32 = arith.constant 0 : i32
    %c0_i32_0 = arith.constant 0 : i32
    %c0_i32_1 = arith.constant 0 : i32
    return %c0_i32, %c0_i32_0 : i32, i32
  }
  func.func @transform_2(%arg0: i32) -> (i32, i32) {
    %c0_i32 = arith.constant 0 : i32
    %c0_i32_0 = arith.constant 0 : i32
    %c0_i32_1 = arith.constant 0 : i32
    return %c0_i32, %c0_i32_0 : i32, i32
  }
  func.func @transform_3(%arg0: i32) -> (i32, i32) {
    %c0_i32 = arith.constant 0 : i32
    %c0_i32_0 = arith.constant 0 : i32
    %c0_i32_1 = arith.constant 0 : i32
    return %c0_i32, %c0_i32_0 : i32, i32
  }
  func.func @transform_4(%arg0: i32) -> (i32, i32) {
    %c0_i32 = arith.constant 0 : i32
    %c0_i32_0 = arith.constant 0 : i32
    %c0_i32_1 = arith.constant 0 : i32
    return %c0_i32, %c0_i32_0 : i32, i32
  }
  func.func @transform_5(%arg0: i32) -> (i32, i32) {
    %c0_i32 = arith.constant 0 : i32
    %c0_i32_0 = arith.constant 0 : i32
    %c0_i32_1 = arith.constant 0 : i32
    return %c0_i32, %c0_i32_0 : i32, i32
  }
  func.func @transform_6(%arg0: i32) -> (i32, i32) {
    %c0_i32 = arith.constant 0 : i32
    %c0_i32_0 = arith.constant 0 : i32
    %c0_i32_1 = arith.constant 0 : i32
    return %c0_i32, %c0_i32_0 : i32, i32
  }
  func.func @transform_7(%arg0: i32) -> (i32, i32) {
    %c0_i32 = arith.constant 0 : i32
    %c0_i32_0 = arith.constant 0 : i32
    %c0_i32_1 = arith.constant 0 : i32
    return %c0_i32, %c0_i32_0 : i32, i32
  }
  func.func @transform_8(%arg0: i32) -> (i32, i32) {
    %c0_i32 = arith.constant 0 : i32
    %c0_i32_0 = arith.constant 0 : i32
    %c0_i32_1 = arith.constant 0 : i32
    return %c0_i32, %c0_i32_0 : i32, i32
  }
  func.func @transform_9(%arg0: i32) -> (i32, i32) {
    %c0_i32 = arith.constant 0 : i32
    %c0_i32_0 = arith.constant 0 : i32
    %c0_i32_1 = arith.constant 0 : i32
    return %c0_i32, %c0_i32_0 : i32, i32
  }
  func.func @transform_10(%arg0: i32) -> (i32, i32) {
    %c0_i32 = arith.constant 0 : i32
    %c0_i32_0 = arith.constant 0 : i32
    %c0_i32_1 = arith.constant 0 : i32
    return %c0_i32, %c0_i32_0 : i32, i32
  }
  func.func @transform_11(%arg0: i32) -> (i32, i32) {
    %c0_i32 = arith.constant 0 : i32
    %c0_i32_0 = arith.constant 0 : i32
    %c0_i32_1 = arith.constant 0 : i32
    return %c0_i32, %c0_i32_0 : i32, i32
  }
  func.func @transform_12(%arg0: i32) -> (i32, i32) {
    %c0_i32 = arith.constant 0 : i32
    %c0_i32_0 = arith.constant 0 : i32
    %c0_i32_1 = arith.constant 0 : i32
    return %c0_i32, %c0_i32_0 : i32, i32
  }
  func.func @transform_13(%arg0: i32) -> (i32, i32) {
    %c0_i32 = arith.constant 0 : i32
    %c0_i32_0 = arith.constant 0 : i32
    %c0_i32_1 = arith.constant 0 : i32
    return %c0_i32, %c0_i32_0 : i32, i32
  }
  func.func @transform_14(%arg0: i32) -> (i32, i32) {
    %c0_i32 = arith.constant 0 : i32
    %c0_i32_0 = arith.constant 0 : i32
    %c0_i32_1 = arith.constant 0 : i32
    return %c0_i32, %c0_i32_0 : i32, i32
  }
  func.func @transform_15(%arg0: i32) -> (i32, i32) {
    %c0_i32 = arith.constant 0 : i32
    %c0_i32_0 = arith.constant 0 : i32
    return %arg0, %c0_i32 : i32, i32
  }
}

</mosaic_0001>

<bundles_post_ra>
// kernel: autoencoder_forward.1
= control target key start
LH: loop header
LB: loop body
LE: loop exit
PB: predicated region body
PF: predicated region fallthrough
CT: control target
= control target key end

     0   :  { %s8154_s0 = inlined_call_operand.hbm [shape: bf16[1024,256], index: 0, kind: input, shape index: {}]   ;;  %s8155_s1 = inlined_call_operand.vmem [shape: bf16[256,128], index: 1, kind: input, shape index: {}]   ;;  %s8156_s2 = inlined_call_operand.hbm [shape: f32[1,128], index: 2, kind: input, shape index: {}]   ;;  %s8157_s3 = inlined_call_operand.vmem [shape: bf16[128,64], index: 3, kind: input, shape index: {}]   ;;  %s8158_s4 = inlined_call_operand.hbm [shape: f32[1,64], index: 4, kind: input, shape index: {}]   ;;  %s8159_s5 = inlined_call_operand.vmem [shape: bf16[64,32], index: 5, kind: input, shape index: {}]   ;;  %s8160_s6 = inlined_call_operand.hbm [shape: f32[1,32], index: 6, kind: input, shape index: {}]   ;;  %s8161_s7 = inlined_call_operand.hbm [shape: bf16[32,32], index: 7, kind: input, shape index: {}]   ;;  %s8162_s8 = inlined_call_operand.hbm [shape: f32[1,32], index: 8, kind: input, shape index: {}]   ;;  %s8163_s9 = inlined_call_operand.vmem [shape: bf16[32,64], index: 9, kind: input, shape index: {}]   ;;  %s8164_s10 = inlined_call_operand.vmem [shape: f32[1,64], index: 10, kind: input, shape index: {}]   ;;  %s8165_s11 = inlined_call_operand.vmem [shape: bf16[64,128], index: 11, kind: input, shape index: {}]   ;;  %s8166_s12 = inlined_call_operand.vmem [shape: f32[1,128], index: 12, kind: input, shape index: {}]   ;;  %s8167_s13 = inlined_call_operand.hbm [shape: bf16[128,256], index: 13, kind: input, shape index: {}]   ;;  %s8168_s14 = inlined_call_operand.vmem [shape: f32[1,256], index: 14, kind: input, shape index: {}]   ;;  %s8169_s15 = inlined_call_operand.hbm [shape: bf16[1024,256], index: 15, kind: output, shape index: {}]  }
   0x1   :  { %8178 = sst [smem:[#allocation20_spill]] %s8154_s0 }
   0x2   :  { %8179 = sst [smem:[#allocation21_spill]] %s8156_s2 }
   0x3   :  { %8180 = sst [smem:[#allocation22_spill]] %s8163_s9 }
   0x4   :  { %8181 = sst [smem:[#allocation23_spill]] %s8164_s10 }
   0x5   :  { %8182 = sst [smem:[#allocation24_spill]] %s8165_s11 }
   0x6   :  { %8183 = sst [smem:[#allocation25_spill]] %s8166_s12 }
   0x7   :  { %8184 = sst [smem:[#allocation26_spill]] %s8168_s14 }
   0x8   :  { %8185 = sst [smem:[#allocation27_spill]] %s8169_s15 }
   0x9   :  { %20 = vsyncpa [#allocation3], 0 }
   0xa   :  { %22 = vsyncpa [#allocation3 + $0x1], 0 }
   0xb   :  { %23 = vsyncpa [#allocation6], 0 }
   0xc   :  { %24 = vsyncpa [#allocation9], 0 }
   0xd   :  { %25 = vsyncpa [#allocation12], 0 }
   0xe   :  { %26 = vsyncpa [#allocation4], 0 }
   0xf   :  { %28 = vsyncpa [#allocation4 + $0x1], 0  ;;  %s6849_s18 = smov 0   ;;  %s6851_s19 = smov 0  }
  0x10   :  { %s6853_s20 = smov 0   ;;  %s6855_s21 = smov 0  }
  0x11 LB: > { %s6754_s22 = smov [#allocation5]   ;;  %s6870_s24 = sadd.s32 4294967295, %s6752_s21   ;;  %s6752_s21 = sphi %s6855_s21, %s8219_s21   ;;  %s6748_s20 = sphi %s6853_s20, %s8218_s20   ;;  %s6744_s19 = sphi %s6851_s19, %s8217_s19   ;;  %s6740_s18 = sphi %s6849_s18, %s8216_s18  }
  0x12   : > { %s401_s23 = sshll.u32 %s6754_s22, 4  ;;  %p4869_p0 = scmp.ge.s32.totalorder %s6752_s21, 1  ;;  %s6875_s23 = int_to_ptr.vmem [resolvable:$true] %s401_s23 }
  0x13   : > { %p8173_p1 = scmp.eq.s32.totalorder %s6870_s24, 0  ;;  %p385_p2 = scmp.lt.s32.totalorder %s6752_s21, 3 }
  0x14   : > { %s6755_s26 = smov [#allocation8]   ;;  %s6756_s28 = smov [#allocation11]  }
  0x15   : > { %p6877_p3 = pnand %p4869_p0, %p385_p2  ;;  %s429_s27 = sshll.u32 %s6755_s26, 4  ;;  %s6884_s27 = int_to_ptr.vmem [resolvable:$true] %s429_s27 }
  0x16   : > { %s453_s29 = sshll.u32 %s6756_s28, 4  ;;  %s6757_s16 = smov [#allocation7]   ;;  %s6892_s29 = int_to_ptr.vmem [resolvable:$true] %s453_s29 }
  0x17   : > { %s8186_s25 = scalar_select %p6877_p3, 1, 0 }
  0x18   : > { %p5850_p5 = pneg %p6877_p3  ;;  %s6894_s17 = sshll.u32 %s6757_s16, 4  ;;  %s416_s17 = int_to_ptr.vmem [resolvable:$true] %s6894_s17 }
  0x19   : > { %s8188_s2 = sld [smem:[#allocation21_spill]] }
  0x1a   : > { %p6888_p6 = pnand %p5850_p5, %p8173_p1 }
  0x1c   : > { %p6904_p8 = pneg %p6888_p6 }
  0x1f   : > { %s6476_s14 = scalar_lea.hbm %s8188_s2, 16 }
  0x20   : > { %p6477_p7 = scmp.ne.s32.totalorder %s8188_s2, %s6476_s14  ;;  %p6483_p11 = scmp.lt.u32.totalorder %s6476_s14, %s8188_s2 }
  0x22   : > { %p6479_p9 = pnand %p6904_p8, %p6477_p7 }
  0x24   : > { %p6480_p10 = pneg %p6479_p9 }
  0x26   : > { %p6485_p12 = pnand %p6483_p11, %p6480_p10 }
  0x28   : > { %6488 = shalt.err (!%p6485_p12)
}
  0x29   : > { %s6489_s12 = scalar_lea.vmem %s6875_s23, 16  ;;  %s6496_s15 = scalar_lea.vmem %s6875_s23, 32 }
  0x2a   : > { %p6490_p13 = scmp.ne.s32.totalorder %s6875_s23, %s6489_s12  ;;  %p6497_p5 = scmp.lt.s32.totalorder %s6875_s23, %s6875_s23 }
  0x2b   : > { %p6498_p7 = scmp.lt.s32.totalorder %s6496_s15, %s6489_s12 }
  0x2c   : > { %p6492_p0 = pnand %p6490_p13, %p6904_p8 }
  0x2d   : > { %p6499_p9 = por %p6498_p7, %p6497_p5 }
  0x2e   : > { %p6493_p2 = pneg %p6492_p0 }
  0x30   : > { %p6500_p4 = pnand %p6499_p9, %p6493_p2 }
  0x32   : > { %6503 = shalt.err (!%p6500_p4)
}
  0x33   : > { %5853 = dma.hbm_to_vmem [thread:$0]  (!%p6888_p6), %s8188_s2, 16, %s6875_s23, [#allocation6]  }
  0x34   : > { %s6504_s16 = scalar_lea.hbm %s8160_s6, 16 }
  0x35   : > { %p6505_p10 = scmp.ne.s32.totalorder %s8160_s6, %s6504_s16  ;;  %p6511_p4 = scmp.lt.u32.totalorder %s6504_s16, %s8160_s6 }
  0x37   : > { %p6507_p11 = pnand %p6505_p10, %p6904_p8 }
  0x39   : > { %p6508_p12 = pneg %p6507_p11 }
  0x3b   : > { %p6513_p13 = pnand %p6511_p4, %p6508_p12 }
  0x3d   : > { %6516 = shalt.err (!%p6513_p13)
}
  0x3e   : > { %s6517_s23 = scalar_lea.vmem %s6884_s27, 16  ;;  %s6524_s9 = scalar_lea.vmem %s6884_s27, 32 }
  0x3f   : > { %p6518_p0 = scmp.ne.s32.totalorder %s6884_s27, %s6517_s23  ;;  %p6525_p7 = scmp.lt.s32.totalorder %s6884_s27, %s6884_s27 }
  0x40   : > { %p6526_p9 = scmp.lt.s32.totalorder %s6524_s9, %s6517_s23 }
  0x41   : > { %p6520_p2 = pnand %p6518_p0, %p6904_p8 }
  0x42   : > { %p6527_p10 = por %p6526_p9, %p6525_p7 }
  0x43   : > { %p6521_p5 = pneg %p6520_p2 }
  0x45   : > { %p6528_p11 = pnand %p6527_p10, %p6521_p5 }
  0x47   : > { %6531 = shalt.err (!%p6528_p11)
}
  0x48   : > { %5859 = dma.hbm_to_vmem [thread:$0]  (!%p6888_p6), %s8160_s6, 16, %s6884_s27, [#allocation9]  }
  0x49   : > { %s6532_s26 = scalar_lea.hbm %s8162_s8, 16 }
  0x4a   : > { %p6533_p12 = scmp.ne.s32.totalorder %s8162_s8, %s6532_s26  ;;  %p6539_p0 = scmp.lt.u32.totalorder %s6532_s26, %s8162_s8 }
  0x4c   : > { %p6535_p4 = pnand %p6533_p12, %p6904_p8 }
  0x4e   : > { %p6536_p13 = pneg %p6535_p4 }
  0x50   : > { %p6541_p2 = pnand %p6539_p0, %p6536_p13 }
  0x52   : > { %6544 = shalt.err (!%p6541_p2)
}
  0x53   : > { %s6545_s27 = scalar_lea.vmem %s6892_s29, 16  ;;  %s6552_s9 = scalar_lea.vmem %s6892_s29, 32 }
  0x54   : > { %p6546_p5 = scmp.ne.s32.totalorder %s6892_s29, %s6545_s27  ;;  %p6553_p10 = scmp.lt.s32.totalorder %s6892_s29, %s6892_s29 }
  0x55   : > { %p6554_p11 = scmp.lt.s32.totalorder %s6552_s9, %s6545_s27 }
  0x56   : > { %p6548_p7 = pnand %p6546_p5, %p6904_p8 }
  0x57   : > { %p6555_p12 = por %p6554_p11, %p6553_p10 }
  0x58   : > { %p6549_p9 = pneg %p6548_p7 }
  0x5a   : > { %p6556_p4 = pnand %p6555_p12, %p6549_p9 }
  0x5c   : > { %6559 = shalt.err (!%p6556_p4)
}
  0x5d   : > { %5865 = dma.hbm_to_vmem [thread:$0]  (!%p6888_p6), %s8162_s8, 16, %s6892_s29, [#allocation12]  }
  0x5e   : > { %s6758_s14 = smov [#allocation10]   ;;  %s6560_s12 = scalar_lea.hbm %s8158_s4, 16 }
  0x5f   : > { %s439_s22 = sshll.u32 %s6758_s14, 4  ;;  %p6561_p13 = scmp.ne.s32.totalorder %s8158_s4, %s6560_s12  ;;  %s440_s22 = int_to_ptr.vmem [resolvable:$true] %s439_s22 }
  0x60   : > { %p6567_p5 = scmp.lt.u32.totalorder %s6560_s12, %s8158_s4 }
  0x61   : > { %p6563_p0 = pnand %p6561_p13, %p6904_p8 }
  0x63   : > { %p6564_p2 = pneg %p6563_p0 }
  0x65   : > { %p6569_p7 = pnand %p6567_p5, %p6564_p2 }
  0x67   : > { %6572 = shalt.err (!%p6569_p7)
}
  0x68   : > { %s6573_s29 = scalar_lea.vmem %s416_s17, 16  ;;  %s6580_s11 = scalar_lea.vmem %s416_s17, 32 }
  0x69   : > { %p6574_p9 = scmp.ne.s32.totalorder %s416_s17, %s6573_s29  ;;  %p6581_p12 = scmp.lt.s32.totalorder %s416_s17, %s416_s17 }
  0x6a   : > { %p6582_p4 = scmp.lt.s32.totalorder %s6580_s11, %s6573_s29 }
  0x6b   : > { %p6576_p10 = pnand %p6574_p9, %p6904_p8 }
  0x6c   : > { %p6583_p1 = por %p6582_p4, %p6581_p12 }
  0x6d   : > { %p6577_p11 = pneg %p6576_p10 }
  0x6f   : > { %p6584_p3 = pnand %p6583_p1, %p6577_p11 }
  0x71   : > { %6587 = shalt.err (!%p6584_p3)
}
  0x72   : > { %5856 = dma.hbm_to_vmem [thread:$0]  (!%p6888_p6), %s8158_s4, 16, %s416_s17, [#allocation6]  }
  0x73   : > { %s6588_s12 = scalar_lea.hbm %s8161_s7, 256 }
  0x74   : > { %p6589_p13 = scmp.ne.s32.totalorder %s8161_s7, %s6588_s12  ;;  %p6595_p3 = scmp.lt.u32.totalorder %s6588_s12, %s8161_s7 }
  0x76   : > { %p6591_p0 = pnand %p6589_p13, %p6904_p8 }
  0x78   : > { %p6592_p1 = pneg %p6591_p0 }
  0x7a   : > { %p6597_p2 = pnand %p6595_p3, %p6592_p1 }
  0x7c   : > { %6600 = shalt.err (!%p6597_p2)
}
  0x7d   : > { %s6601_s29 = scalar_lea.vmem %s440_s22, 256  ;;  %p6609_p10 = scmp.lt.s32.totalorder %s440_s22, %s440_s22 }
  0x7e   : > { %p6602_p5 = scmp.ne.s32.totalorder %s440_s22, %s6601_s29  ;;  %p6610_p11 = scmp.lt.s32.totalorder %s6601_s29, %s6601_s29 }
  0x80   : > { %p6604_p7 = pnand %p6602_p5, %p6904_p8  ;;  %p6611_p12 = por %p6610_p11, %p6609_p10 }
  0x82   : > { %p6605_p9 = pneg %p6604_p7 }
  0x84   : > { %p6612_p4 = pnand %p6611_p12, %p6605_p9 }
  0x86   : > { %6615 = shalt.err (!%p6612_p4)
}
  0x87   : > { %s6759_s17 = smov 64   ;;  %s6760_s11 = smov 4  }
  0x88   : > { %5862 = dma.hbm_to_vmem [thread:$0]  (!%p6888_p6), %s8161_s7, 256, %s440_s22, [#allocation9], %s6759_s17, %s6759_s17, %s6760_s11  }
  0x89   : > { %s6761_s26 = smov [#allocation13]   ;;  %s6616_s23 = scalar_lea.hbm %s8167_s13, 2048 }
  0x8a   : > { %s475_s16 = sshll.u32 %s6761_s26, 4  ;;  %p6617_p13 = scmp.ne.s32.totalorder %s8167_s13, %s6616_s23  ;;  %s476_s16 = int_to_ptr.vmem [resolvable:$true] %s475_s16 }
  0x8b   : > { %p6623_p3 = scmp.lt.u32.totalorder %s6616_s23, %s8167_s13 }
  0x8c   : > { %p6619_p0 = pnand %p6617_p13, %p6904_p8 }
  0x8e   : > { %p6620_p1 = pneg %p6619_p0 }
  0x90   : > { %p6625_p2 = pnand %p6623_p3, %p6620_p1 }
  0x92   : > { %6628 = shalt.err (!%p6625_p2)
}
  0x93   : > { %s6629_s22 = scalar_lea.vmem %s476_s16, 2048  ;;  %p6637_p10 = scmp.lt.s32.totalorder %s476_s16, %s476_s16 }
  0x94   : > { %p6630_p5 = scmp.ne.s32.totalorder %s476_s16, %s6629_s22  ;;  %p6638_p11 = scmp.lt.s32.totalorder %s6629_s22, %s6629_s22 }
  0x96   : > { %p6632_p7 = pnand %p6630_p5, %p6904_p8  ;;  %p6639_p12 = por %p6638_p11, %p6637_p10 }
  0x98   : > { %p6633_p9 = pneg %p6632_p7 }
  0x9a   : > { %p6640_p4 = pnand %p6639_p12, %p6633_p9 }
  0x9c   : > { %6643 = shalt.err (!%p6640_p4)
}
  0x9d   : > { %s8175_s17 = smov 128   ;;  %s8176_s2 = smov 8  }
  0x9e   : > { %5868 = dma.hbm_to_vmem [thread:$0]  (!%p6888_p6), %s8167_s13, 2048, %s476_s16, [#allocation12], %s8175_s17, %s8175_s17, %s8176_s2  }
  0x9f   : > { %s4868_s10 = sadd.s32 4294967294, %s6752_s21   ;;  %s7034_s14 = sadd.s32 1, %s6752_s21  }
  0xa0   : > { %s38_s26 = ssub.s32 %s6752_s21, %s7034_s14  ;;  %s41_s12 = sadd.s32 1, %s6748_s20 }
  0xa1   : > { %p39_p8 = scmp.eq.s32.totalorder %s38_s26, 0  ;;  %p48_p13 = scmp.ne.s32.totalorder %s6748_s20, %s6744_s19 }
  0xa2   : > { %p49_p0 = scmp.eq.s32.totalorder %s6752_s21, 0  ;;  %p54_p1 = scmp.ne.s32.totalorder %s6744_s19, %s6740_s18 }
  0xa3   : > { %s7045_s30 = scalar_select %p39_p8, %s6748_s20, %s41_s12  }
  0xa4   : > { %p7047_p3 = por %p49_p0, %p48_p13  ;;  %p8191_p2 = scmp.eq.s32.totalorder %s6870_s24, 0 }
  0xa5   : > { %p372_p5 = scmp.eq.s32.totalorder %s6870_s24, 1  ;;  %p378_p7 = scmp.eq.s32.totalorder %s4868_s10, 1 }
  0xa6   : > { %p7053_p6 = por %p8191_p2, %p54_p1  ;;  %p5883_p9 = scmp.lt.s32.totalorder %s6752_s21, 2 }
  0xa7   : > { %s492_s23 = sand.u32 1, %s6748_s20   ;;  %p7060_p10 = por %p372_p5, %p48_p13 }
  0xa8   : > { %p7064_p11 = por %p378_p7, %p54_p1  ;;  %s4877_s29 = sshll.u32 %s492_s23, 9 }
  0xa9   : > { %s8193_s27 = scalar_select %p7060_p10, 1, 0 }
  0xaa   : > { %s8194_s9 = scalar_select %p7064_p11, 1, 0 }
  0xab   : > { %s5211_s22 = sshll.u32 %s6752_s21, 13  ;;  %s8195_s0 = sld [smem:[#allocation20_spill]] }
  0xac   : > { %s496_s10 = scalar_lea.vmem [#allocation2], %s4877_s29  ;;  %p7078_p12 = pnand %p5883_p9, %p7047_p3 }
  0xad   : > { %s504_s12 = sshll.u32 %s496_s10, 4  ;;  %s7082_s2 = scalar_lea.sflag [#allocation3], %s492_s23  ;;  %s7074_s12 = int_to_ptr.vmem [resolvable:$true] %s504_s12 }
  0xae   : > { %p6646_p8 = pneg %p7078_p12 }
  0xb1   : > { %s7072_s26 = scalar_lea.hbm %s8195_s0, %s5211_s22  ;;  %s6649_s15 = scalar_lea.hbm %s8195_s0, 16384 }
  0xb2   : > { %s6644_s28 = scalar_lea.hbm %s7072_s26, 8192  ;;  %p6650_p1 = scmp.lt.u32.totalorder %s7072_s26, %s8195_s0 }
  0xb3   : > { %p6645_p4 = scmp.ne.s32.totalorder %s7072_s26, %s6644_s28  ;;  %p6651_p3 = scmp.lt.u32.totalorder %s6649_s15, %s6644_s28 }
  0xb4   : > { %p6653_p5 = scmp.lt.u32.totalorder %s6644_s28, %s7072_s26 }
  0xb5   : > { %p6647_p13 = pnand %p6646_p8, %p6645_p4  ;;  %p6652_p2 = por %p6651_p3, %p6650_p1 }
  0xb7   : > { %p6648_p0 = pneg %p6647_p13  ;;  %p6654_p7 = por %p6653_p5, %p6652_p2 }
  0xb9   : > { %p6655_p9 = pnand %p6654_p7, %p6648_p0 }
  0xbb   : > { %6658 = shalt.err (!%p6655_p9)
}
  0xbc   : > { %s6659_s23 = scalar_lea.vmem %s7074_s12, 8192  ;;  %s6764_s29 = smov [#allocation2]  }
  0xbd   : > { %p6660_p4 = scmp.ne.s32.totalorder %s7074_s12, %s6659_s23  ;;  %s6664_s22 = sshll.u32 %s6764_s29, 4  ;;  %s6665_s22 = int_to_ptr.vmem [resolvable:$false] %s6664_s22 }
  0xbe   : > { %s6666_s11 = scalar_lea.vmem %s6665_s22, 16384  ;;  %p6667_p10 = scmp.lt.s32.totalorder %s7074_s12, %s6665_s22 }
  0xbf   : > { %p6662_p13 = pnand %p6660_p4, %p6646_p8  ;;  %p6668_p1 = scmp.lt.s32.totalorder %s6666_s11, %s6659_s23 }
  0xc1   : > { %p6663_p11 = pneg %p6662_p13  ;;  %p6669_p3 = por %p6668_p1, %p6667_p10 }
  0xc3   : > { %p6670_p2 = pnand %p6669_p3, %p6663_p11 }
  0xc5   : > { %6673 = shalt.err (!%p6670_p2)
}
  0xc6   : > { %s8197_s28 = smov 8   ;;  %s8198_s15 = smov 128  }
  0xc7   : > { %5872 = dma.hbm_to_vmem [thread:$0]  (!%p7078_p12), %s7072_s26, 8192, %s7074_s12, %s7082_s2, %s8198_s15, %s8198_s15, %s8197_s28  }
  0xc8   : > { %p8199_p8 = scmp.ne.s32.totalorder %s8186_s25, 0 }
  0xc9   : > { %s7116_s10 = sand.u32 (!%p8199_p8), 1, %s6744_s19  }
  0xca   : > { %516 = sbr.rel (%p8199_p8) target bundleno = 2181 (0x885), region = 80  ;;  %s4882_s23 = sshll.u32 (!%p8199_p8), %s7116_s10, 9 }
  0xcb   : > { %s519_s29 = scalar_lea.sflag (!%p8199_p8), [#allocation3], %s7116_s10  ;;  %s7122_s17 = scalar_lea.vmem (!%p8199_p8), [#allocation2], %s4882_s23 }
  0xd1   : > { %6719 = dma.done.wait (%p7053_p6), %s519_s29, 8192  }
  0xd2   : > { %6721 = vsyncadd (%p7053_p6), %s519_s29, 4294959104  ;;  %p8200_p10 = scmp.eq.s32.totalorder %s6870_s24, 0 }
  0xd4   : > { %6723 = dma.done.wait (%p8200_p10), [#allocation6], 32   ;;  %p8201_p11 = pmov %p8200_p10 }
  0xd5   : > { %p8202_p12 = pmov %p8200_p10 }
  0xd6   : > { %6725 = vsyncadd (%p8201_p11), [#allocation6], 4294967264 }
  0xd7   : > { %6727 = dma.done.wait (%p8202_p12), [#allocation9], 272   ;;  %p8203_p0 = pmov %p8200_p10 }
  0xd9   : > { %6729 = vsyncadd (%p8203_p0), [#allocation9], 4294967024  ;;  %p8204_p5 = pmov %p8203_p0 }
  0xda   : > { %p8205_p7 = pmov %p8203_p0 }
  0xdb   : > { %6731 = dma.done.wait (%p8204_p5), [#allocation12], 2064  }
  0xdc   : > { %6733 = vsyncadd (%p8205_p7), [#allocation12], 4294965232  ;;  %v6765_v0 = vmov 0   ;;  %v5936_v1 = vld [vmem:[%s8155_s1] sm:$0xff]   ;;  %v5937_v2 = vld [vmem:[%s8155_s1 + $0x8] sm:$0xff]   ;;  %vm1931_vm0 = vcmask 523264  }
  0xdd   : > { %1115 = vmatprep.subr.bf16.mxu0 %v6765_v0  ;;  %v5938_v3 = vld [vmem:[%s8155_s1 + $0x10] sm:$0xff]   ;;  %v5939_v4 = vld [vmem:[%s8155_s1 + $0x18] sm:$0xff]   ;;  %v5940_v5 = vld [vmem:[%s8155_s1 + $0x20] sm:$0xff]   ;;  %s8206_s28 = sld [smem:[#allocation22_spill]]  ;;  %vm2404_vm1 = vcmask 261120   ;;  %s8207_s2 = sld [smem:[#allocation24_spill]] }
  0xde   : > { %1116 = vmatpush1.bf16.msra.mxu0 %v5936_v1  ;;  %v5954_v6 = vld [vmem:[%s7122_s17 + $0x4] ss:$8 sps:$4 sm:$0xff]   ;;  %v5942_v8 = vld [vmem:[%s8155_s1 + $0x30] sm:$0xff]   ;;  %v5943_v9 = vld [vmem:[%s8155_s1 + $0x38] sm:$0xff]   ;;  %s8208_s25 = sld [smem:[#allocation23_spill]]  ;;  %s8209_s12 = sld [smem:[#allocation25_spill]] }
  0xdf   : > { %1117 = vmatprep.subr.bf16.mxu0 %v6765_v0  ;;  %v5941_v7 = vld [vmem:[%s8155_s1 + $0x28] sm:$0xff]   ;;  %1147 = vmatprep.mubr.bf16.mxu0 %v5954_v6  ;;  %v5944_v10 = vld [vmem:[%s8155_s1 + $0x40] sm:$0xff]   ;;  %v5946_v12 = vld [vmem:[%s8155_s1 + $0x50] sm:$0xff]   ;;  %s8210_s15 = sld [smem:[#allocation26_spill]]  ;;  %s7909_s29 = scalar_lea.vmem [#allocation14], %s4882_s23 }
  0xe0   : > { %v5945_v11 = vld [vmem:[%s8155_s1 + $0x48] sm:$0xff]   ;;  %v5947_v13 = vld [vmem:[%s8155_s1 + $0x58] sm:$0xff]   ;;  %v5948_v14 = vld [vmem:[%s8155_s1 + $0x60] sm:$0xff]   ;;  %s5277_s23 = sshll.u32 %s6870_s24, 13  ;;  %s8211_s26 = sld [smem:[#allocation27_spill]] }
  0xe1   : > { %v5949_v15 = vld [vmem:[%s8155_s1 + $0x68] sm:$0xff]   ;;  %v5950_v16 = vld [vmem:[%s8155_s1 + $0x70] sm:$0xff]   ;;  %v5951_v17 = vld [vmem:[%s8155_s1 + $0x78] sm:$0xff]   ;;  %p8212_p9 = scmp.ne.s32.totalorder %s8193_s27, 0  ;;  %s6766_s11 = smov [#allocation14]  }
  0xe2   : > { %1118 = vmatpush1.bf16.msra.mxu0 %v5937_v2  ;;  %v5952_v18 = vld [vmem:[%s7122_s17] ss:$8 sps:$4 sm:$0xff]   ;;  %v5955_v19 = vld [vmem:[%s7122_s17 + $0x14] ss:$8 sps:$4 sm:$0xff]   ;;  %v5957_v20 = vld [vmem:[%s7122_s17 + $0x10] ss:$8 sps:$4 sm:$0xff]  }
  0xe3   : > { %1119 = vmatprep.subr.bf16.mxu0 %v6765_v0  ;;  %v5958_v21 = vld [vmem:[%s7122_s17 + $0x24] ss:$8 sps:$4 sm:$0xff]   ;;  %v5960_v22 = vld [vmem:[%s7122_s17 + $0x20] ss:$8 sps:$4 sm:$0xff]   ;;  %v5961_v23 = vld [vmem:[%s7122_s17 + $0x34] ss:$8 sps:$4 sm:$0xff]  }
  0xe4   : > { %v5963_v24 = vld [vmem:[%s7122_s17 + $0x30] ss:$8 sps:$4 sm:$0xff]   ;;  %v5964_v25 = vld [vmem:[%s7122_s17 + $0x44] ss:$8 sps:$4 sm:$0xff]   ;;  %v5966_v26 = vld [vmem:[%s7122_s17 + $0x40] ss:$8 sps:$4 sm:$0xff]  }
  0xe5   : > { %v5967_v27 = vld [vmem:[%s7122_s17 + $0x54] ss:$8 sps:$4 sm:$0xff]   ;;  %v5969_v28 = vld [vmem:[%s7122_s17 + $0x50] ss:$8 sps:$4 sm:$0xff]   ;;  %v5970_v29 = vld [vmem:[%s7122_s17 + $0x64] ss:$8 sps:$4 sm:$0xff]  }
  0xe6   : > { %1120 = vmatpush1.bf16.msra.mxu0 %v5938_v3  ;;  %v5972_v30 = vld [vmem:[%s7122_s17 + $0x60] ss:$8 sps:$4 sm:$0xff]   ;;  %v5973_v31 = vld [vmem:[%s7122_s17 + $0x74] ss:$8 sps:$4 sm:$0xff]   ;;  %v5975_v32 = vld [vmem:[%s7122_s17 + $0x70] ss:$8 sps:$4 sm:$0xff]  }
  0xe7   : > { %1121 = vmatprep.subr.bf16.mxu0 %v6765_v0  ;;  %v5976_v33 = vld [vmem:[%s7122_s17 + $0x84] ss:$8 sps:$4 sm:$0xff]   ;;  %v5978_v34 = vld [vmem:[%s7122_s17 + $0x80] ss:$8 sps:$4 sm:$0xff]   ;;  %v5979_v35 = vld [vmem:[%s7122_s17 + $0x94] ss:$8 sps:$4 sm:$0xff]  }
  0xe8   : > { %v5981_v36 = vld [vmem:[%s7122_s17 + $0x90] ss:$8 sps:$4 sm:$0xff]   ;;  %v5982_v37 = vld [vmem:[%s7122_s17 + $0xa4] ss:$8 sps:$4 sm:$0xff]   ;;  %v5984_v39 = vld [vmem:[%s7122_s17 + $0xa0] ss:$8 sps:$4 sm:$0xff]  }
  0xe9   : > { %v6030_v38 = vld [vmem:[%s8157_s3] sm:$0xff]   ;;  %v5985_v40 = vld [vmem:[%s7122_s17 + $0xb4] ss:$8 sps:$4 sm:$0xff]   ;;  %v6034_v41 = vld [vmem:[%s8157_s3 + $0x8] sm:$0xff]  }
  0xea   : > { %1122 = vmatpush1.bf16.msra.mxu0 %v5939_v4  ;;  %5458 = vmatprep.subr.bf16.mxu1 %v6030_v38  ;;  %v5987_v42 = vld [vmem:[%s7122_s17 + $0xb0] ss:$8 sps:$4 sm:$0xff]   ;;  %v5988_v44 = vld [vmem:[%s7122_s17 + $0xc4] ss:$8 sps:$4 sm:$0xff]   ;;  %v5990_v46 = vld [vmem:[%s7122_s17 + $0xc0] ss:$8 sps:$4 sm:$0xff]  }
  0xeb   : > { %1123 = vmatprep.subr.bf16.mxu0 %v6765_v0  ;;  %5459 = vmatpush3.bf16.msra.mxu1 %v6030_v38  ;;  %v6035_v43 = vld [vmem:[%s8157_s3 + $0x10] sm:$0xff]   ;;  %v6039_v45 = vld [vmem:[%s8157_s3 + $0x18] sm:$0xff]   ;;  %v6040_v47 = vld [vmem:[%s8157_s3 + $0x20] sm:$0xff]  }
  0xec   : > { %5460 = vmatprep.subr.bf16.mxu1 %v6034_v41  ;;  %v5991_v48 = vld [vmem:[%s7122_s17 + $0xd4] ss:$8 sps:$4 sm:$0xff]   ;;  %v6044_v49 = vld [vmem:[%s8157_s3 + $0x28] sm:$0xff]   ;;  %v5993_v50 = vld [vmem:[%s7122_s17 + $0xd0] ss:$8 sps:$4 sm:$0xff]  }
  0xed   : > { %v6045_v51 = vld [vmem:[%s8157_s3 + $0x30] sm:$0xff]   ;;  %v5994_v52 = vld [vmem:[%s7122_s17 + $0xe4] ss:$8 sps:$4 sm:$0xff]   ;;  %v6049_v53 = vld [vmem:[%s8157_s3 + $0x38] sm:$0xff]  }
  0xee   : > { %1124 = vmatpush1.bf16.msra.mxu0 %v5940_v5  ;;  %v5996_v54 = vld [vmem:[%s7122_s17 + $0xe0] ss:$8 sps:$4 sm:$0xff]   ;;  %v5997_v55 = vld [vmem:[%s7122_s17 + $0xf4] ss:$8 sps:$4 sm:$0xff]   ;;  %v5999_v56 = vld [vmem:[%s7122_s17 + $0xf0] ss:$8 sps:$4 sm:$0xff]  }
  0xef   : > { %1125 = vmatprep.subr.bf16.mxu0 %v6765_v0  ;;  %5461 = vmatpush3.bf16.msra.mxu1 %v6034_v41  ;;  %v6000_v57 = vld [vmem:[%s7122_s17 + $0x104] ss:$8 sps:$4 sm:$0xff]   ;;  %v6002_v58 = vld [vmem:[%s7122_s17 + $0x100] ss:$8 sps:$4 sm:$0xff]   ;;  %v6003_v59 = vld [vmem:[%s7122_s17 + $0x114] ss:$8 sps:$4 sm:$0xff]  }
  0xf0   : > { %5462 = vmatprep.subr.bf16.mxu1 %v6035_v43  ;;  %v6005_v60 = vld [vmem:[%s7122_s17 + $0x110] ss:$8 sps:$4 sm:$0xff]   ;;  %v6006_v61 = vld [vmem:[%s7122_s17 + $0x124] ss:$8 sps:$4 sm:$0xff]   ;;  %v6008_v62 = vld [vmem:[%s7122_s17 + $0x120] ss:$8 sps:$4 sm:$0xff]  }
  0xf1   : > { %v6009_v63 = vld [vmem:[%s7122_s17 + $0x134] ss:$8 sps:$4 sm:$0xff]   ;;  %v6011_v1 = vld [vmem:[%s7122_s17 + $0x130] ss:$8 sps:$4 sm:$0xff]   ;;  %v6012_v2 = vld [vmem:[%s7122_s17 + $0x144] ss:$8 sps:$4 sm:$0xff]  }
  0xf2   : > { %1126 = vmatpush1.bf16.msra.mxu0 %v5941_v7  ;;  %v6014_v3 = vld [vmem:[%s7122_s17 + $0x140] ss:$8 sps:$4 sm:$0xff]   ;;  %v6015_v4 = vld [vmem:[%s7122_s17 + $0x154] ss:$8 sps:$4 sm:$0xff]   ;;  %v6017_v5 = vld [vmem:[%s7122_s17 + $0x150] ss:$8 sps:$4 sm:$0xff]  }
  0xf3   : > { %1127 = vmatprep.subr.bf16.mxu0 %v6765_v0  ;;  %5463 = vmatpush3.bf16.msra.mxu1 %v6035_v43  ;;  %v6018_v6 = vld [vmem:[%s7122_s17 + $0x164] ss:$8 sps:$4 sm:$0xff]   ;;  %v6020_v7 = vld [vmem:[%s7122_s17 + $0x160] ss:$8 sps:$4 sm:$0xff]   ;;  %v6048_v38 = vld [vmem:[%s7122_s17 + $0x1d0] ss:$8 sps:$4 sm:$0xff]  }
  0xf4   : > { %5464 = vmatprep.subr.bf16.mxu1 %v6039_v45  ;;  %v6050_v41 = vld [vmem:[%s7122_s17 + $0x1e4] ss:$8 sps:$4 sm:$0xff]  }
  0xf6   : > { %1128 = vmatpush1.bf16.msra.mxu0 %v5942_v8  ;;  %v6021_v8 = vld [vmem:[%s7122_s17 + $0x174] ss:$8 sps:$4 sm:$0xff]  }
  0xf7   : > { %1129 = vmatprep.subr.bf16.mxu0 %v6765_v0  ;;  %5465 = vmatpush3.bf16.msra.mxu1 %v6039_v45 }
  0xf8   : > { %5466 = vmatprep.subr.bf16.mxu1 %v6040_v47 }
  0xfa   : > { %1130 = vmatpush1.bf16.msra.mxu0 %v5943_v9  ;;  %v6023_v9 = vld [vmem:[%s7122_s17 + $0x170] ss:$8 sps:$4 sm:$0xff]  }
  0xfb   : > { %1131 = vmatprep.subr.bf16.mxu0 %v6765_v0  ;;  %5467 = vmatpush3.bf16.msra.mxu1 %v6040_v47 }
  0xfc   : > { %5468 = vmatprep.subr.bf16.mxu1 %v6044_v49 }
  0xfe   : > { %1132 = vmatpush1.bf16.msra.mxu0 %v5944_v10  ;;  %v6024_v10 = vld [vmem:[%s7122_s17 + $0x184] ss:$8 sps:$4 sm:$0xff]  }
  0xff   : > { %1133 = vmatprep.subr.bf16.mxu0 %v6765_v0  ;;  %5469 = vmatpush3.bf16.msra.mxu1 %v6044_v49  ;;  %v6052_v49 = vld [vmem:[%s7122_s17 + $0x1e0] ss:$8 sps:$4 sm:$0xff]  }
 0x100   : > { %5470 = vmatprep.subr.bf16.mxu1 %v6045_v51 }
 0x102   : > { %1134 = vmatpush1.bf16.msra.mxu0 %v5945_v11  ;;  %v6026_v11 = vld [vmem:[%s7122_s17 + $0x180] ss:$8 sps:$4 sm:$0xff]  }
 0x103   : > { %1135 = vmatprep.subr.bf16.mxu0 %v6765_v0  ;;  %5471 = vmatpush3.bf16.msra.mxu1 %v6045_v51 }
 0x104   : > { %5472 = vmatprep.subr.bf16.mxu1 %v6049_v53 }
 0x106   : > { %1136 = vmatpush1.bf16.msra.mxu0 %v5946_v12  ;;  %v6027_v12 = vld [vmem:[%s7122_s17 + $0x194] ss:$8 sps:$4 sm:$0xff]  }
 0x107   : > { %1137 = vmatprep.subr.bf16.mxu0 %v6765_v0  ;;  %5473 = vmatpush3.bf16.msra.mxu1 %v6049_v53 }
 0x10a   : > { %1138 = vmatpush1.bf16.msra.mxu0 %v5947_v13  ;;  %v6029_v13 = vld [vmem:[%s7122_s17 + $0x190] ss:$8 sps:$4 sm:$0xff]  }
 0x10b   : > { %1139 = vmatprep.subr.bf16.mxu0 %v6765_v0 }
 0x10e   : > { %1140 = vmatpush1.bf16.msra.mxu0 %v5948_v14  ;;  %v6031_v14 = vld [vmem:[%s7122_s17 + $0x1a4] ss:$8 sps:$4 sm:$0xff]  }
 0x10f   : > { %1141 = vmatprep.subr.bf16.mxu0 %v6765_v0 }
 0x112   : > { %1142 = vmatpush1.bf16.msra.mxu0 %v5949_v15  ;;  %v6033_v15 = vld [vmem:[%s7122_s17 + $0x1a0] ss:$8 sps:$4 sm:$0xff]  }
 0x113   : > { %1143 = vmatprep.subr.bf16.mxu0 %v6765_v0 }
 0x116   : > { %1144 = vmatpush1.bf16.msra.mxu0 %v5950_v16  ;;  %v6036_v16 = vld [vmem:[%s7122_s17 + $0x1b4] ss:$8 sps:$4 sm:$0xff]  }
 0x117   : > { %1145 = vmatprep.subr.bf16.mxu0 %v6765_v0 }
 0x11a   : > { %1146 = vmatpush1.bf16.msra.mxu0 %v5951_v17  ;;  %v7283_v17 = vld [vmem:[#allocation5] ss:$0 sm:$0xff] }
 0x11d   : > { %1148 = vmatmul.mubr.bf16.vlgmr.msra.gmra.mrb[0].mxu0 %v5952_v18 }
 0x11e   : > { %1155 = vmatprep.mubr.bf16.mxu0 %v5955_v19 }
 0x125   : > { %1156 = vmatmul.mubr.bf16.gmra.mrb[4].mxu0 %v5957_v20  ;;  %v6038_v20 = vld [vmem:[%s7122_s17 + $0x1b0] ss:$8 sps:$4 sm:$0xff]  }
 0x126   : > { %1163 = vmatprep.mubr.bf16.mxu0 %v5958_v21 }
 0x12d   : > { %1164 = vmatmul.mubr.bf16.gmra.mrb[8].mxu0 %v5960_v22  ;;  %v6041_v22 = vld [vmem:[%s7122_s17 + $0x1c4] ss:$8 sps:$4 sm:$0xff]  }
 0x12e   : > { %1171 = vmatprep.mubr.bf16.mxu0 %v5961_v23 }
 0x135   : > { %1172 = vmatmul.mubr.bf16.gmra.mrb[12].mxu0 %v5963_v24 }
 0x136   : > { %1179 = vmatprep.mubr.bf16.mxu0 %v5964_v25 }
 0x13d   : > { %1180 = vmatmul.mubr.bf16.gmra.mrb[16].mxu0 %v5966_v26 }
 0x13e   : > { %1187 = vmatprep.mubr.bf16.mxu0 %v5967_v27 }
 0x145   : > { %1188 = vmatmul.mubr.bf16.gmra.mrb[20].mxu0 %v5969_v28 }
 0x146   : > { %1195 = vmatprep.mubr.bf16.mxu0 %v5970_v29  ;;  %v6043_v29 = vld [vmem:[%s7122_s17 + $0x1c0] ss:$8 sps:$4 sm:$0xff]  }
 0x14d   : > { %1196 = vmatmul.mubr.bf16.gmra.mrb[24].mxu0 %v5972_v30 }
 0x14e   : > { %1203 = vmatprep.mubr.bf16.mxu0 %v5973_v31  ;;  %v6046_v31 = vld [vmem:[%s7122_s17 + $0x1d4] ss:$8 sps:$4 sm:$0xff]  }
 0x155   : > { %1204 = vmatmul.mubr.bf16.gmra.mrb[28].mxu0 %v5975_v32 }
 0x156   : > { %1211 = vmatprep.mubr.bf16.mxu0 %v5976_v33 }
 0x15d   : > { %1212 = vmatmul.mubr.bf16.gmra.mrb[32].mxu0 %v5978_v34 }
 0x15e   : > { %1219 = vmatprep.mubr.bf16.mxu0 %v5979_v35 }
 0x165   : > { %1220 = vmatmul.mubr.bf16.gmra.mrb[36].mxu0 %v5981_v36 }
 0x166   : > { %1227 = vmatprep.mubr.bf16.mxu0 %v5982_v37 }
 0x16d   : > { %1228 = vmatmul.mubr.bf16.gmra.mrb[40].mxu0 %v5984_v39 }
 0x16e   : > { %1235 = vmatprep.mubr.bf16.mxu0 %v5985_v40 }
 0x175   : > { %1236 = vmatmul.mubr.bf16.gmra.mrb[44].mxu0 %v5987_v42 }
 0x176   : > { %1243 = vmatprep.mubr.bf16.mxu0 %v5988_v44 }
 0x17d   : > { %1244 = vmatmul.mubr.bf16.gmra.mrb[48].mxu0 %v5990_v46  ;;  %v6056_v46 = vld [vmem:[%s8159_s5] sm:$0xff]  }
 0x17e   : > { %1251 = vmatprep.mubr.bf16.mxu0 %v5991_v48  ;;  %5538 = vmatprep.subr.bf16.mxu1 %v6056_v46 }
 0x185   : > { %1252 = vmatmul.mubr.bf16.gmra.mrb[52].mxu0 %v5993_v50 }
 0x186   : > { %1259 = vmatprep.mubr.bf16.mxu0 %v5994_v52  ;;  %v6053_v52 = vld [vmem:[%s7122_s17 + $0x1f4] ss:$8 sps:$4 sm:$0xff]  }
 0x18d   : > { %1260 = vmatmul.mubr.bf16.gmra.mrb[56].mxu0 %v5996_v54 }
 0x18e   : > { %1267 = vmatprep.mubr.bf16.mxu0 %v5997_v55 }
 0x195   : > { %1268 = vmatmul.mubr.bf16.gmra.mrb[60].mxu0 %v5999_v56 }
 0x196   : > { %1275 = vmatprep.mubr.bf16.mxu0 %v6000_v57 }
 0x19d   : > { %1276 = vmatmul.mubr.bf16.gmra.mrb[64].mxu0 %v6002_v58 }
 0x19e   : > { %1283 = vmatprep.mubr.bf16.mxu0 %v6003_v59  ;;  %v6055_v59 = vld [vmem:[%s7122_s17 + $0x1f0] ss:$8 sps:$4 sm:$0xff]   ;;  %s4738_s17 = sshll.u32 %s7909_s29, 4  ;;  %s8108_s17 = int_to_ptr.vmem [resolvable:$true] %s4738_s17 }
 0x19f   : > { %s6674_s22 = scalar_lea.vmem %s8108_s17, 8192 }
 0x1a0   : > { %p6675_p6 = scmp.ne.s32.totalorder %s8108_s17, %s6674_s22 }
 0x1a2   : > { %p6676_p4 = pnand %p6675_p6, %p8212_p9 }
 0x1a4   : > { %p6677_p13 = pneg %p6676_p4 }
 0x1a5   : > { %1284 = vmatmul.mubr.bf16.gmra.mrb[68].mxu0 %v6005_v60 }
 0x1a6   : > { %1291 = vmatprep.mubr.bf16.mxu0 %v6006_v61 }
 0x1ad   : > { %1292 = vmatmul.mubr.bf16.gmra.mrb[72].mxu0 %v6008_v62 }
 0x1ae   : > { %1299 = vmatprep.mubr.bf16.mxu0 %v6009_v63 }
 0x1b5   : > { %1300 = vmatmul.mubr.bf16.gmra.mrb[76].mxu0 %v6011_v1 }
 0x1b6   : > { %1307 = vmatprep.mubr.bf16.mxu0 %v6012_v2 }
 0x1bd   : > { %1308 = vmatmul.mubr.bf16.gmra.mrb[80].mxu0 %v6014_v3 }
 0x1be   : > { %1315 = vmatprep.mubr.bf16.mxu0 %v6015_v4 }
 0x1c5   : > { %1316 = vmatmul.mubr.bf16.gmra.mrb[84].mxu0 %v6017_v5 }
 0x1c6   : > { %1323 = vmatprep.mubr.bf16.mxu0 %v6018_v6 }
 0x1cd   : > { %1324 = vmatmul.mubr.bf16.gmra.mrb[88].mxu0 %v6020_v7 }
 0x1ce   : > { %1331 = vmatprep.mubr.bf16.mxu0 %v6021_v8 }
 0x1d5   : > { %1332 = vmatmul.mubr.bf16.gmra.mrb[92].mxu0 %v6023_v9 }
 0x1d6   : > { %1339 = vmatprep.mubr.bf16.mxu0 %v6024_v10 }
 0x1dd   : > { %1340 = vmatmul.mubr.bf16.gmra.mrb[96].mxu0 %v6026_v11 }
 0x1de   : > { %1347 = vmatprep.mubr.bf16.mxu0 %v6027_v12 }
 0x1e5   : > { %1348 = vmatmul.mubr.bf16.gmra.mrb[100].mxu0 %v6029_v13 }
 0x1e6   : > { %1355 = vmatprep.mubr.bf16.mxu0 %v6031_v14 }
 0x1ed   : > { %1356 = vmatmul.mubr.bf16.gmra.mrb[104].mxu0 %v6033_v15 }
 0x1ee   : > { %1363 = vmatprep.mubr.bf16.mxu0 %v6036_v16 }
 0x1f0   : > { %v1149_v18 = vpop.f32.mrb[0].mxu0 }
 0x1f1   : > { %v1151_v19 = vpop.f32.mrb[1].mxu0  ;;  %v1150_v23 = vadd.f32 %v7283_v17, %v1149_v18 }
 0x1f2   : > { %v1152_v21 = vpop.f32.mrb[2].mxu0 }
 0x1f3   : > { %v1153_v24 = vadd.f32 %v7283_v17, %v1152_v21  ;;  %v1154_v25 = vpop.f32.mrb[3].mxu0 }
 0x1f5   : > { %1364 = vmatmul.mubr.bf16.gmra.mrb[108].mxu0 %v6038_v20  ;;  %v1404_v26 = vpack.c.bf16 %v1153_v24, %v1150_v23  ;;  %v6057_v20 = vld [vmem:[%s8159_s5 + $0x8] sm:$0xff]  }
 0x1f6   : > { %1371 = vmatprep.mubr.bf16.mxu0 %v6041_v22 }
 0x1f7   : > { %6092 = vtanh.bf16 %v1404_v26 }
 0x1f8   : > { %v1157_v27 = vpop.f32.mrb[4].mxu0 }
 0x1f9   : > { %v1159_v28 = vpop.f32.mrb[5].mxu0  ;;  %v1158_v32 = vadd.f32 %v7283_v17, %v1157_v27 }
 0x1fa   : > { %v1160_v30 = vpop.f32.mrb[6].mxu0 }
 0x1fb   : > { %v1161_v33 = vadd.f32 %v7283_v17, %v1160_v30  ;;  %v1162_v34 = vpop.f32.mrb[7].mxu0 }
 0x1fd   : > { %v1405_v35 = vpack.c.bf16 %v1161_v33, %v1158_v32  ;;  %1372 = vmatmul.mubr.bf16.gmra.mrb[112].mxu0 %v6043_v29 }
 0x1fe   : > { %1379 = vmatprep.mubr.bf16.mxu0 %v6046_v31 }
 0x1ff   : > { %6094 = vtanh.bf16 %v1405_v35 }
 0x200   : > { %v1165_v36 = vpop.f32.mrb[8].mxu0 }
 0x201   : > { %v1167_v37 = vpop.f32.mrb[9].mxu0  ;;  %v1166_v42 = vadd.f32 %v7283_v17, %v1165_v36 }
 0x202   : > { %v6093_v39 = vpop.eup %6092  ;;  %v1168_v40 = vpop.f32.mrb[10].mxu0 }
 0x203   : > { %v1169_v43 = vadd.f32 %v7283_v17, %v1168_v40  ;;  %v1170_v44 = vpop.f32.mrb[11].mxu0  ;;  %5474 = vmatprep.mubr.bf16.mxu1 %v6093_v39 }
 0x205   : > { %v1406_v45 = vpack.c.bf16 %v1169_v43, %v1166_v42  ;;  %1380 = vmatmul.mubr.bf16.gmra.mrb[116].mxu0 %v6048_v38 }
 0x206   : > { %1387 = vmatprep.mubr.bf16.mxu0 %v6050_v41 }
 0x207   : > { %6096 = vtanh.bf16 %v1406_v45 }
 0x208   : > { %v1173_v47 = vpop.f32.mrb[12].mxu0 }
 0x209   : > { %v1175_v48 = vpop.f32.mrb[13].mxu0  ;;  %v1174_v53 = vadd.f32 %v7283_v17, %v1173_v47 }
 0x20a   : > { %v6095_v50 = vpop.eup %6094  ;;  %v1176_v51 = vpop.f32.mrb[14].mxu0 }
 0x20b   : > { %v1177_v54 = vadd.f32 %v7283_v17, %v1176_v51  ;;  %v1178_v55 = vpop.f32.mrb[15].mxu0  ;;  %5475 = vmatmul.mubr.bf16.vlgmr.msra.gmra.mrb[0].mxu1 %v6095_v50 }
 0x20c   : > { %5539 = vmatpush3.bf16.msra.mxu1 %v6056_v46 }
 0x20d   : > { %v1407_v56 = vpack.c.bf16 %v1177_v54, %v1174_v53  ;;  %1388 = vmatmul.mubr.bf16.gmra.mrb[120].mxu0 %v6052_v49  ;;  %5540 = vmatprep.subr.bf16.mxu1 %v6057_v20  ;;  %v6058_v53 = vld [vmem:[%s8159_s5 + $0x10] sm:$0xff]  }
 0x20e   : > { %1395 = vmatprep.mubr.bf16.mxu0 %v6053_v52 }
 0x20f   : > { %6098 = vtanh.bf16 %v1407_v56 }
 0x210   : > { %v1181_v57 = vpop.f32.mrb[16].mxu0  ;;  %5541 = vmatpush3.bf16.msra.mxu1 %v6057_v20 }
 0x211   : > { %v1183_v58 = vpop.f32.mrb[17].mxu0  ;;  %v1182_v62 = vadd.f32 %v7283_v17, %v1181_v57  ;;  %5542 = vmatprep.subr.bf16.mxu1 %v6058_v53 }
 0x212   : > { %v6097_v60 = vpop.eup %6096  ;;  %v1184_v61 = vpop.f32.mrb[18].mxu0 }
 0x213   : > { %v1185_v63 = vadd.f32 %v7283_v17, %v1184_v61  ;;  %v1186_v1 = vpop.f32.mrb[19].mxu0  ;;  %5478 = vmatprep.mubr.bf16.mxu1 %v6097_v60 }
 0x214   : > { %5543 = vmatpush3.bf16.msra.mxu1 %v6058_v53 }
 0x215   : > { %v1408_v2 = vpack.c.bf16 %v1185_v63, %v1182_v62  ;;  %1396 = vmatmul.mubr.bf16.gmra.mrb[124].mxu0 %v6055_v59 }
 0x217   : > { %6100 = vtanh.bf16 %v1408_v2 }
 0x218   : > { %v1189_v3 = vpop.f32.mrb[20].mxu0 }
 0x219   : > { %v1191_v4 = vpop.f32.mrb[21].mxu0  ;;  %v1190_v7 = vadd.f32 %v7283_v17, %v1189_v3 }
 0x21a   : > { %v6099_v5 = vpop.eup %6098  ;;  %v1192_v6 = vpop.f32.mrb[22].mxu0 }
 0x21b   : > { %v1193_v8 = vadd.f32 %v7283_v17, %v1192_v6  ;;  %v1194_v9 = vpop.f32.mrb[23].mxu0  ;;  %5479 = vmatmul.mubr.bf16.gmra.mrb[4].mxu1 %v6099_v5 }
 0x21d   : > { %v1409_v10 = vpack.c.bf16 %v1193_v8, %v1190_v7 }
 0x21f   : > { %6102 = vtanh.bf16 %v1409_v10 }
 0x220   : > { %v1197_v11 = vpop.f32.mrb[24].mxu0 }
 0x221   : > { %v1199_v12 = vpop.f32.mrb[25].mxu0  ;;  %v1198_v15 = vadd.f32 %v7283_v17, %v1197_v11 }
 0x222   : > { %v6101_v13 = vpop.eup %6100  ;;  %v1200_v14 = vpop.f32.mrb[26].mxu0 }
 0x223   : > { %v1201_v16 = vadd.f32 %v7283_v17, %v1200_v14  ;;  %v1202_v18 = vpop.f32.mrb[27].mxu0  ;;  %5482 = vmatprep.mubr.bf16.mxu1 %v6101_v13 }
 0x225   : > { %v1410_v19 = vpack.c.bf16 %v1201_v16, %v1198_v15 }
 0x227   : > { %6104 = vtanh.bf16 %v1410_v19 }
 0x228   : > { %v1205_v21 = vpop.f32.mrb[28].mxu0 }
 0x229   : > { %v1207_v22 = vpop.f32.mrb[29].mxu0  ;;  %v1206_v25 = vadd.f32 %v7283_v17, %v1205_v21 }
 0x22a   : > { %v6103_v23 = vpop.eup %6102  ;;  %v1208_v24 = vpop.f32.mrb[30].mxu0 }
 0x22b   : > { %v1209_v26 = vadd.f32 %v7283_v17, %v1208_v24  ;;  %v1210_v27 = vpop.f32.mrb[31].mxu0  ;;  %5483 = vmatmul.mubr.bf16.gmra.mrb[8].mxu1 %v6103_v23  ;;  %v6059_v24 = vld [vmem:[%s8159_s5 + $0x18] sm:$0xff]  }
 0x22c   : > { %5544 = vmatprep.subr.bf16.mxu1 %v6059_v24 }
 0x22d   : > { %v1411_v28 = vpack.c.bf16 %v1209_v26, %v1206_v25  ;;  %5545 = vmatpush3.bf16.msra.mxu1 %v6059_v24 }
 0x22f   : > { %6106 = vtanh.bf16 %v1411_v28 }
 0x230   : > { %v1213_v29 = vpop.f32.mrb[32].mxu0 }
 0x231   : > { %v1215_v30 = vpop.f32.mrb[33].mxu0  ;;  %v1214_v33 = vadd.f32 %v7283_v17, %v1213_v29 }
 0x232   : > { %v6105_v31 = vpop.eup %6104  ;;  %v1216_v32 = vpop.f32.mrb[34].mxu0 }
 0x233   : > { %v1217_v34 = vadd.f32 %v7283_v17, %v1216_v32  ;;  %v1218_v35 = vpop.f32.mrb[35].mxu0  ;;  %5486 = vmatprep.mubr.bf16.mxu1 %v6105_v31 }
 0x235   : > { %v1412_v36 = vpack.c.bf16 %v1217_v34, %v1214_v33 }
 0x237   : > { %6108 = vtanh.bf16 %v1412_v36 }
 0x238   : > { %v1221_v37 = vpop.f32.mrb[36].mxu0 }
 0x239   : > { %v1223_v38 = vpop.f32.mrb[37].mxu0  ;;  %v1222_v41 = vadd.f32 %v7283_v17, %v1221_v37 }
 0x23a   : > { %v6107_v39 = vpop.eup %6106  ;;  %v1224_v40 = vpop.f32.mrb[38].mxu0 }
 0x23b   : > { %v1225_v42 = vadd.f32 %v7283_v17, %v1224_v40  ;;  %v1226_v43 = vpop.f32.mrb[39].mxu0  ;;  %5487 = vmatmul.mubr.bf16.gmra.mrb[12].mxu1 %v6107_v39 }
 0x23d   : > { %v1413_v44 = vpack.c.bf16 %v1225_v42, %v1222_v41 }
 0x23f   : > { %6110 = vtanh.bf16 %v1413_v44 }
 0x240   : > { %v1229_v45 = vpop.f32.mrb[40].mxu0 }
 0x241   : > { %v1231_v46 = vpop.f32.mrb[41].mxu0  ;;  %v1230_v49 = vadd.f32 %v7283_v17, %v1229_v45 }
 0x242   : > { %v6109_v47 = vpop.eup %6108  ;;  %v1232_v48 = vpop.f32.mrb[42].mxu0 }
 0x243   : > { %v1233_v50 = vadd.f32 %v7283_v17, %v1232_v48  ;;  %v1234_v51 = vpop.f32.mrb[43].mxu0  ;;  %5490 = vmatprep.mubr.bf16.mxu1 %v6109_v47 }
 0x245   : > { %v1414_v52 = vpack.c.bf16 %v1233_v50, %v1230_v49 }
 0x247   : > { %6112 = vtanh.bf16 %v1414_v52 }
 0x248   : > { %v1237_v54 = vpop.f32.mrb[44].mxu0 }
 0x249   : > { %v1239_v55 = vpop.f32.mrb[45].mxu0  ;;  %v1238_v58 = vadd.f32 %v7283_v17, %v1237_v54 }
 0x24a   : > { %v6111_v56 = vpop.eup %6110  ;;  %v1240_v57 = vpop.f32.mrb[46].mxu0 }
 0x24b   : > { %v1241_v59 = vadd.f32 %v7283_v17, %v1240_v57  ;;  %v1242_v60 = vpop.f32.mrb[47].mxu0  ;;  %5491 = vmatmul.mubr.bf16.gmra.mrb[16].mxu1 %v6111_v56 }
 0x24d   : > { %v1415_v61 = vpack.c.bf16 %v1241_v59, %v1238_v58 }
 0x24f   : > { %6114 = vtanh.bf16 %v1415_v61 }
 0x250   : > { %v1245_v62 = vpop.f32.mrb[48].mxu0 }
 0x251   : > { %v1247_v63 = vpop.f32.mrb[49].mxu0  ;;  %v1246_v3 = vadd.f32 %v7283_v17, %v1245_v62 }
 0x252   : > { %v6113_v1 = vpop.eup %6112  ;;  %v1248_v2 = vpop.f32.mrb[50].mxu0 }
 0x253   : > { %v1249_v4 = vadd.f32 %v7283_v17, %v1248_v2  ;;  %v1250_v5 = vpop.f32.mrb[51].mxu0  ;;  %5494 = vmatprep.mubr.bf16.mxu1 %v6113_v1 }
 0x255   : > { %v1416_v6 = vpack.c.bf16 %v1249_v4, %v1246_v3 }
 0x257   : > { %6116 = vtanh.bf16 %v1416_v6 }
 0x258   : > { %v1253_v7 = vpop.f32.mrb[52].mxu0 }
 0x259   : > { %v1255_v8 = vpop.f32.mrb[53].mxu0  ;;  %v1254_v11 = vadd.f32 %v7283_v17, %v1253_v7 }
 0x25a   : > { %v6115_v9 = vpop.eup %6114  ;;  %v1256_v10 = vpop.f32.mrb[54].mxu0 }
 0x25b   : > { %v1257_v12 = vadd.f32 %v7283_v17, %v1256_v10  ;;  %v1258_v13 = vpop.f32.mrb[55].mxu0  ;;  %5495 = vmatmul.mubr.bf16.gmra.mrb[20].mxu1 %v6115_v9 }
 0x25d   : > { %v1417_v14 = vpack.c.bf16 %v1257_v12, %v1254_v11 }
 0x25f   : > { %6118 = vtanh.bf16 %v1417_v14 }
 0x260   : > { %v1261_v15 = vpop.f32.mrb[56].mxu0 }
 0x261   : > { %v1263_v16 = vpop.f32.mrb[57].mxu0  ;;  %v1262_v20 = vadd.f32 %v7283_v17, %v1261_v15 }
 0x262   : > { %v6117_v18 = vpop.eup %6116  ;;  %v1264_v19 = vpop.f32.mrb[58].mxu0 }
 0x263   : > { %v1265_v21 = vadd.f32 %v7283_v17, %v1264_v19  ;;  %v1266_v22 = vpop.f32.mrb[59].mxu0  ;;  %5498 = vmatprep.mubr.bf16.mxu1 %v6117_v18 }
 0x265   : > { %v1418_v23 = vpack.c.bf16 %v1265_v21, %v1262_v20 }
 0x267   : > { %6120 = vtanh.bf16 %v1418_v23 }
 0x268   : > { %v1269_v25 = vpop.f32.mrb[60].mxu0 }
 0x269   : > { %v1271_v26 = vpop.f32.mrb[61].mxu0  ;;  %v1270_v29 = vadd.f32 %v7283_v17, %v1269_v25 }
 0x26a   : > { %v6119_v27 = vpop.eup %6118  ;;  %v1272_v28 = vpop.f32.mrb[62].mxu0 }
 0x26b   : > { %v1273_v30 = vadd.f32 %v7283_v17, %v1272_v28  ;;  %v1274_v31 = vpop.f32.mrb[63].mxu0  ;;  %5499 = vmatmul.mubr.bf16.gmra.mrb[24].mxu1 %v6119_v27 }
 0x26d   : > { %v1419_v32 = vpack.c.bf16 %v1273_v30, %v1270_v29 }
 0x26f   : > { %6122 = vtanh.bf16 %v1419_v32 }
 0x270   : > { %v1277_v33 = vpop.f32.mrb[64].mxu0 }
 0x271   : > { %v1279_v34 = vpop.f32.mrb[65].mxu0  ;;  %v1278_v37 = vadd.f32 %v7283_v17, %v1277_v33 }
 0x272   : > { %v6121_v35 = vpop.eup %6120  ;;  %v1280_v36 = vpop.f32.mrb[66].mxu0 }
 0x273   : > { %v1281_v38 = vadd.f32 %v7283_v17, %v1280_v36  ;;  %v1282_v39 = vpop.f32.mrb[67].mxu0  ;;  %5502 = vmatprep.mubr.bf16.mxu1 %v6121_v35 }
 0x275   : > { %v1420_v40 = vpack.c.bf16 %v1281_v38, %v1278_v37 }
 0x277   : > { %6124 = vtanh.bf16 %v1420_v40 }
 0x278   : > { %v1285_v41 = vpop.f32.mrb[68].mxu0 }
 0x279   : > { %v1287_v42 = vpop.f32.mrb[69].mxu0  ;;  %v1286_v45 = vadd.f32 %v7283_v17, %v1285_v41 }
 0x27a   : > { %v6123_v43 = vpop.eup %6122  ;;  %v1288_v44 = vpop.f32.mrb[70].mxu0 }
 0x27b   : > { %v1289_v46 = vadd.f32 %v7283_v17, %v1288_v44  ;;  %v1290_v47 = vpop.f32.mrb[71].mxu0  ;;  %5503 = vmatmul.mubr.bf16.gmra.mrb[28].mxu1 %v6123_v43 }
 0x27d   : > { %v1421_v48 = vpack.c.bf16 %v1289_v46, %v1286_v45 }
 0x27f   : > { %6126 = vtanh.bf16 %v1421_v48 }
 0x280   : > { %v1293_v49 = vpop.f32.mrb[72].mxu0 }
 0x281   : > { %v1295_v50 = vpop.f32.mrb[73].mxu0  ;;  %v1294_v53 = vadd.f32 %v7283_v17, %v1293_v49 }
 0x282   : > { %v6125_v51 = vpop.eup %6124  ;;  %v1296_v52 = vpop.f32.mrb[74].mxu0 }
 0x283   : > { %v1297_v54 = vadd.f32 %v7283_v17, %v1296_v52  ;;  %v1298_v55 = vpop.f32.mrb[75].mxu0  ;;  %5506 = vmatprep.mubr.bf16.mxu1 %v6125_v51 }
 0x285   : > { %v1422_v56 = vpack.c.bf16 %v1297_v54, %v1294_v53 }
 0x287   : > { %6128 = vtanh.bf16 %v1422_v56 }
 0x288   : > { %v1301_v57 = vpop.f32.mrb[76].mxu0 }
 0x289   : > { %v1303_v58 = vpop.f32.mrb[77].mxu0  ;;  %v1302_v61 = vadd.f32 %v7283_v17, %v1301_v57 }
 0x28a   : > { %v6127_v59 = vpop.eup %6126  ;;  %v1304_v60 = vpop.f32.mrb[78].mxu0 }
 0x28b   : > { %v1305_v62 = vadd.f32 %v7283_v17, %v1304_v60  ;;  %v1306_v63 = vpop.f32.mrb[79].mxu0  ;;  %5507 = vmatmul.mubr.bf16.gmra.mrb[32].mxu1 %v6127_v59 }
 0x28d   : > { %v1423_v1 = vpack.c.bf16 %v1305_v62, %v1302_v61 }
 0x28f   : > { %6130 = vtanh.bf16 %v1423_v1 }
 0x290   : > { %v1309_v2 = vpop.f32.mrb[80].mxu0 }
 0x291   : > { %v1311_v3 = vpop.f32.mrb[81].mxu0  ;;  %v1310_v6 = vadd.f32 %v7283_v17, %v1309_v2 }
 0x292   : > { %v6129_v4 = vpop.eup %6128  ;;  %v1312_v5 = vpop.f32.mrb[82].mxu0 }
 0x293   : > { %v1313_v7 = vadd.f32 %v7283_v17, %v1312_v5  ;;  %v1314_v8 = vpop.f32.mrb[83].mxu0  ;;  %5510 = vmatprep.mubr.bf16.mxu1 %v6129_v4 }
 0x295   : > { %v1424_v9 = vpack.c.bf16 %v1313_v7, %v1310_v6 }
 0x297   : > { %6132 = vtanh.bf16 %v1424_v9 }
 0x298   : > { %v1317_v10 = vpop.f32.mrb[84].mxu0 }
 0x299   : > { %v1319_v11 = vpop.f32.mrb[85].mxu0  ;;  %v1318_v14 = vadd.f32 %v7283_v17, %v1317_v10 }
 0x29a   : > { %v6131_v12 = vpop.eup %6130  ;;  %v1320_v13 = vpop.f32.mrb[86].mxu0 }
 0x29b   : > { %v1321_v15 = vadd.f32 %v7283_v17, %v1320_v13  ;;  %v1322_v16 = vpop.f32.mrb[87].mxu0  ;;  %5511 = vmatmul.mubr.bf16.gmra.mrb[36].mxu1 %v6131_v12 }
 0x29d   : > { %v1425_v18 = vpack.c.bf16 %v1321_v15, %v1318_v14 }
 0x29f   : > { %6134 = vtanh.bf16 %v1425_v18 }
 0x2a0   : > { %v1325_v19 = vpop.f32.mrb[88].mxu0 }
 0x2a1   : > { %v1327_v20 = vpop.f32.mrb[89].mxu0  ;;  %v1326_v23 = vadd.f32 %v7283_v17, %v1325_v19 }
 0x2a2   : > { %v6133_v21 = vpop.eup %6132  ;;  %v1328_v22 = vpop.f32.mrb[90].mxu0 }
 0x2a3   : > { %v1329_v24 = vadd.f32 %v7283_v17, %v1328_v22  ;;  %v1330_v25 = vpop.f32.mrb[91].mxu0  ;;  %5514 = vmatprep.mubr.bf16.mxu1 %v6133_v21  ;;  %v7366_v22 = vld [vmem:[#allocation7] ss:$0 sm:$0xff] }
 0x2a5   : > { %v1426_v26 = vpack.c.bf16 %v1329_v24, %v1326_v23 }
 0x2a7   : > { %6136 = vtanh.bf16 %v1426_v26 }
 0x2a8   : > { %v1333_v27 = vpop.f32.mrb[92].mxu0 }
 0x2a9   : > { %v1335_v28 = vpop.f32.mrb[93].mxu0  ;;  %v1334_v31 = vadd.f32 %v7283_v17, %v1333_v27 }
 0x2aa   : > { %v6135_v29 = vpop.eup %6134  ;;  %v1336_v30 = vpop.f32.mrb[94].mxu0 }
 0x2ab   : > { %v1337_v32 = vadd.f32 %v7283_v17, %v1336_v30  ;;  %v1338_v33 = vpop.f32.mrb[95].mxu0  ;;  %5515 = vmatmul.mubr.bf16.gmra.mrb[40].mxu1 %v6135_v29 }
 0x2ad   : > { %v1427_v34 = vpack.c.bf16 %v1337_v32, %v1334_v31 }
 0x2af   : > { %6138 = vtanh.bf16 %v1427_v34 }
 0x2b0   : > { %v1341_v35 = vpop.f32.mrb[96].mxu0 }
 0x2b1   : > { %v1343_v36 = vpop.f32.mrb[97].mxu0  ;;  %v1342_v39 = vadd.f32 %v7283_v17, %v1341_v35 }
 0x2b2   : > { %v6137_v37 = vpop.eup %6136  ;;  %v1344_v38 = vpop.f32.mrb[98].mxu0 }
 0x2b3   : > { %v1345_v40 = vadd.f32 %v7283_v17, %v1344_v38  ;;  %v1346_v41 = vpop.f32.mrb[99].mxu0  ;;  %5518 = vmatprep.mubr.bf16.mxu1 %v6137_v37 }
 0x2b5   : > { %v1428_v42 = vpack.c.bf16 %v1345_v40, %v1342_v39  ;;  %v6060_v40 = vld [vmem:[#allocation10] sm:$0xff]  }
 0x2b6   : > { %5610 = vmatprep.subr.bf16.mxu1 %v6060_v40 }
 0x2b7   : > { %6140 = vtanh.bf16 %v1428_v42 }
 0x2b8   : > { %v1349_v43 = vpop.f32.mrb[100].mxu0 }
 0x2b9   : > { %v1351_v44 = vpop.f32.mrb[101].mxu0  ;;  %v1350_v47 = vadd.f32 %v7283_v17, %v1349_v43 }
 0x2ba   : > { %v6139_v45 = vpop.eup %6138  ;;  %v1352_v46 = vpop.f32.mrb[102].mxu0 }
 0x2bb   : > { %v1353_v48 = vadd.f32 %v7283_v17, %v1352_v46  ;;  %v1354_v49 = vpop.f32.mrb[103].mxu0  ;;  %5519 = vmatmul.mubr.bf16.gmra.mrb[44].mxu1 %v6139_v45 }
 0x2bd   : > { %v1429_v50 = vpack.c.bf16 %v1353_v48, %v1350_v47 }
 0x2bf   : > { %6142 = vtanh.bf16 %v1429_v50 }
 0x2c0   : > { %v1357_v51 = vpop.f32.mrb[104].mxu0 }
 0x2c1   : > { %v1359_v52 = vpop.f32.mrb[105].mxu0  ;;  %v1358_v55 = vadd.f32 %v7283_v17, %v1357_v51 }
 0x2c2   : > { %v6141_v53 = vpop.eup %6140  ;;  %v1360_v54 = vpop.f32.mrb[106].mxu0 }
 0x2c3   : > { %v1361_v56 = vadd.f32 %v7283_v17, %v1360_v54  ;;  %v1362_v57 = vpop.f32.mrb[107].mxu0  ;;  %5522 = vmatprep.mubr.bf16.mxu1 %v6141_v53 }
 0x2c5   : > { %v1430_v58 = vpack.c.bf16 %v1361_v56, %v1358_v55 }
 0x2c7   : > { %6144 = vtanh.bf16 %v1430_v58 }
 0x2c8   : > { %v1365_v59 = vpop.f32.mrb[108].mxu0 }
 0x2c9   : > { %v1367_v60 = vpop.f32.mrb[109].mxu0  ;;  %v1366_v63 = vadd.f32 %v7283_v17, %v1365_v59 }
 0x2ca   : > { %v6143_v61 = vpop.eup %6142  ;;  %v1368_v62 = vpop.f32.mrb[110].mxu0 }
 0x2cb   : > { %v1369_v1 = vadd.f32 %v7283_v17, %v1368_v62  ;;  %v1370_v2 = vpop.f32.mrb[111].mxu0  ;;  %5523 = vmatmul.mubr.bf16.gmra.mrb[48].mxu1 %v6143_v61 }
 0x2cd   : > { %v1431_v3 = vpack.c.bf16 %v1369_v1, %v1366_v63 }
 0x2cf   : > { %6146 = vtanh.bf16 %v1431_v3 }
 0x2d0   : > { %v1373_v4 = vpop.f32.mrb[112].mxu0 }
 0x2d1   : > { %v1375_v5 = vpop.f32.mrb[113].mxu0  ;;  %v1374_v8 = vadd.f32 %v7283_v17, %v1373_v4 }
 0x2d2   : > { %v6145_v6 = vpop.eup %6144  ;;  %v1376_v7 = vpop.f32.mrb[114].mxu0 }
 0x2d3   : > { %v1377_v9 = vadd.f32 %v7283_v17, %v1376_v7  ;;  %v1378_v10 = vpop.f32.mrb[115].mxu0  ;;  %5526 = vmatprep.mubr.bf16.mxu1 %v6145_v6 }
 0x2d5   : > { %v1432_v11 = vpack.c.bf16 %v1377_v9, %v1374_v8 }
 0x2d7   : > { %6148 = vtanh.bf16 %v1432_v11 }
 0x2d8   : > { %v1381_v12 = vpop.f32.mrb[116].mxu0 }
 0x2d9   : > { %v1383_v13 = vpop.f32.mrb[117].mxu0  ;;  %v1382_v16 = vadd.f32 %v7283_v17, %v1381_v12 }
 0x2da   : > { %v6147_v14 = vpop.eup %6146  ;;  %v1384_v15 = vpop.f32.mrb[118].mxu0 }
 0x2db   : > { %v1385_v18 = vadd.f32 %v7283_v17, %v1384_v15  ;;  %v1386_v19 = vpop.f32.mrb[119].mxu0  ;;  %5527 = vmatmul.mubr.bf16.gmra.mrb[52].mxu1 %v6147_v14 }
 0x2dd   : > { %v1433_v20 = vpack.c.bf16 %v1385_v18, %v1382_v16 }
 0x2de   : > { %v5476_v21 = vpop.f32.mrb[0].mxu1 }
 0x2df   : > { %6150 = vtanh.bf16 %v1433_v20  ;;  %v1573_v23 = vpop.f32.mrb[1].mxu1  ;;  %v1582_v26 = vadd.f32 %v5476_v21, %v7366_v22 }
 0x2e0   : > { %v1389_v24 = vpop.f32.mrb[120].mxu0  ;;  %v5477_v25 = vpop.f32.mrb[2].mxu1  ;;  %v1574_v31 = vadd.f32 %v7366_v22, %v1573_v23 }
 0x2e1   : > { %v1585_v27 = vadd.f32 %v5477_v25, %v7366_v22  ;;  %v1391_v28 = vpop.f32.mrb[121].mxu0  ;;  %v1576_v29 = vpop.f32.mrb[3].mxu1  ;;  %v1390_v34 = vadd.f32 %v7283_v17, %v1389_v24 }
 0x2e2   : > { %v6149_v30 = vpop.eup %6148  ;;  %v1577_v32 = vadd.f32 %v7366_v22, %v1576_v29  ;;  %v1392_v33 = vpop.f32.mrb[122].mxu0 }
 0x2e3   : > { %v1829_v35 = vpack.c.bf16 %v1585_v27, %v1582_v26  ;;  %v1393_v36 = vadd.f32 %v7283_v17, %v1392_v33  ;;  %v1394_v37 = vpop.f32.mrb[123].mxu0  ;;  %5530 = vmatprep.mubr.bf16.mxu1 %v6149_v30 }
 0x2e4   : > { %v1828_v38 = vpack.c.bf16 %v1577_v32, %v1574_v31  ;;  %v6061_v37 = vld [vmem:[#allocation10 + $0x8] sm:$0xff]  }
 0x2e5   : > { %v1434_v39 = vpack.c.bf16 %v1393_v36, %v1390_v34 }
 0x2e7   : > { %6152 = vtanh.bf16 %v1434_v39 }
 0x2e8   : > { %v1397_v41 = vpop.f32.mrb[124].mxu0 }
 0x2e9   : > { %v1399_v42 = vpop.f32.mrb[125].mxu0  ;;  %v1398_v45 = vadd.f32 %v7283_v17, %v1397_v41 }
 0x2ea   : > { %v6151_v43 = vpop.eup %6150  ;;  %v1400_v44 = vpop.f32.mrb[126].mxu0 }
 0x2eb   : > { %v1401_v46 = vadd.f32 %v7283_v17, %v1400_v44  ;;  %v1402_v47 = vpop.f32.mrb[127].mxu0  ;;  %5531 = vmatmul.mubr.bf16.gmra.mrb[56].mxu1 %v6151_v43 }
 0x2ed   : > { %v1435_v48 = vpack.c.bf16 %v1401_v46, %v1398_v45 }
 0x2ee   : > { %v5480_v49 = vpop.f32.mrb[4].mxu1 }
 0x2ef   : > { %6154 = vtanh.bf16 %v1435_v48  ;;  %v1589_v50 = vpop.f32.mrb[5].mxu1  ;;  %v1598_v52 = vadd.f32 %v5480_v49, %v7366_v22 }
 0x2f0   : > { %6156 = vtanh.bf16 %v1828_v38  ;;  %v5481_v51 = vpop.f32.mrb[6].mxu1  ;;  %v1590_v56 = vadd.f32 %v7366_v22, %v1589_v50 }
 0x2f1   : > { %v1601_v53 = vadd.f32 %v5481_v51, %v7366_v22  ;;  %v1592_v54 = vpop.f32.mrb[7].mxu1  ;;  %6158 = vtanh.bf16 %v1829_v35 }
 0x2f2   : > { %v6153_v55 = vpop.eup %6152  ;;  %v1593_v57 = vadd.f32 %v7366_v22, %v1592_v54 }
 0x2f3   : > { %v1831_v58 = vpack.c.bf16 %v1601_v53, %v1598_v52  ;;  %5534 = vmatprep.mubr.bf16.mxu1 %v6153_v55 }
 0x2f4   : > { %v1830_v17 = vpack.c.bf16 %v1593_v57, %v1590_v56 }
 0x2f6   : > { %6160 = vtanh.bf16 %v1830_v17 }
 0x2f7   : > { %6162 = vtanh.bf16 %v1831_v58 }
 0x2fa   : > { %v6155_v59 = vpop.eup %6154 }
 0x2fb   : > { %v6157_v60 = vpop.eup %6156  ;;  %5535 = vmatmul.mubr.bf16.gmra.mrb[60].mxu1 %v6155_v59 }
 0x2fc   : > { %5546 = vmatprep.mubr.msk.bf16.mxu1 %vm1931_vm0, %v6157_v60  ;;  %v6159_v4 = vpop.eup %6158 }
 0x2fe   : > { %v5484_v61 = vpop.f32.mrb[8].mxu1 }
 0x2ff   : > { %v1605_v62 = vpop.f32.mrb[9].mxu1  ;;  %v1614_v1 = vadd.f32 %v5484_v61, %v7366_v22 }
 0x300   : > { %v5485_v63 = vpop.f32.mrb[10].mxu1  ;;  %v1606_v5 = vadd.f32 %v7366_v22, %v1605_v62 }
 0x301   : > { %v1617_v2 = vadd.f32 %v5485_v63, %v7366_v22  ;;  %v1608_v3 = vpop.f32.mrb[11].mxu1  ;;  %v6161_v7 = vpop.eup %6160 }
 0x302   : > { %v1609_v6 = vadd.f32 %v7366_v22, %v1608_v3  ;;  %v6163_v10 = vpop.eup %6162 }
 0x303   : > { %v1833_v8 = vpack.c.bf16 %v1617_v2, %v1614_v1  ;;  %5547 = vmatmul.mubr.msk.bf16.vlgmr.msra.gmra.mrb[64].mxu1 %vm1931_vm0, %v6159_v4 }
 0x304   : > { %v1832_v9 = vpack.c.bf16 %v1609_v6, %v1606_v5  ;;  %5550 = vmatprep.mubr.msk.bf16.mxu1 %vm1931_vm0, %v6161_v7  ;;  %5611 = vmatpush3.bf16.msra.mxu1 %v6060_v40 }
 0x305   : > { %5612 = vmatprep.subr.bf16.mxu1 %v6061_v37 }
 0x306   : > { %6164 = vtanh.bf16 %v1832_v9 }
 0x307   : > { %6166 = vtanh.bf16 %v1833_v8 }
 0x308   : > { %5613 = vmatpush3.bf16.msra.mxu1 %v6061_v37 }
 0x30b   : > { %5551 = vmatmul.mubr.msk.bf16.gmra.mrb[68].mxu1 %vm1931_vm0, %v6163_v10  ;;  %v7421_v10 = vld [vmem:[%s8206_s28] sm:$0xff]  }
 0x30c   : > { %5678 = vmatprep.subr.bf16.mxu0 %v7421_v10  ;;  %5818 = vmatprep.subr.bf16.mxu1 %v7421_v10 }
 0x30d   : > { %5679 = vmatpush3.bf16.msra.mxu0 %v7421_v10 }
 0x30e   : > { %v5488_v11 = vpop.f32.mrb[12].mxu1 }
 0x30f   : > { %v1621_v12 = vpop.f32.mrb[13].mxu1  ;;  %v1630_v15 = vadd.f32 %v5488_v11, %v7366_v22 }
 0x310   : > { %v5489_v13 = vpop.f32.mrb[14].mxu1  ;;  %v1622_v20 = vadd.f32 %v7366_v22, %v1621_v12 }
 0x311   : > { %v6165_v14 = vpop.eup %6164  ;;  %v1633_v16 = vadd.f32 %v5489_v13, %v7366_v22  ;;  %v1624_v18 = vpop.f32.mrb[15].mxu1 }
 0x312   : > { %v6167_v19 = vpop.eup %6166  ;;  %v1625_v21 = vadd.f32 %v7366_v22, %v1624_v18  ;;  %5554 = vmatprep.mubr.msk.bf16.mxu1 %vm1931_vm0, %v6165_v14 }
 0x313   : > { %v1835_v23 = vpack.c.bf16 %v1633_v16, %v1630_v15  ;;  %5555 = vmatmul.mubr.msk.bf16.gmra.mrb[72].mxu1 %vm1931_vm0, %v6167_v19 }
 0x314   : > { %v1834_v24 = vpack.c.bf16 %v1625_v21, %v1622_v20 }
 0x316   : > { %6168 = vtanh.bf16 %v1834_v24 }
 0x317   : > { %6170 = vtanh.bf16 %v1835_v23 }
 0x31e   : > { %v5492_v25 = vpop.f32.mrb[16].mxu1 }
 0x31f   : > { %v1637_v26 = vpop.f32.mrb[17].mxu1  ;;  %v1646_v29 = vadd.f32 %v5492_v25, %v7366_v22 }
 0x320   : > { %v5493_v27 = vpop.f32.mrb[18].mxu1  ;;  %v1638_v33 = vadd.f32 %v7366_v22, %v1637_v26 }
 0x321   : > { %v6169_v28 = vpop.eup %6168  ;;  %v1649_v30 = vadd.f32 %v5493_v27, %v7366_v22  ;;  %v1640_v31 = vpop.f32.mrb[19].mxu1 }
 0x322   : > { %v6171_v32 = vpop.eup %6170  ;;  %v1641_v34 = vadd.f32 %v7366_v22, %v1640_v31  ;;  %5558 = vmatprep.mubr.msk.bf16.mxu1 %vm1931_vm0, %v6169_v28 }
 0x323   : > { %v1837_v35 = vpack.c.bf16 %v1649_v30, %v1646_v29  ;;  %5559 = vmatmul.mubr.msk.bf16.gmra.mrb[76].mxu1 %vm1931_vm0, %v6171_v32 }
 0x324   : > { %v1836_v36 = vpack.c.bf16 %v1641_v34, %v1638_v33 }
 0x326   : > { %6172 = vtanh.bf16 %v1836_v36 }
 0x327   : > { %6174 = vtanh.bf16 %v1837_v35 }
 0x32e   : > { %v5496_v38 = vpop.f32.mrb[20].mxu1 }
 0x32f   : > { %v1653_v39 = vpop.f32.mrb[21].mxu1  ;;  %v1662_v42 = vadd.f32 %v5496_v38, %v7366_v22 }
 0x330   : > { %v5497_v40 = vpop.f32.mrb[22].mxu1  ;;  %v1654_v46 = vadd.f32 %v7366_v22, %v1653_v39 }
 0x331   : > { %v6173_v41 = vpop.eup %6172  ;;  %v1665_v43 = vadd.f32 %v5497_v40, %v7366_v22  ;;  %v1656_v44 = vpop.f32.mrb[23].mxu1 }
 0x332   : > { %v6175_v45 = vpop.eup %6174  ;;  %v1657_v47 = vadd.f32 %v7366_v22, %v1656_v44  ;;  %5562 = vmatprep.mubr.msk.bf16.mxu1 %vm1931_vm0, %v6173_v41 }
 0x333   : > { %v1839_v48 = vpack.c.bf16 %v1665_v43, %v1662_v42  ;;  %5563 = vmatmul.mubr.msk.bf16.gmra.mrb[80].mxu1 %vm1931_vm0, %v6175_v45 }
 0x334   : > { %v1838_v49 = vpack.c.bf16 %v1657_v47, %v1654_v46 }
 0x336   : > { %6176 = vtanh.bf16 %v1838_v49 }
 0x337   : > { %6178 = vtanh.bf16 %v1839_v48 }
 0x33e   : > { %v5500_v50 = vpop.f32.mrb[24].mxu1 }
 0x33f   : > { %v1669_v51 = vpop.f32.mrb[25].mxu1  ;;  %v1678_v54 = vadd.f32 %v5500_v50, %v7366_v22 }
 0x340   : > { %v5501_v52 = vpop.f32.mrb[26].mxu1  ;;  %v1670_v58 = vadd.f32 %v7366_v22, %v1669_v51 }
 0x341   : > { %v6177_v53 = vpop.eup %6176  ;;  %v1681_v55 = vadd.f32 %v5501_v52, %v7366_v22  ;;  %v1672_v56 = vpop.f32.mrb[27].mxu1 }
 0x342   : > { %v6179_v57 = vpop.eup %6178  ;;  %v1673_v17 = vadd.f32 %v7366_v22, %v1672_v56  ;;  %5566 = vmatprep.mubr.msk.bf16.mxu1 %vm1931_vm0, %v6177_v53 }
 0x343   : > { %v1841_v59 = vpack.c.bf16 %v1681_v55, %v1678_v54  ;;  %5567 = vmatmul.mubr.msk.bf16.gmra.mrb[84].mxu1 %vm1931_vm0, %v6179_v57 }
 0x344   : > { %v1840_v60 = vpack.c.bf16 %v1673_v17, %v1670_v58 }
 0x346   : > { %6180 = vtanh.bf16 %v1840_v60 }
 0x347   : > { %6182 = vtanh.bf16 %v1841_v59 }
 0x34e   : > { %v5504_v61 = vpop.f32.mrb[28].mxu1 }
 0x34f   : > { %v1685_v62 = vpop.f32.mrb[29].mxu1  ;;  %v1694_v2 = vadd.f32 %v5504_v61, %v7366_v22 }
 0x350   : > { %v5505_v63 = vpop.f32.mrb[30].mxu1  ;;  %v1686_v6 = vadd.f32 %v7366_v22, %v1685_v62 }
 0x351   : > { %v6181_v1 = vpop.eup %6180  ;;  %v1697_v3 = vadd.f32 %v5505_v63, %v7366_v22  ;;  %v1688_v4 = vpop.f32.mrb[31].mxu1 }
 0x352   : > { %v6183_v5 = vpop.eup %6182  ;;  %v1689_v7 = vadd.f32 %v7366_v22, %v1688_v4  ;;  %5570 = vmatprep.mubr.msk.bf16.mxu1 %vm1931_vm0, %v6181_v1 }
 0x353   : > { %v1843_v8 = vpack.c.bf16 %v1697_v3, %v1694_v2  ;;  %5571 = vmatmul.mubr.msk.bf16.gmra.mrb[88].mxu1 %vm1931_vm0, %v6183_v5 }
 0x354   : > { %v1842_v9 = vpack.c.bf16 %v1689_v7, %v1686_v6 }
 0x356   : > { %6184 = vtanh.bf16 %v1842_v9 }
 0x357   : > { %6186 = vtanh.bf16 %v1843_v8 }
 0x35e   : > { %v5508_v11 = vpop.f32.mrb[32].mxu1 }
 0x35f   : > { %v1701_v12 = vpop.f32.mrb[33].mxu1  ;;  %v1710_v15 = vadd.f32 %v5508_v11, %v7366_v22 }
 0x360   : > { %v5509_v13 = vpop.f32.mrb[34].mxu1  ;;  %v1702_v20 = vadd.f32 %v7366_v22, %v1701_v12 }
 0x361   : > { %v6185_v14 = vpop.eup %6184  ;;  %v1713_v16 = vadd.f32 %v5509_v13, %v7366_v22  ;;  %v1704_v18 = vpop.f32.mrb[35].mxu1 }
 0x362   : > { %v6187_v19 = vpop.eup %6186  ;;  %v1705_v21 = vadd.f32 %v7366_v22, %v1704_v18  ;;  %5574 = vmatprep.mubr.msk.bf16.mxu1 %vm1931_vm0, %v6185_v14 }
 0x363   : > { %v1845_v23 = vpack.c.bf16 %v1713_v16, %v1710_v15  ;;  %5575 = vmatmul.mubr.msk.bf16.gmra.mrb[92].mxu1 %vm1931_vm0, %v6187_v19 }
 0x364   : > { %v1844_v24 = vpack.c.bf16 %v1705_v21, %v1702_v20 }
 0x366   : > { %6188 = vtanh.bf16 %v1844_v24 }
 0x367   : > { %6190 = vtanh.bf16 %v1845_v23 }
 0x36e   : > { %v5512_v25 = vpop.f32.mrb[36].mxu1 }
 0x36f   : > { %v1717_v26 = vpop.f32.mrb[37].mxu1  ;;  %v1726_v29 = vadd.f32 %v5512_v25, %v7366_v22 }
 0x370   : > { %v5513_v27 = vpop.f32.mrb[38].mxu1  ;;  %v1718_v33 = vadd.f32 %v7366_v22, %v1717_v26 }
 0x371   : > { %v6189_v28 = vpop.eup %6188  ;;  %v1729_v30 = vadd.f32 %v5513_v27, %v7366_v22  ;;  %v1720_v31 = vpop.f32.mrb[39].mxu1 }
 0x372   : > { %v6191_v32 = vpop.eup %6190  ;;  %v1721_v34 = vadd.f32 %v7366_v22, %v1720_v31  ;;  %5578 = vmatprep.mubr.msk.bf16.mxu1 %vm1931_vm0, %v6189_v28 }
 0x373   : > { %v1847_v35 = vpack.c.bf16 %v1729_v30, %v1726_v29  ;;  %5579 = vmatmul.mubr.msk.bf16.gmra.mrb[96].mxu1 %vm1931_vm0, %v6191_v32 }
 0x374   : > { %v1846_v36 = vpack.c.bf16 %v1721_v34, %v1718_v33 }
 0x376   : > { %6192 = vtanh.bf16 %v1846_v36 }
 0x377   : > { %6194 = vtanh.bf16 %v1847_v35 }
 0x37e   : > { %v5516_v37 = vpop.f32.mrb[40].mxu1 }
 0x37f   : > { %v1733_v38 = vpop.f32.mrb[41].mxu1  ;;  %v1742_v41 = vadd.f32 %v5516_v37, %v7366_v22  ;;  %v7471_v37 = vld [vmem:[%s8206_s28 + $0x8] sm:$0xff]  }
 0x380   : > { %v5517_v39 = vpop.f32.mrb[42].mxu1  ;;  %v1734_v45 = vadd.f32 %v7366_v22, %v1733_v38  ;;  %5680 = vmatprep.subr.bf16.mxu0 %v7471_v37 }
 0x381   : > { %v6193_v40 = vpop.eup %6192  ;;  %v1745_v42 = vadd.f32 %v5517_v39, %v7366_v22  ;;  %v1736_v43 = vpop.f32.mrb[43].mxu1  ;;  %5681 = vmatpush3.bf16.msra.mxu0 %v7471_v37 }
 0x382   : > { %v6195_v44 = vpop.eup %6194  ;;  %v1737_v46 = vadd.f32 %v7366_v22, %v1736_v43  ;;  %5582 = vmatprep.mubr.msk.bf16.mxu1 %vm1931_vm0, %v6193_v40 }
 0x383   : > { %v1849_v47 = vpack.c.bf16 %v1745_v42, %v1742_v41  ;;  %5583 = vmatmul.mubr.msk.bf16.gmra.mrb[100].mxu1 %vm1931_vm0, %v6195_v44 }
 0x384   : > { %v1848_v48 = vpack.c.bf16 %v1737_v46, %v1734_v45 }
 0x386   : > { %6196 = vtanh.bf16 %v1848_v48 }
 0x387   : > { %6198 = vtanh.bf16 %v1849_v47 }
 0x38e   : > { %v5520_v49 = vpop.f32.mrb[44].mxu1 }
 0x38f   : > { %v1749_v50 = vpop.f32.mrb[45].mxu1  ;;  %v1758_v53 = vadd.f32 %v5520_v49, %v7366_v22 }
 0x390   : > { %v5521_v51 = vpop.f32.mrb[46].mxu1  ;;  %v1750_v57 = vadd.f32 %v7366_v22, %v1749_v50  ;;  %v7481_v50 = vld [vmem:[#allocation8] ss:$0 sm:$0xff] }
 0x391   : > { %v6197_v52 = vpop.eup %6196  ;;  %v1761_v54 = vadd.f32 %v5521_v51, %v7366_v22  ;;  %v1752_v55 = vpop.f32.mrb[47].mxu1 }
 0x392   : > { %v6199_v56 = vpop.eup %6198  ;;  %v1753_v58 = vadd.f32 %v7366_v22, %v1752_v55  ;;  %5586 = vmatprep.mubr.msk.bf16.mxu1 %vm1931_vm0, %v6197_v52 }
 0x393   : > { %v1851_v17 = vpack.c.bf16 %v1761_v54, %v1758_v53  ;;  %5587 = vmatmul.mubr.msk.bf16.gmra.mrb[104].mxu1 %vm1931_vm0, %v6199_v56 }
 0x394   : > { %v1850_v59 = vpack.c.bf16 %v1753_v58, %v1750_v57 }
 0x396   : > { %6200 = vtanh.bf16 %v1850_v59 }
 0x397   : > { %6202 = vtanh.bf16 %v1851_v17 }
 0x39e   : > { %v5524_v60 = vpop.f32.mrb[48].mxu1 }
 0x39f   : > { %v1765_v61 = vpop.f32.mrb[49].mxu1  ;;  %v1774_v1 = vadd.f32 %v5524_v60, %v7366_v22 }
 0x3a0   : > { %v5525_v62 = vpop.f32.mrb[50].mxu1  ;;  %v1766_v5 = vadd.f32 %v7366_v22, %v1765_v61 }
 0x3a1   : > { %v6201_v63 = vpop.eup %6200  ;;  %v1777_v2 = vadd.f32 %v5525_v62, %v7366_v22  ;;  %v1768_v3 = vpop.f32.mrb[51].mxu1 }
 0x3a2   : > { %v6203_v4 = vpop.eup %6202  ;;  %v1769_v6 = vadd.f32 %v7366_v22, %v1768_v3  ;;  %5590 = vmatprep.mubr.msk.bf16.mxu1 %vm1931_vm0, %v6201_v63 }
 0x3a3   : > { %v1853_v7 = vpack.c.bf16 %v1777_v2, %v1774_v1  ;;  %5591 = vmatmul.mubr.msk.bf16.gmra.mrb[108].mxu1 %vm1931_vm0, %v6203_v4 }
 0x3a4   : > { %v1852_v8 = vpack.c.bf16 %v1769_v6, %v1766_v5 }
 0x3a6   : > { %6204 = vtanh.bf16 %v1852_v8 }
 0x3a7   : > { %6206 = vtanh.bf16 %v1853_v7 }
 0x3ae   : > { %v5528_v9 = vpop.f32.mrb[52].mxu1 }
 0x3af   : > { %v1781_v11 = vpop.f32.mrb[53].mxu1  ;;  %v1790_v14 = vadd.f32 %v5528_v9, %v7366_v22 }
 0x3b0   : > { %v5529_v12 = vpop.f32.mrb[54].mxu1  ;;  %v1782_v19 = vadd.f32 %v7366_v22, %v1781_v11 }
 0x3b1   : > { %v6205_v13 = vpop.eup %6204  ;;  %v1793_v15 = vadd.f32 %v5529_v12, %v7366_v22  ;;  %v1784_v16 = vpop.f32.mrb[55].mxu1 }
 0x3b2   : > { %v6207_v18 = vpop.eup %6206  ;;  %v1785_v20 = vadd.f32 %v7366_v22, %v1784_v16  ;;  %5594 = vmatprep.mubr.msk.bf16.mxu1 %vm1931_vm0, %v6205_v13 }
 0x3b3   : > { %v1855_v21 = vpack.c.bf16 %v1793_v15, %v1790_v14  ;;  %5595 = vmatmul.mubr.msk.bf16.gmra.mrb[112].mxu1 %vm1931_vm0, %v6207_v18 }
 0x3b4   : > { %v1854_v23 = vpack.c.bf16 %v1785_v20, %v1782_v19 }
 0x3b6   : > { %6208 = vtanh.bf16 %v1854_v23 }
 0x3b7   : > { %6210 = vtanh.bf16 %v1855_v21 }
 0x3be   : > { %v5532_v24 = vpop.f32.mrb[56].mxu1 }
 0x3bf   : > { %v1797_v25 = vpop.f32.mrb[57].mxu1  ;;  %v1806_v28 = vadd.f32 %v5532_v24, %v7366_v22 }
 0x3c0   : > { %v5533_v26 = vpop.f32.mrb[58].mxu1  ;;  %v1798_v32 = vadd.f32 %v7366_v22, %v1797_v25 }
 0x3c1   : > { %v6209_v27 = vpop.eup %6208  ;;  %v1809_v29 = vadd.f32 %v5533_v26, %v7366_v22  ;;  %v1800_v30 = vpop.f32.mrb[59].mxu1 }
 0x3c2   : > { %v6211_v31 = vpop.eup %6210  ;;  %v1801_v33 = vadd.f32 %v7366_v22, %v1800_v30  ;;  %5598 = vmatprep.mubr.msk.bf16.mxu1 %vm1931_vm0, %v6209_v27 }
 0x3c3   : > { %v1857_v34 = vpack.c.bf16 %v1809_v29, %v1806_v28  ;;  %5599 = vmatmul.mubr.msk.bf16.gmra.mrb[116].mxu1 %vm1931_vm0, %v6211_v31 }
 0x3c4   : > { %v1856_v35 = vpack.c.bf16 %v1801_v33, %v1798_v32 }
 0x3c6   : > { %6212 = vtanh.bf16 %v1856_v35 }
 0x3c7   : > { %6214 = vtanh.bf16 %v1857_v34 }
 0x3ce   : > { %v5536_v36 = vpop.f32.mrb[60].mxu1 }
 0x3cf   : > { %v1813_v38 = vpop.f32.mrb[61].mxu1  ;;  %v1822_v41 = vadd.f32 %v5536_v36, %v7366_v22 }
 0x3d0   : > { %v5537_v39 = vpop.f32.mrb[62].mxu1  ;;  %v1814_v45 = vadd.f32 %v7366_v22, %v1813_v38 }
 0x3d1   : > { %v6213_v40 = vpop.eup %6212  ;;  %v1825_v42 = vadd.f32 %v5537_v39, %v7366_v22  ;;  %v1816_v43 = vpop.f32.mrb[63].mxu1 }
 0x3d2   : > { %v6215_v44 = vpop.eup %6214  ;;  %v1817_v46 = vadd.f32 %v7366_v22, %v1816_v43  ;;  %5602 = vmatprep.mubr.msk.bf16.mxu1 %vm1931_vm0, %v6213_v40 }
 0x3d3   : > { %v1859_v47 = vpack.c.bf16 %v1825_v42, %v1822_v41  ;;  %5603 = vmatmul.mubr.msk.bf16.gmra.mrb[120].mxu1 %vm1931_vm0, %v6215_v44 }
 0x3d4   : > { %v1858_v48 = vpack.c.bf16 %v1817_v46, %v1814_v45 }
 0x3d6   : > { %6216 = vtanh.bf16 %v1858_v48  ;;  %v5548_v49 = vpop.f32.mrb[64].mxu1 }
 0x3d7   : > { %6218 = vtanh.bf16 %v1859_v47  ;;  %v2062_v51 = vpop.f32.mrb[65].mxu1  ;;  %v2071_v53 = vadd.f32 %v5548_v49, %v7481_v50 }
 0x3d8   : > { %v5549_v52 = vpop.f32.mrb[66].mxu1  ;;  %v2063_v22 = vadd.f32 %v7481_v50, %v2062_v51 }
 0x3d9   : > { %v2074_v54 = vadd.f32 %v5549_v52, %v7481_v50  ;;  %v2065_v55 = vpop.f32.mrb[67].mxu1 }
 0x3da   : > { %v2066_v56 = vadd.f32 %v7481_v50, %v2065_v55 }
 0x3db   : > { %v2318_v57 = vpack.c.bf16 %v2074_v54, %v2071_v53 }
 0x3dc   : > { %v2317_v58 = vpack.c.bf16 %v2066_v56, %v2063_v22 }
 0x3de   : > { %6220 = vtanh.bf16 %v2317_v58  ;;  %v5552_v17 = vpop.f32.mrb[68].mxu1 }
 0x3df   : > { %6222 = vtanh.bf16 %v2318_v57  ;;  %v2078_v59 = vpop.f32.mrb[69].mxu1  ;;  %v2087_v62 = vadd.f32 %v5552_v17, %v7481_v50 }
 0x3e0   : > { %v5553_v60 = vpop.f32.mrb[70].mxu1  ;;  %v2079_v3 = vadd.f32 %v7481_v50, %v2078_v59 }
 0x3e1   : > { %v6217_v61 = vpop.eup %6216  ;;  %v2090_v63 = vadd.f32 %v5553_v60, %v7481_v50  ;;  %v2081_v1 = vpop.f32.mrb[71].mxu1 }
 0x3e2   : > { %v6219_v2 = vpop.eup %6218  ;;  %v2082_v4 = vadd.f32 %v7481_v50, %v2081_v1  ;;  %5606 = vmatprep.mubr.msk.bf16.mxu1 %vm1931_vm0, %v6217_v61 }
 0x3e3   : > { %v2320_v5 = vpack.c.bf16 %v2090_v63, %v2087_v62  ;;  %5607 = vmatmul.mubr.msk.bf16.gmra.mrb[124].mxu1 %vm1931_vm0, %v6219_v2 }
 0x3e4   : > { %v2319_v6 = vpack.c.bf16 %v2082_v4, %v2079_v3 }
 0x3e6   : > { %6224 = vtanh.bf16 %v2319_v6  ;;  %v5556_v7 = vpop.f32.mrb[72].mxu1 }
 0x3e7   : > { %6226 = vtanh.bf16 %v2320_v5  ;;  %v2094_v8 = vpop.f32.mrb[73].mxu1  ;;  %v2103_v12 = vadd.f32 %v5556_v7, %v7481_v50 }
 0x3e8   : > { %v5557_v9 = vpop.f32.mrb[74].mxu1  ;;  %v2095_v16 = vadd.f32 %v7481_v50, %v2094_v8 }
 0x3e9   : > { %v6221_v11 = vpop.eup %6220  ;;  %v2106_v13 = vadd.f32 %v5557_v9, %v7481_v50  ;;  %v2097_v14 = vpop.f32.mrb[75].mxu1 }
 0x3ea   : > { %v6223_v15 = vpop.eup %6222  ;;  %v2098_v18 = vadd.f32 %v7481_v50, %v2097_v14  ;;  %5614 = vmatprep.mubr.msk.bf16.mxu1 %vm2404_vm1, %v6221_v11 }
 0x3eb   : > { %v2322_v19 = vpack.c.bf16 %v2106_v13, %v2103_v12  ;;  %5615 = vmatmul.mubr.msk.bf16.vlgmr.msra.gmra.mrb[128].mxu1 %vm2404_vm1, %v6223_v15 }
 0x3ec   : > { %v2321_v20 = vpack.c.bf16 %v2098_v18, %v2095_v16  ;;  %5820 = vmatpush3.bf16.msra.mxu1 %v7421_v10 }
 0x3ed   : > { %5819 = vmatprep.subr.bf16.mxu1 %v7471_v37 }
 0x3ee   : > { %6228 = vtanh.bf16 %v2321_v20 }
 0x3ef   : > { %6230 = vtanh.bf16 %v2322_v19 }
 0x3f0   : > { %5821 = vmatpush3.bf16.msra.mxu1 %v7471_v37 }
 0x3f1   : > { %v6225_v21 = vpop.eup %6224 }
 0x3f2   : > { %v6227_v23 = vpop.eup %6226  ;;  %5618 = vmatprep.mubr.msk.bf16.mxu1 %vm2404_vm1, %v6225_v21 }
 0x3f3   : > { %5619 = vmatmul.mubr.msk.bf16.gmra.mrb[132].mxu1 %vm2404_vm1, %v6227_v23 }
 0x3f6   : > { %v5560_v24 = vpop.f32.mrb[76].mxu1 }
 0x3f7   : > { %v2110_v25 = vpop.f32.mrb[77].mxu1  ;;  %v2119_v28 = vadd.f32 %v5560_v24, %v7481_v50 }
 0x3f8   : > { %v5561_v26 = vpop.f32.mrb[78].mxu1  ;;  %v2111_v31 = vadd.f32 %v7481_v50, %v2110_v25 }
 0x3f9   : > { %v6229_v27 = vpop.eup %6228  ;;  %v2122_v10 = vadd.f32 %v5561_v26, %v7481_v50  ;;  %v2113_v29 = vpop.f32.mrb[79].mxu1 }
 0x3fa   : > { %v6231_v30 = vpop.eup %6230  ;;  %v2114_v32 = vadd.f32 %v7481_v50, %v2113_v29  ;;  %5622 = vmatprep.mubr.msk.bf16.mxu1 %vm2404_vm1, %v6229_v27 }
 0x3fb   : > { %v2324_v33 = vpack.c.bf16 %v2122_v10, %v2119_v28  ;;  %5623 = vmatmul.mubr.msk.bf16.gmra.mrb[136].mxu1 %vm2404_vm1, %v6231_v30 }
 0x3fc   : > { %v2323_v34 = vpack.c.bf16 %v2114_v32, %v2111_v31 }
 0x3fe   : > { %6232 = vtanh.bf16 %v2323_v34 }
 0x3ff   : > { %6234 = vtanh.bf16 %v2324_v33 }
 0x406   : > { %v5564_v35 = vpop.f32.mrb[80].mxu1 }
 0x407   : > { %v2126_v36 = vpop.f32.mrb[81].mxu1  ;;  %v2135_v39 = vadd.f32 %v5564_v35, %v7481_v50 }
 0x408   : > { %v5565_v37 = vpop.f32.mrb[82].mxu1  ;;  %v2127_v43 = vadd.f32 %v7481_v50, %v2126_v36 }
 0x409   : > { %v6233_v38 = vpop.eup %6232  ;;  %v2138_v40 = vadd.f32 %v5565_v37, %v7481_v50  ;;  %v2129_v41 = vpop.f32.mrb[83].mxu1 }
 0x40a   : > { %v6235_v42 = vpop.eup %6234  ;;  %v2130_v44 = vadd.f32 %v7481_v50, %v2129_v41  ;;  %5626 = vmatprep.mubr.msk.bf16.mxu1 %vm2404_vm1, %v6233_v38 }
 0x40b   : > { %v2326_v45 = vpack.c.bf16 %v2138_v40, %v2135_v39  ;;  %5627 = vmatmul.mubr.msk.bf16.gmra.mrb[140].mxu1 %vm2404_vm1, %v6235_v42 }
 0x40c   : > { %v2325_v46 = vpack.c.bf16 %v2130_v44, %v2127_v43 }
 0x40e   : > { %6236 = vtanh.bf16 %v2325_v46 }
 0x40f   : > { %6238 = vtanh.bf16 %v2326_v45 }
 0x416   : > { %v5568_v47 = vpop.f32.mrb[84].mxu1 }
 0x417   : > { %v2142_v48 = vpop.f32.mrb[85].mxu1  ;;  %v2151_v52 = vadd.f32 %v5568_v47, %v7481_v50 }
 0x418   : > { %v5569_v49 = vpop.f32.mrb[86].mxu1  ;;  %v2143_v22 = vadd.f32 %v7481_v50, %v2142_v48 }
 0x419   : > { %v6237_v51 = vpop.eup %6236  ;;  %v2154_v53 = vadd.f32 %v5569_v49, %v7481_v50  ;;  %v2145_v54 = vpop.f32.mrb[87].mxu1 }
 0x41a   : > { %v6239_v55 = vpop.eup %6238  ;;  %v2146_v56 = vadd.f32 %v7481_v50, %v2145_v54  ;;  %5630 = vmatprep.mubr.msk.bf16.mxu1 %vm2404_vm1, %v6237_v51 }
 0x41b   : > { %v2328_v57 = vpack.c.bf16 %v2154_v53, %v2151_v52  ;;  %5631 = vmatmul.mubr.msk.bf16.gmra.mrb[144].mxu1 %vm2404_vm1, %v6239_v55 }
 0x41c   : > { %v2327_v58 = vpack.c.bf16 %v2146_v56, %v2143_v22 }
 0x41e   : > { %6240 = vtanh.bf16 %v2327_v58 }
 0x41f   : > { %6242 = vtanh.bf16 %v2328_v57 }
 0x426   : > { %v5572_v17 = vpop.f32.mrb[88].mxu1 }
 0x427   : > { %v2158_v59 = vpop.f32.mrb[89].mxu1  ;;  %v2167_v62 = vadd.f32 %v5572_v17, %v7481_v50 }
 0x428   : > { %v5573_v60 = vpop.f32.mrb[90].mxu1  ;;  %v2159_v3 = vadd.f32 %v7481_v50, %v2158_v59 }
 0x429   : > { %v6241_v61 = vpop.eup %6240  ;;  %v2170_v63 = vadd.f32 %v5573_v60, %v7481_v50  ;;  %v2161_v1 = vpop.f32.mrb[91].mxu1 }
 0x42a   : > { %v6243_v2 = vpop.eup %6242  ;;  %v2162_v4 = vadd.f32 %v7481_v50, %v2161_v1  ;;  %5634 = vmatprep.mubr.msk.bf16.mxu1 %vm2404_vm1, %v6241_v61 }
 0x42b   : > { %v2330_v5 = vpack.c.bf16 %v2170_v63, %v2167_v62  ;;  %5635 = vmatmul.mubr.msk.bf16.gmra.mrb[148].mxu1 %vm2404_vm1, %v6243_v2 }
 0x42c   : > { %v2329_v6 = vpack.c.bf16 %v2162_v4, %v2159_v3 }
 0x42e   : > { %6244 = vtanh.bf16 %v2329_v6 }
 0x42f   : > { %6246 = vtanh.bf16 %v2330_v5 }
 0x436   : > { %v5576_v7 = vpop.f32.mrb[92].mxu1 }
 0x437   : > { %v2174_v8 = vpop.f32.mrb[93].mxu1  ;;  %v2183_v12 = vadd.f32 %v5576_v7, %v7481_v50 }
 0x438   : > { %v5577_v9 = vpop.f32.mrb[94].mxu1  ;;  %v2175_v16 = vadd.f32 %v7481_v50, %v2174_v8 }
 0x439   : > { %v6245_v11 = vpop.eup %6244  ;;  %v2186_v13 = vadd.f32 %v5577_v9, %v7481_v50  ;;  %v2177_v14 = vpop.f32.mrb[95].mxu1 }
 0x43a   : > { %v6247_v15 = vpop.eup %6246  ;;  %v2178_v18 = vadd.f32 %v7481_v50, %v2177_v14  ;;  %5638 = vmatprep.mubr.msk.bf16.mxu1 %vm2404_vm1, %v6245_v11 }
 0x43b   : > { %v2332_v19 = vpack.c.bf16 %v2186_v13, %v2183_v12  ;;  %5639 = vmatmul.mubr.msk.bf16.gmra.mrb[152].mxu1 %vm2404_vm1, %v6247_v15 }
 0x43c   : > { %v2331_v20 = vpack.c.bf16 %v2178_v18, %v2175_v16 }
 0x43e   : > { %6248 = vtanh.bf16 %v2331_v20 }
 0x43f   : > { %6250 = vtanh.bf16 %v2332_v19 }
 0x446   : > { %v5580_v21 = vpop.f32.mrb[96].mxu1 }
 0x447   : > { %v2190_v23 = vpop.f32.mrb[97].mxu1  ;;  %v2199_v26 = vadd.f32 %v5580_v21, %v7481_v50 }
 0x448   : > { %v5581_v24 = vpop.f32.mrb[98].mxu1  ;;  %v2191_v29 = vadd.f32 %v7481_v50, %v2190_v23 }
 0x449   : > { %v6249_v25 = vpop.eup %6248  ;;  %v2202_v27 = vadd.f32 %v5581_v24, %v7481_v50  ;;  %v2193_v28 = vpop.f32.mrb[99].mxu1 }
 0x44a   : > { %v6251_v10 = vpop.eup %6250  ;;  %v2194_v30 = vadd.f32 %v7481_v50, %v2193_v28  ;;  %5642 = vmatprep.mubr.msk.bf16.mxu1 %vm2404_vm1, %v6249_v25 }
 0x44b   : > { %v2334_v31 = vpack.c.bf16 %v2202_v27, %v2199_v26  ;;  %5643 = vmatmul.mubr.msk.bf16.gmra.mrb[156].mxu1 %vm2404_vm1, %v6251_v10 }
 0x44c   : > { %v2333_v32 = vpack.c.bf16 %v2194_v30, %v2191_v29 }
 0x44e   : > { %6252 = vtanh.bf16 %v2333_v32 }
 0x44f   : > { %6254 = vtanh.bf16 %v2334_v31 }
 0x456   : > { %v5584_v33 = vpop.f32.mrb[100].mxu1 }
 0x457   : > { %v2206_v34 = vpop.f32.mrb[101].mxu1  ;;  %v2215_v37 = vadd.f32 %v5584_v33, %v7481_v50 }
 0x458   : > { %v5585_v35 = vpop.f32.mrb[102].mxu1  ;;  %v2207_v41 = vadd.f32 %v7481_v50, %v2206_v34 }
 0x459   : > { %v6253_v36 = vpop.eup %6252  ;;  %v2218_v38 = vadd.f32 %v5585_v35, %v7481_v50  ;;  %v2209_v39 = vpop.f32.mrb[103].mxu1 }
 0x45a   : > { %v6255_v40 = vpop.eup %6254  ;;  %v2210_v42 = vadd.f32 %v7481_v50, %v2209_v39  ;;  %5646 = vmatprep.mubr.msk.bf16.mxu1 %vm2404_vm1, %v6253_v36 }
 0x45b   : > { %v2336_v43 = vpack.c.bf16 %v2218_v38, %v2215_v37  ;;  %5647 = vmatmul.mubr.msk.bf16.gmra.mrb[160].mxu1 %vm2404_vm1, %v6255_v40 }
 0x45c   : > { %v2335_v44 = vpack.c.bf16 %v2210_v42, %v2207_v41 }
 0x45e   : > { %6256 = vtanh.bf16 %v2335_v44 }
 0x45f   : > { %6258 = vtanh.bf16 %v2336_v43 }
 0x466   : > { %v5588_v45 = vpop.f32.mrb[104].mxu1 }
 0x467   : > { %v2222_v46 = vpop.f32.mrb[105].mxu1  ;;  %v2231_v49 = vadd.f32 %v5588_v45, %v7481_v50 }
 0x468   : > { %v5589_v47 = vpop.f32.mrb[106].mxu1  ;;  %v2223_v54 = vadd.f32 %v7481_v50, %v2222_v46 }
 0x469   : > { %v6257_v48 = vpop.eup %6256  ;;  %v2234_v51 = vadd.f32 %v5589_v47, %v7481_v50  ;;  %v2225_v52 = vpop.f32.mrb[107].mxu1 }
 0x46a   : > { %v6259_v53 = vpop.eup %6258  ;;  %v2226_v55 = vadd.f32 %v7481_v50, %v2225_v52  ;;  %5650 = vmatprep.mubr.msk.bf16.mxu1 %vm2404_vm1, %v6257_v48 }
 0x46b   : > { %v2338_v22 = vpack.c.bf16 %v2234_v51, %v2231_v49  ;;  %5651 = vmatmul.mubr.msk.bf16.gmra.mrb[164].mxu1 %vm2404_vm1, %v6259_v53 }
 0x46c   : > { %v2337_v56 = vpack.c.bf16 %v2226_v55, %v2223_v54 }
 0x46e   : > { %6260 = vtanh.bf16 %v2337_v56  ;;  %v7582_v56 = vld [vmem:[#allocation11] ss:$0 sm:$0xff] }
 0x46f   : > { %6262 = vtanh.bf16 %v2338_v22 }
 0x476   : > { %v5592_v57 = vpop.f32.mrb[108].mxu1 }
 0x477   : > { %v2238_v58 = vpop.f32.mrb[109].mxu1  ;;  %v2247_v60 = vadd.f32 %v5592_v57, %v7481_v50 }
 0x478   : > { %v5593_v17 = vpop.f32.mrb[110].mxu1  ;;  %v2239_v1 = vadd.f32 %v7481_v50, %v2238_v58 }
 0x479   : > { %v6261_v59 = vpop.eup %6260  ;;  %v2250_v61 = vadd.f32 %v5593_v17, %v7481_v50  ;;  %v2241_v62 = vpop.f32.mrb[111].mxu1 }
 0x47a   : > { %v6263_v63 = vpop.eup %6262  ;;  %v2242_v2 = vadd.f32 %v7481_v50, %v2241_v62  ;;  %5654 = vmatprep.mubr.msk.bf16.mxu1 %vm2404_vm1, %v6261_v59 }
 0x47b   : > { %v2340_v3 = vpack.c.bf16 %v2250_v61, %v2247_v60  ;;  %5655 = vmatmul.mubr.msk.bf16.gmra.mrb[168].mxu1 %vm2404_vm1, %v6263_v63 }
 0x47c   : > { %v2339_v4 = vpack.c.bf16 %v2242_v2, %v2239_v1 }
 0x47e   : > { %6264 = vtanh.bf16 %v2339_v4 }
 0x47f   : > { %6266 = vtanh.bf16 %v2340_v3 }
 0x486   : > { %v5596_v5 = vpop.f32.mrb[112].mxu1 }
 0x487   : > { %v2254_v6 = vpop.f32.mrb[113].mxu1  ;;  %v2263_v9 = vadd.f32 %v5596_v5, %v7481_v50 }
 0x488   : > { %v5597_v7 = vpop.f32.mrb[114].mxu1  ;;  %v2255_v14 = vadd.f32 %v7481_v50, %v2254_v6 }
 0x489   : > { %v6265_v8 = vpop.eup %6264  ;;  %v2266_v11 = vadd.f32 %v5597_v7, %v7481_v50  ;;  %v2257_v12 = vpop.f32.mrb[115].mxu1 }
 0x48a   : > { %v6267_v13 = vpop.eup %6266  ;;  %v2258_v15 = vadd.f32 %v7481_v50, %v2257_v12  ;;  %5658 = vmatprep.mubr.msk.bf16.mxu1 %vm2404_vm1, %v6265_v8 }
 0x48b   : > { %v2342_v16 = vpack.c.bf16 %v2266_v11, %v2263_v9  ;;  %5659 = vmatmul.mubr.msk.bf16.gmra.mrb[172].mxu1 %vm2404_vm1, %v6267_v13 }
 0x48c   : > { %v2341_v18 = vpack.c.bf16 %v2258_v15, %v2255_v14 }
 0x48e   : > { %6268 = vtanh.bf16 %v2341_v18 }
 0x48f   : > { %6270 = vtanh.bf16 %v2342_v16 }
 0x496   : > { %v5600_v19 = vpop.f32.mrb[116].mxu1 }
 0x497   : > { %v2270_v20 = vpop.f32.mrb[117].mxu1  ;;  %v2279_v24 = vadd.f32 %v5600_v19, %v7481_v50 }
 0x498   : > { %v5601_v21 = vpop.f32.mrb[118].mxu1  ;;  %v2271_v28 = vadd.f32 %v7481_v50, %v2270_v20 }
 0x499   : > { %v6269_v23 = vpop.eup %6268  ;;  %v2282_v25 = vadd.f32 %v5601_v21, %v7481_v50  ;;  %v2273_v26 = vpop.f32.mrb[119].mxu1 }
 0x49a   : > { %v6271_v27 = vpop.eup %6270  ;;  %v2274_v10 = vadd.f32 %v7481_v50, %v2273_v26  ;;  %5662 = vmatprep.mubr.msk.bf16.mxu1 %vm2404_vm1, %v6269_v23 }
 0x49b   : > { %v2344_v29 = vpack.c.bf16 %v2282_v25, %v2279_v24  ;;  %5663 = vmatmul.mubr.msk.bf16.gmra.mrb[176].mxu1 %vm2404_vm1, %v6271_v27 }
 0x49c   : > { %v2343_v30 = vpack.c.bf16 %v2274_v10, %v2271_v28 }
 0x49e   : > { %6272 = vtanh.bf16 %v2343_v30 }
 0x49f   : > { %6274 = vtanh.bf16 %v2344_v29 }
 0x4a6   : > { %v5604_v31 = vpop.f32.mrb[120].mxu1 }
 0x4a7   : > { %v2286_v32 = vpop.f32.mrb[121].mxu1  ;;  %v2295_v35 = vadd.f32 %v5604_v31, %v7481_v50 }
 0x4a8   : > { %v5605_v33 = vpop.f32.mrb[122].mxu1  ;;  %v2287_v39 = vadd.f32 %v7481_v50, %v2286_v32 }
 0x4a9   : > { %v6273_v34 = vpop.eup %6272  ;;  %v2298_v36 = vadd.f32 %v5605_v33, %v7481_v50  ;;  %v2289_v37 = vpop.f32.mrb[123].mxu1 }
 0x4aa   : > { %v6275_v38 = vpop.eup %6274  ;;  %v2290_v40 = vadd.f32 %v7481_v50, %v2289_v37  ;;  %5666 = vmatprep.mubr.msk.bf16.mxu1 %vm2404_vm1, %v6273_v34 }
 0x4ab   : > { %v2346_v41 = vpack.c.bf16 %v2298_v36, %v2295_v35  ;;  %5667 = vmatmul.mubr.msk.bf16.gmra.mrb[180].mxu1 %vm2404_vm1, %v6275_v38 }
 0x4ac   : > { %v2345_v42 = vpack.c.bf16 %v2290_v40, %v2287_v39 }
 0x4ae   : > { %6276 = vtanh.bf16 %v2345_v42 }
 0x4af   : > { %6278 = vtanh.bf16 %v2346_v41  ;;  %v7611_v41 = vld [vmem:[%s8207_s2] sm:$0xff]  }
 0x4b0   : > { %5746 = vmatprep.subr.bf16.mxu1 %v7611_v41 }
 0x4b6   : > { %v5608_v43 = vpop.f32.mrb[124].mxu1 }
 0x4b7   : > { %v2302_v44 = vpop.f32.mrb[125].mxu1  ;;  %v2311_v47 = vadd.f32 %v5608_v43, %v7481_v50 }
 0x4b8   : > { %v5609_v45 = vpop.f32.mrb[126].mxu1  ;;  %v2303_v52 = vadd.f32 %v7481_v50, %v2302_v44 }
 0x4b9   : > { %v6277_v46 = vpop.eup %6276  ;;  %v2314_v48 = vadd.f32 %v5609_v45, %v7481_v50  ;;  %v2305_v49 = vpop.f32.mrb[127].mxu1 }
 0x4ba   : > { %v6279_v51 = vpop.eup %6278  ;;  %v2306_v53 = vadd.f32 %v7481_v50, %v2305_v49  ;;  %5670 = vmatprep.mubr.msk.bf16.mxu1 %vm2404_vm1, %v6277_v46 }
 0x4bb   : > { %v2348_v54 = vpack.c.bf16 %v2314_v48, %v2311_v47  ;;  %5671 = vmatmul.mubr.msk.bf16.gmra.mrb[184].mxu1 %vm2404_vm1, %v6279_v51 }
 0x4bc   : > { %v2347_v55 = vpack.c.bf16 %v2306_v53, %v2303_v52 }
 0x4be   : > { %6280 = vtanh.bf16 %v2347_v55  ;;  %v5616_v22 = vpop.f32.mrb[128].mxu1 }
 0x4bf   : > { %6282 = vtanh.bf16 %v2348_v54  ;;  %v2535_v57 = vpop.f32.mrb[129].mxu1  ;;  %v2544_v17 = vadd.f32 %v5616_v22, %v7582_v56 }
 0x4c0   : > { %v5617_v58 = vpop.f32.mrb[130].mxu1  ;;  %v2536_v50 = vadd.f32 %v7582_v56, %v2535_v57 }
 0x4c1   : > { %v2547_v59 = vadd.f32 %v5617_v58, %v7582_v56  ;;  %v2538_v60 = vpop.f32.mrb[131].mxu1 }
 0x4c2   : > { %v2539_v61 = vadd.f32 %v7582_v56, %v2538_v60 }
 0x4c3   : > { %v2791_v62 = vpack.c.bf16 %v2547_v59, %v2544_v17 }
 0x4c4   : > { %v2790_v63 = vpack.c.bf16 %v2539_v61, %v2536_v50 }
 0x4c6   : > { %6284 = vtanh.bf16 %v2790_v63  ;;  %v5620_v1 = vpop.f32.mrb[132].mxu1 }
 0x4c7   : > { %6286 = vtanh.bf16 %v2791_v62  ;;  %v2551_v2 = vpop.f32.mrb[133].mxu1  ;;  %v2560_v5 = vadd.f32 %v5620_v1, %v7582_v56 }
 0x4c8   : > { %v5621_v3 = vpop.f32.mrb[134].mxu1  ;;  %v2552_v9 = vadd.f32 %v7582_v56, %v2551_v2 }
 0x4c9   : > { %v6281_v4 = vpop.eup %6280  ;;  %v2563_v6 = vadd.f32 %v5621_v3, %v7582_v56  ;;  %v2554_v7 = vpop.f32.mrb[135].mxu1 }
 0x4ca   : > { %v6283_v8 = vpop.eup %6282  ;;  %v2555_v11 = vadd.f32 %v7582_v56, %v2554_v7  ;;  %5674 = vmatprep.mubr.msk.bf16.mxu1 %vm2404_vm1, %v6281_v4 }
 0x4cb   : > { %v2793_v12 = vpack.c.bf16 %v2563_v6, %v2560_v5  ;;  %5675 = vmatmul.mubr.msk.bf16.gmra.mrb[188].mxu1 %vm2404_vm1, %v6283_v8 }
 0x4cc   : > { %v2792_v13 = vpack.c.bf16 %v2555_v11, %v2552_v9 }
 0x4ce   : > { %6288 = vtanh.bf16 %v2792_v13  ;;  %v5624_v14 = vpop.f32.mrb[136].mxu1 }
 0x4cf   : > { %6290 = vtanh.bf16 %v2793_v12  ;;  %v2567_v15 = vpop.f32.mrb[137].mxu1  ;;  %v2576_v19 = vadd.f32 %v5624_v14, %v7582_v56 }
 0x4d0   : > { %v5625_v16 = vpop.f32.mrb[138].mxu1  ;;  %v2568_v24 = vadd.f32 %v7582_v56, %v2567_v15 }
 0x4d1   : > { %v6285_v18 = vpop.eup %6284  ;;  %v2579_v20 = vadd.f32 %v5625_v16, %v7582_v56  ;;  %v2570_v21 = vpop.f32.mrb[139].mxu1 }
 0x4d2   : > { %v6287_v23 = vpop.eup %6286  ;;  %v2571_v25 = vadd.f32 %v7582_v56, %v2570_v21  ;;  %5682 = vmatprep.mubr.msk.bf16.mxu0 %vm2404_vm1, %v6285_v18 }
 0x4d3   : > { %v2795_v26 = vpack.c.bf16 %v2579_v20, %v2576_v19  ;;  %5683 = vmatmul.mubr.msk.bf16.vlgmr.msra.gmra.mrb[128].mxu0 %vm2404_vm1, %v6287_v23 }
 0x4d4   : > { %v2794_v27 = vpack.c.bf16 %v2571_v25, %v2568_v24  ;;  %v6065_v24 = vld [vmem:[%s8207_s2 + $0x8] sm:$0xff]  }
 0x4d6   : > { %6292 = vtanh.bf16 %v2794_v27 }
 0x4d7   : > { %6294 = vtanh.bf16 %v2795_v26 }
 0x4d9   : > { %v6289_v28 = vpop.eup %6288 }
 0x4da   : > { %v6291_v10 = vpop.eup %6290  ;;  %5686 = vmatprep.mubr.msk.bf16.mxu0 %vm2404_vm1, %v6289_v28 }
 0x4db   : > { %5687 = vmatmul.mubr.msk.bf16.gmra.mrb[132].mxu0 %vm2404_vm1, %v6291_v10 }
 0x4de   : > { %v5628_v29 = vpop.f32.mrb[140].mxu1 }
 0x4df   : > { %v2583_v30 = vpop.f32.mrb[141].mxu1  ;;  %v2592_v33 = vadd.f32 %v5628_v29, %v7582_v56  ;;  %v6066_v29 = vld [vmem:[%s8207_s2 + $0x10] sm:$0xff]  }
 0x4e0   : > { %v5629_v31 = vpop.f32.mrb[142].mxu1  ;;  %v2584_v37 = vadd.f32 %v7582_v56, %v2583_v30  ;;  %v6067_v30 = vld [vmem:[%s8207_s2 + $0x18] sm:$0xff]  }
 0x4e1   : > { %v6293_v32 = vpop.eup %6292  ;;  %v2595_v34 = vadd.f32 %v5629_v31, %v7582_v56  ;;  %v2586_v35 = vpop.f32.mrb[143].mxu1 }
 0x4e2   : > { %v6295_v36 = vpop.eup %6294  ;;  %v2587_v38 = vadd.f32 %v7582_v56, %v2586_v35  ;;  %5690 = vmatprep.mubr.msk.bf16.mxu0 %vm2404_vm1, %v6293_v32 }
 0x4e3   : > { %v2797_v39 = vpack.c.bf16 %v2595_v34, %v2592_v33  ;;  %5691 = vmatmul.mubr.msk.bf16.gmra.mrb[136].mxu0 %vm2404_vm1, %v6295_v36 }
 0x4e4   : > { %v2796_v40 = vpack.c.bf16 %v2587_v38, %v2584_v37 }
 0x4e6   : > { %6296 = vtanh.bf16 %v2796_v40 }
 0x4e7   : > { %6298 = vtanh.bf16 %v2797_v39 }
 0x4ee   : > { %v5632_v42 = vpop.f32.mrb[144].mxu1 }
 0x4ef   : > { %v2599_v43 = vpop.f32.mrb[145].mxu1  ;;  %v2608_v46 = vadd.f32 %v5632_v42, %v7582_v56 }
 0x4f0   : > { %v5633_v44 = vpop.f32.mrb[146].mxu1  ;;  %v2600_v51 = vadd.f32 %v7582_v56, %v2599_v43 }
 0x4f1   : > { %v6297_v45 = vpop.eup %6296  ;;  %v2611_v47 = vadd.f32 %v5633_v44, %v7582_v56  ;;  %v2602_v48 = vpop.f32.mrb[147].mxu1 }
 0x4f2   : > { %v6299_v49 = vpop.eup %6298  ;;  %v2603_v52 = vadd.f32 %v7582_v56, %v2602_v48  ;;  %5694 = vmatprep.mubr.msk.bf16.mxu0 %vm2404_vm1, %v6297_v45 }
 0x4f3   : > { %v2799_v53 = vpack.c.bf16 %v2611_v47, %v2608_v46  ;;  %5695 = vmatmul.mubr.msk.bf16.gmra.mrb[140].mxu0 %vm2404_vm1, %v6299_v49 }
 0x4f4   : > { %v2798_v54 = vpack.c.bf16 %v2603_v52, %v2600_v51 }
 0x4f6   : > { %6300 = vtanh.bf16 %v2798_v54 }
 0x4f7   : > { %6302 = vtanh.bf16 %v2799_v53 }
 0x4fe   : > { %v5636_v55 = vpop.f32.mrb[148].mxu1 }
 0x4ff   : > { %v2615_v22 = vpop.f32.mrb[149].mxu1  ;;  %v2624_v17 = vadd.f32 %v5636_v55, %v7582_v56 }
 0x500   : > { %v5637_v57 = vpop.f32.mrb[150].mxu1  ;;  %v2616_v61 = vadd.f32 %v7582_v56, %v2615_v22 }
 0x501   : > { %v6301_v58 = vpop.eup %6300  ;;  %v2627_v59 = vadd.f32 %v5637_v57, %v7582_v56  ;;  %v2618_v60 = vpop.f32.mrb[151].mxu1 }
 0x502   : > { %v6303_v50 = vpop.eup %6302  ;;  %v2619_v62 = vadd.f32 %v7582_v56, %v2618_v60  ;;  %5698 = vmatprep.mubr.msk.bf16.mxu0 %vm2404_vm1, %v6301_v58 }
 0x503   : > { %v2801_v63 = vpack.c.bf16 %v2627_v59, %v2624_v17  ;;  %5699 = vmatmul.mubr.msk.bf16.gmra.mrb[144].mxu0 %vm2404_vm1, %v6303_v50 }
 0x504   : > { %v2800_v1 = vpack.c.bf16 %v2619_v62, %v2616_v61 }
 0x506   : > { %6304 = vtanh.bf16 %v2800_v1 }
 0x507   : > { %6306 = vtanh.bf16 %v2801_v63 }
 0x50e   : > { %v5640_v2 = vpop.f32.mrb[152].mxu1 }
 0x50f   : > { %v2631_v3 = vpop.f32.mrb[153].mxu1  ;;  %v2640_v6 = vadd.f32 %v5640_v2, %v7582_v56 }
 0x510   : > { %v5641_v4 = vpop.f32.mrb[154].mxu1  ;;  %v2632_v11 = vadd.f32 %v7582_v56, %v2631_v3 }
 0x511   : > { %v6305_v5 = vpop.eup %6304  ;;  %v2643_v7 = vadd.f32 %v5641_v4, %v7582_v56  ;;  %v2634_v8 = vpop.f32.mrb[155].mxu1 }
 0x512   : > { %v6307_v9 = vpop.eup %6306  ;;  %v2635_v12 = vadd.f32 %v7582_v56, %v2634_v8  ;;  %5702 = vmatprep.mubr.msk.bf16.mxu0 %vm2404_vm1, %v6305_v5 }
 0x513   : > { %v2803_v13 = vpack.c.bf16 %v2643_v7, %v2640_v6  ;;  %5703 = vmatmul.mubr.msk.bf16.gmra.mrb[148].mxu0 %vm2404_vm1, %v6307_v9 }
 0x514   : > { %v2802_v14 = vpack.c.bf16 %v2635_v12, %v2632_v11  ;;  %3954 = vmatprep.mubr.bf16.mxu0 %v6765_v0 }
 0x516   : > { %6308 = vtanh.bf16 %v2802_v14 }
 0x517   : > { %6310 = vtanh.bf16 %v2803_v13 }
 0x51e   : > { %v5644_v15 = vpop.f32.mrb[156].mxu1 }
 0x51f   : > { %v2647_v16 = vpop.f32.mrb[157].mxu1  ;;  %v2656_v20 = vadd.f32 %v5644_v15, %v7582_v56 }
 0x520   : > { %v5645_v18 = vpop.f32.mrb[158].mxu1  ;;  %v2648_v26 = vadd.f32 %v7582_v56, %v2647_v16 }
 0x521   : > { %v6309_v19 = vpop.eup %6308  ;;  %v2659_v21 = vadd.f32 %v5645_v18, %v7582_v56  ;;  %v2650_v23 = vpop.f32.mrb[159].mxu1 }
 0x522   : > { %v6311_v25 = vpop.eup %6310  ;;  %v2651_v27 = vadd.f32 %v7582_v56, %v2650_v23  ;;  %5706 = vmatprep.mubr.msk.bf16.mxu1 %vm2404_vm1, %v6309_v19 }
 0x523   : > { %v2805_v28 = vpack.c.bf16 %v2659_v21, %v2656_v20  ;;  %5707 = vmatmul.mubr.msk.bf16.vlgmr.msra.gmra.mrb[192].mxu1 %vm2404_vm1, %v6311_v25 }
 0x524   : > { %v2804_v10 = vpack.c.bf16 %v2651_v27, %v2648_v26  ;;  %5747 = vmatpush3.bf16.msra.mxu1 %v7611_v41 }
 0x525   : > { %5748 = vmatprep.subr.bf16.mxu1 %v6065_v24 }
 0x526   : > { %6312 = vtanh.bf16 %v2804_v10 }
 0x527   : > { %6314 = vtanh.bf16 %v2805_v28 }
 0x528   : > { %5749 = vmatpush3.bf16.msra.mxu1 %v6065_v24 }
 0x529   : > { %5750 = vmatprep.subr.bf16.mxu1 %v6066_v29 }
 0x52c   : > { %5751 = vmatpush3.bf16.msra.mxu1 %v6066_v29 }
 0x52d   : > { %5752 = vmatprep.subr.bf16.mxu1 %v6067_v30 }
 0x52e   : > { %v5648_v31 = vpop.f32.mrb[160].mxu1 }
 0x52f   : > { %v2663_v32 = vpop.f32.mrb[161].mxu1  ;;  %v2672_v35 = vadd.f32 %v5648_v31, %v7582_v56 }
 0x530   : > { %v5649_v33 = vpop.f32.mrb[162].mxu1  ;;  %5753 = vmatpush3.bf16.msra.mxu1 %v6067_v30  ;;  %v2664_v39 = vadd.f32 %v7582_v56, %v2663_v32 }
 0x531   : > { %v6313_v34 = vpop.eup %6312  ;;  %v2675_v36 = vadd.f32 %v5649_v33, %v7582_v56  ;;  %v2666_v37 = vpop.f32.mrb[163].mxu1 }
 0x532   : > { %v6315_v38 = vpop.eup %6314  ;;  %v2667_v40 = vadd.f32 %v7582_v56, %v2666_v37  ;;  %5710 = vmatprep.mubr.msk.bf16.mxu1 %vm2404_vm1, %v6313_v34 }
 0x533   : > { %v2807_v41 = vpack.c.bf16 %v2675_v36, %v2672_v35  ;;  %5711 = vmatmul.mubr.msk.bf16.gmra.mrb[196].mxu1 %vm2404_vm1, %v6315_v38 }
 0x534   : > { %v2806_v42 = vpack.c.bf16 %v2667_v40, %v2664_v39 }
 0x536   : > { %6316 = vtanh.bf16 %v2806_v42 }
 0x537   : > { %6318 = vtanh.bf16 %v2807_v41 }
 0x53e   : > { %v5652_v43 = vpop.f32.mrb[164].mxu1 }
 0x53f   : > { %v2679_v44 = vpop.f32.mrb[165].mxu1  ;;  %v2688_v47 = vadd.f32 %v5652_v43, %v7582_v56 }
 0x540   : > { %v5653_v45 = vpop.f32.mrb[166].mxu1  ;;  %v2680_v52 = vadd.f32 %v7582_v56, %v2679_v44 }
 0x541   : > { %v6317_v46 = vpop.eup %6316  ;;  %v2691_v48 = vadd.f32 %v5653_v45, %v7582_v56  ;;  %v2682_v49 = vpop.f32.mrb[167].mxu1 }
 0x542   : > { %v6319_v51 = vpop.eup %6318  ;;  %v2683_v53 = vadd.f32 %v7582_v56, %v2682_v49  ;;  %5714 = vmatprep.mubr.msk.bf16.mxu1 %vm2404_vm1, %v6317_v46 }
 0x543   : > { %v2809_v54 = vpack.c.bf16 %v2691_v48, %v2688_v47  ;;  %5715 = vmatmul.mubr.msk.bf16.gmra.mrb[200].mxu1 %vm2404_vm1, %v6319_v51 }
 0x544   : > { %v2808_v55 = vpack.c.bf16 %v2683_v53, %v2680_v52 }
 0x546   : > { %6320 = vtanh.bf16 %v2808_v55 }
 0x547   : > { %6322 = vtanh.bf16 %v2809_v54 }
 0x54e   : > { %v5656_v22 = vpop.f32.mrb[168].mxu1 }
 0x54f   : > { %v2695_v57 = vpop.f32.mrb[169].mxu1  ;;  %v2704_v59 = vadd.f32 %v5656_v22, %v7582_v56 }
 0x550   : > { %v5657_v58 = vpop.f32.mrb[170].mxu1  ;;  %v2696_v62 = vadd.f32 %v7582_v56, %v2695_v57 }
 0x551   : > { %v6321_v17 = vpop.eup %6320  ;;  %v2707_v60 = vadd.f32 %v5657_v58, %v7582_v56  ;;  %v2698_v50 = vpop.f32.mrb[171].mxu1 }
 0x552   : > { %v6323_v61 = vpop.eup %6322  ;;  %v2699_v63 = vadd.f32 %v7582_v56, %v2698_v50  ;;  %5718 = vmatprep.mubr.msk.bf16.mxu1 %vm2404_vm1, %v6321_v17 }
 0x553   : > { %v2811_v1 = vpack.c.bf16 %v2707_v60, %v2704_v59  ;;  %5719 = vmatmul.mubr.msk.bf16.gmra.mrb[204].mxu1 %vm2404_vm1, %v6323_v61 }
 0x554   : > { %v2810_v2 = vpack.c.bf16 %v2699_v63, %v2696_v62 }
 0x556   : > { %6324 = vtanh.bf16 %v2810_v2  ;;  %v7700_v2 = vld [vmem:[%s8208_s25] ss:$0 sm:$0xff] }
 0x557   : > { %6326 = vtanh.bf16 %v2811_v1 }
 0x55e   : > { %v5660_v3 = vpop.f32.mrb[172].mxu1 }
 0x55f   : > { %v2711_v4 = vpop.f32.mrb[173].mxu1  ;;  %v2720_v7 = vadd.f32 %v5660_v3, %v7582_v56 }
 0x560   : > { %v5661_v5 = vpop.f32.mrb[174].mxu1  ;;  %v2712_v12 = vadd.f32 %v7582_v56, %v2711_v4 }
 0x561   : > { %v6325_v6 = vpop.eup %6324  ;;  %v2723_v8 = vadd.f32 %v5661_v5, %v7582_v56  ;;  %v2714_v9 = vpop.f32.mrb[175].mxu1 }
 0x562   : > { %v6327_v11 = vpop.eup %6326  ;;  %v2715_v13 = vadd.f32 %v7582_v56, %v2714_v9  ;;  %5722 = vmatprep.mubr.msk.bf16.mxu1 %vm2404_vm1, %v6325_v6 }
 0x563   : > { %v2813_v14 = vpack.c.bf16 %v2723_v8, %v2720_v7  ;;  %5723 = vmatmul.mubr.msk.bf16.gmra.mrb[208].mxu1 %vm2404_vm1, %v6327_v11 }
 0x564   : > { %v2812_v15 = vpack.c.bf16 %v2715_v13, %v2712_v12 }
 0x566   : > { %6328 = vtanh.bf16 %v2812_v15 }
 0x567   : > { %6330 = vtanh.bf16 %v2813_v14 }
 0x56e   : > { %v5664_v16 = vpop.f32.mrb[176].mxu1 }
 0x56f   : > { %v2727_v18 = vpop.f32.mrb[177].mxu1  ;;  %v2736_v21 = vadd.f32 %v5664_v16, %v7582_v56 }
 0x570   : > { %v5665_v19 = vpop.f32.mrb[178].mxu1  ;;  %v2728_v26 = vadd.f32 %v7582_v56, %v2727_v18 }
 0x571   : > { %v6329_v20 = vpop.eup %6328  ;;  %v2739_v23 = vadd.f32 %v5665_v19, %v7582_v56  ;;  %v2730_v24 = vpop.f32.mrb[179].mxu1 }
 0x572   : > { %v6331_v25 = vpop.eup %6330  ;;  %v2731_v27 = vadd.f32 %v7582_v56, %v2730_v24  ;;  %5726 = vmatprep.mubr.msk.bf16.mxu1 %vm2404_vm1, %v6329_v20 }
 0x573   : > { %v2815_v28 = vpack.c.bf16 %v2739_v23, %v2736_v21  ;;  %5727 = vmatmul.mubr.msk.bf16.gmra.mrb[212].mxu1 %vm2404_vm1, %v6331_v25 }
 0x574   : > { %v2814_v10 = vpack.c.bf16 %v2731_v27, %v2728_v26 }
 0x576   : > { %6332 = vtanh.bf16 %v2814_v10 }
 0x577   : > { %6334 = vtanh.bf16 %v2815_v28 }
 0x57e   : > { %v5668_v29 = vpop.f32.mrb[180].mxu1 }
 0x57f   : > { %v2743_v30 = vpop.f32.mrb[181].mxu1  ;;  %v2752_v33 = vadd.f32 %v5668_v29, %v7582_v56 }
 0x580   : > { %v5669_v31 = vpop.f32.mrb[182].mxu1  ;;  %v2744_v37 = vadd.f32 %v7582_v56, %v2743_v30 }
 0x581   : > { %v6333_v32 = vpop.eup %6332  ;;  %v2755_v34 = vadd.f32 %v5669_v31, %v7582_v56  ;;  %v2746_v35 = vpop.f32.mrb[183].mxu1 }
 0x582   : > { %v6335_v36 = vpop.eup %6334  ;;  %v2747_v38 = vadd.f32 %v7582_v56, %v2746_v35  ;;  %5730 = vmatprep.mubr.msk.bf16.mxu1 %vm2404_vm1, %v6333_v32 }
 0x583   : > { %v2817_v39 = vpack.c.bf16 %v2755_v34, %v2752_v33  ;;  %5731 = vmatmul.mubr.msk.bf16.gmra.mrb[216].mxu1 %vm2404_vm1, %v6335_v36 }
 0x584   : > { %v2816_v40 = vpack.c.bf16 %v2747_v38, %v2744_v37 }
 0x586   : > { %6336 = vtanh.bf16 %v2816_v40 }
 0x587   : > { %6338 = vtanh.bf16 %v2817_v39 }
 0x58e   : > { %v5672_v41 = vpop.f32.mrb[184].mxu1 }
 0x58f   : > { %v2759_v42 = vpop.f32.mrb[185].mxu1  ;;  %v2768_v45 = vadd.f32 %v5672_v41, %v7582_v56 }
 0x590   : > { %v5673_v43 = vpop.f32.mrb[186].mxu1  ;;  %v2760_v49 = vadd.f32 %v7582_v56, %v2759_v42 }
 0x591   : > { %v6337_v44 = vpop.eup %6336  ;;  %v2771_v46 = vadd.f32 %v5673_v43, %v7582_v56  ;;  %v2762_v47 = vpop.f32.mrb[187].mxu1 }
 0x592   : > { %v6339_v48 = vpop.eup %6338  ;;  %v2763_v51 = vadd.f32 %v7582_v56, %v2762_v47  ;;  %5734 = vmatprep.mubr.msk.bf16.mxu1 %vm2404_vm1, %v6337_v44 }
 0x593   : > { %v2819_v52 = vpack.c.bf16 %v2771_v46, %v2768_v45  ;;  %5735 = vmatmul.mubr.msk.bf16.gmra.mrb[220].mxu1 %vm2404_vm1, %v6339_v48 }
 0x594   : > { %v2818_v53 = vpack.c.bf16 %v2763_v51, %v2760_v49 }
 0x596   : > { %6340 = vtanh.bf16 %v2818_v53 }
 0x597   : > { %6342 = vtanh.bf16 %v2819_v52 }
 0x59e   : > { %v5676_v54 = vpop.f32.mrb[188].mxu1 }
 0x59f   : > { %v2775_v55 = vpop.f32.mrb[189].mxu1  ;;  %v2784_v58 = vadd.f32 %v5676_v54, %v7582_v56 }
 0x5a0   : > { %v5677_v22 = vpop.f32.mrb[190].mxu1  ;;  %v2776_v50 = vadd.f32 %v7582_v56, %v2775_v55 }
 0x5a1   : > { %v6341_v57 = vpop.eup %6340  ;;  %v2787_v17 = vadd.f32 %v5677_v22, %v7582_v56  ;;  %v2778_v59 = vpop.f32.mrb[191].mxu1 }
 0x5a2   : > { %v6343_v60 = vpop.eup %6342  ;;  %v2779_v61 = vadd.f32 %v7582_v56, %v2778_v59  ;;  %5738 = vmatprep.mubr.msk.bf16.mxu1 %vm2404_vm1, %v6341_v57 }
 0x5a3   : > { %v2821_v62 = vpack.c.bf16 %v2787_v17, %v2784_v58  ;;  %5739 = vmatmul.mubr.msk.bf16.gmra.mrb[224].mxu1 %vm2404_vm1, %v6343_v60 }
 0x5a4   : > { %v2820_v63 = vpack.c.bf16 %v2779_v61, %v2776_v50 }
 0x5a6   : > { %6344 = vtanh.bf16 %v2820_v63  ;;  %v5684_v1 = vpop.f32.mrb[128].mxu0 }
 0x5a7   : > { %6346 = vtanh.bf16 %v2821_v62  ;;  %v3007_v3 = vpop.f32.mrb[129].mxu0  ;;  %v3016_v5 = vadd.f32 %v5684_v1, %v7700_v2 }
 0x5a8   : > { %v5685_v4 = vpop.f32.mrb[130].mxu0  ;;  %v3008_v7 = vadd.f32 %v7700_v2, %v3007_v3 }
 0x5a9   : > { %v3019_v56 = vadd.f32 %v5685_v4, %v7700_v2  ;;  %v3010_v6 = vpop.f32.mrb[131].mxu0 }
 0x5aa   : > { %v3011_v8 = vadd.f32 %v7700_v2, %v3010_v6 }
 0x5ab   : > { %v3263_v9 = vpack.c.bf16 %v3019_v56, %v3016_v5 }
 0x5ac   : > { %v3262_v11 = vpack.c.bf16 %v3011_v8, %v3008_v7 }
 0x5ae   : > { %6348 = vtanh.bf16 %v3262_v11  ;;  %v5688_v12 = vpop.f32.mrb[132].mxu0 }
 0x5af   : > { %6350 = vtanh.bf16 %v3263_v9  ;;  %v3023_v13 = vpop.f32.mrb[133].mxu0  ;;  %v3032_v16 = vadd.f32 %v5688_v12, %v7700_v2  ;;  %v6068_v12 = vld [vmem:[#allocation13] ss:$8 sps:$4 sm:$0xff]  }
 0x5b0   : > { %v5689_v14 = vpop.f32.mrb[134].mxu0  ;;  %v3024_v21 = vadd.f32 %v7700_v2, %v3023_v13  ;;  %v6070_v13 = vld [vmem:[#allocation13 + $0x4] ss:$8 sps:$4 sm:$0xff]  }
 0x5b1   : > { %v6345_v15 = vpop.eup %6344  ;;  %v3035_v18 = vadd.f32 %v5689_v14, %v7700_v2  ;;  %v3026_v19 = vpop.f32.mrb[135].mxu0  ;;  %3922 = vmatprep.subr.bf16.mxu0 %v6070_v13 }
 0x5b2   : > { %v6347_v20 = vpop.eup %6346  ;;  %v3027_v23 = vadd.f32 %v7700_v2, %v3026_v19  ;;  %5742 = vmatprep.mubr.msk.bf16.mxu1 %vm2404_vm1, %v6345_v15  ;;  %3923 = vmatpush1.bf16.msra.mxu0 %v6068_v12  ;;  %v6073_v19 = vld [vmem:[#allocation13 + $0x14] ss:$8 sps:$4 sm:$0xff]  }
 0x5b3   : > { %v3265_v24 = vpack.c.bf16 %v3035_v18, %v3032_v16  ;;  %5743 = vmatmul.mubr.msk.bf16.gmra.mrb[228].mxu1 %vm2404_vm1, %v6347_v20  ;;  %v6071_v18 = vld [vmem:[#allocation13 + $0x10] ss:$8 sps:$4 sm:$0xff]   ;;  %3924 = vmatprep.subr.bf16.mxu0 %v6073_v19 }
 0x5b4   : > { %v3264_v25 = vpack.c.bf16 %v3027_v23, %v3024_v21 }
 0x5b6   : > { %6352 = vtanh.bf16 %v3264_v25  ;;  %v5692_v26 = vpop.f32.mrb[136].mxu0  ;;  %3925 = vmatpush1.bf16.msra.mxu0 %v6071_v18 }
 0x5b7   : > { %6354 = vtanh.bf16 %v3265_v24  ;;  %v3039_v27 = vpop.f32.mrb[137].mxu0  ;;  %v3048_v29 = vadd.f32 %v5692_v26, %v7700_v2 }
 0x5b8   : > { %v5693_v28 = vpop.f32.mrb[138].mxu0  ;;  %v3040_v33 = vadd.f32 %v7700_v2, %v3039_v27 }
 0x5b9   : > { %v6349_v10 = vpop.eup %6348  ;;  %v3051_v30 = vadd.f32 %v5693_v28, %v7700_v2  ;;  %v3042_v31 = vpop.f32.mrb[139].mxu0 }
 0x5ba   : > { %v6351_v32 = vpop.eup %6350  ;;  %v3043_v34 = vadd.f32 %v7700_v2, %v3042_v31  ;;  %5754 = vmatprep.mubr.msk.bf16.mxu1 %vm1931_vm0, %v6349_v10  ;;  %v6079_v31 = vld [vmem:[#allocation13 + $0x34] ss:$8 sps:$4 sm:$0xff]  }
 0x5bb   : > { %v3267_v35 = vpack.c.bf16 %v3051_v30, %v3048_v29  ;;  %5755 = vmatmul.mubr.msk.bf16.vlgmr.msra.gmra.mrb[232].mxu1 %vm1931_vm0, %v6351_v32  ;;  %v6074_v29 = vld [vmem:[#allocation13 + $0x20] ss:$8 sps:$4 sm:$0xff]   ;;  %v6076_v30 = vld [vmem:[#allocation13 + $0x24] ss:$8 sps:$4 sm:$0xff]   ;;  %v6077_v32 = vld [vmem:[#allocation13 + $0x30] ss:$8 sps:$4 sm:$0xff]  }
 0x5bc   : > { %v3266_v36 = vpack.c.bf16 %v3043_v34, %v3040_v33  ;;  %3926 = vmatprep.subr.bf16.mxu0 %v6076_v30 }
 0x5bd   : > { %3927 = vmatpush1.bf16.msra.mxu0 %v6074_v29 }
 0x5be   : > { %6356 = vtanh.bf16 %v3266_v36  ;;  %3928 = vmatprep.subr.bf16.mxu0 %v6079_v31 }
 0x5bf   : > { %6358 = vtanh.bf16 %v3267_v35 }
 0x5c1   : > { %v6353_v37 = vpop.eup %6352  ;;  %3929 = vmatpush1.bf16.msra.mxu0 %v6077_v32 }
 0x5c2   : > { %v6355_v38 = vpop.eup %6354  ;;  %5758 = vmatprep.mubr.msk.bf16.mxu1 %vm1931_vm0, %v6353_v37 }
 0x5c3   : > { %5759 = vmatmul.mubr.msk.bf16.gmra.mrb[236].mxu1 %vm1931_vm0, %v6355_v38 }
 0x5c6   : > { %v5696_v39 = vpop.f32.mrb[140].mxu0 }
 0x5c7   : > { %v3055_v40 = vpop.f32.mrb[141].mxu0  ;;  %v3064_v43 = vadd.f32 %v5696_v39, %v7700_v2 }
 0x5c8   : > { %v5697_v41 = vpop.f32.mrb[142].mxu0  ;;  %v3056_v47 = vadd.f32 %v7700_v2, %v3055_v40 }
 0x5c9   : > { %v6357_v42 = vpop.eup %6356  ;;  %v3067_v44 = vadd.f32 %v5697_v41, %v7700_v2  ;;  %v3058_v45 = vpop.f32.mrb[143].mxu0 }
 0x5ca   : > { %v6359_v46 = vpop.eup %6358  ;;  %v3059_v48 = vadd.f32 %v7700_v2, %v3058_v45  ;;  %5762 = vmatprep.mubr.msk.bf16.mxu1 %vm1931_vm0, %v6357_v42  ;;  %v6080_v45 = vld [vmem:[#allocation13 + $0x40] ss:$8 sps:$4 sm:$0xff]  }
 0x5cb   : > { %v3269_v49 = vpack.c.bf16 %v3067_v44, %v3064_v43  ;;  %5763 = vmatmul.mubr.msk.bf16.gmra.mrb[240].mxu1 %vm1931_vm0, %v6359_v46  ;;  %v6082_v46 = vld [vmem:[#allocation13 + $0x44] ss:$8 sps:$4 sm:$0xff]  }
 0x5cc   : > { %v3268_v51 = vpack.c.bf16 %v3059_v48, %v3056_v47  ;;  %3930 = vmatprep.subr.bf16.mxu0 %v6082_v46  ;;  %v6085_v47 = vld [vmem:[#allocation13 + $0x54] ss:$8 sps:$4 sm:$0xff]   ;;  %v6083_v48 = vld [vmem:[#allocation13 + $0x50] ss:$8 sps:$4 sm:$0xff]  }
 0x5cd   : > { %3931 = vmatpush1.bf16.msra.mxu0 %v6080_v45 }
 0x5ce   : > { %6360 = vtanh.bf16 %v3268_v51  ;;  %3932 = vmatprep.subr.bf16.mxu0 %v6085_v47  ;;  %v6086_v51 = vld [vmem:[#allocation13 + $0x60] ss:$8 sps:$4 sm:$0xff]  }
 0x5cf   : > { %6362 = vtanh.bf16 %v3269_v49 }
 0x5d1   : > { %3933 = vmatpush1.bf16.msra.mxu0 %v6083_v48 }
 0x5d6   : > { %v5700_v52 = vpop.f32.mrb[144].mxu0 }
 0x5d7   : > { %v3071_v53 = vpop.f32.mrb[145].mxu0  ;;  %v3080_v22 = vadd.f32 %v5700_v52, %v7700_v2  ;;  %v6088_v52 = vld [vmem:[#allocation13 + $0x64] ss:$8 sps:$4 sm:$0xff]  }
 0x5d8   : > { %v5701_v54 = vpop.f32.mrb[146].mxu0  ;;  %v3072_v59 = vadd.f32 %v7700_v2, %v3071_v53  ;;  %3934 = vmatprep.subr.bf16.mxu0 %v6088_v52 }
 0x5d9   : > { %v6361_v55 = vpop.eup %6360  ;;  %v3083_v57 = vadd.f32 %v5701_v54, %v7700_v2  ;;  %v3074_v58 = vpop.f32.mrb[147].mxu0  ;;  %3935 = vmatpush1.bf16.msra.mxu0 %v6086_v51 }
 0x5da   : > { %v6363_v17 = vpop.eup %6362  ;;  %v3075_v60 = vadd.f32 %v7700_v2, %v3074_v58  ;;  %5766 = vmatprep.mubr.msk.bf16.mxu1 %vm1931_vm0, %v6361_v55 }
 0x5db   : > { %v3271_v50 = vpack.c.bf16 %v3083_v57, %v3080_v22  ;;  %5767 = vmatmul.mubr.msk.bf16.gmra.mrb[244].mxu1 %vm1931_vm0, %v6363_v17 }
 0x5dc   : > { %v3270_v61 = vpack.c.bf16 %v3075_v60, %v3072_v59 }
 0x5de   : > { %6364 = vtanh.bf16 %v3270_v61 }
 0x5df   : > { %6366 = vtanh.bf16 %v3271_v50 }
 0x5e6   : > { %v5704_v62 = vpop.f32.mrb[148].mxu0 }
 0x5e7   : > { %v3087_v63 = vpop.f32.mrb[149].mxu0  ;;  %v3096_v4 = vadd.f32 %v5704_v62, %v7700_v2  ;;  %v6091_v62 = vld [vmem:[#allocation13 + $0x74] ss:$8 sps:$4 sm:$0xff]  }
 0x5e8   : > { %v5705_v1 = vpop.f32.mrb[150].mxu0  ;;  %v3088_v7 = vadd.f32 %v7700_v2, %v3087_v63  ;;  %v6089_v63 = vld [vmem:[#allocation13 + $0x70] ss:$8 sps:$4 sm:$0xff]   ;;  %3936 = vmatprep.subr.bf16.mxu0 %v6091_v62 }
 0x5e9   : > { %v6365_v3 = vpop.eup %6364  ;;  %v3099_v5 = vadd.f32 %v5705_v1, %v7700_v2  ;;  %v3090_v56 = vpop.f32.mrb[151].mxu0  ;;  %3937 = vmatpush1.bf16.msra.mxu0 %v6089_v63 }
 0x5ea   : > { %v6367_v6 = vpop.eup %6366  ;;  %v3091_v8 = vadd.f32 %v7700_v2, %v3090_v56  ;;  %5770 = vmatprep.mubr.msk.bf16.mxu1 %vm1931_vm0, %v6365_v3 }
 0x5eb   : > { %v3273_v9 = vpack.c.bf16 %v3099_v5, %v3096_v4  ;;  %5771 = vmatmul.mubr.msk.bf16.gmra.mrb[248].mxu1 %vm1931_vm0, %v6367_v6 }
 0x5ec   : > { %v3272_v11 = vpack.c.bf16 %v3091_v8, %v3088_v7 }
 0x5ee   : > { %6368 = vtanh.bf16 %v3272_v11 }
 0x5ef   : > { %6370 = vtanh.bf16 %v3273_v9 }
 0x5f6   : > { %v5708_v14 = vpop.f32.mrb[192].mxu1 }
 0x5f7   : > { %v3103_v15 = vpop.f32.mrb[193].mxu1  ;;  %v3112_v21 = vadd.f32 %v5708_v14, %v7700_v2 }
 0x5f8   : > { %v5709_v16 = vpop.f32.mrb[194].mxu1  ;;  %v3104_v26 = vadd.f32 %v7700_v2, %v3103_v15 }
 0x5f9   : > { %v6369_v20 = vpop.eup %6368  ;;  %v3115_v23 = vadd.f32 %v5709_v16, %v7700_v2  ;;  %v3106_v24 = vpop.f32.mrb[195].mxu1 }
 0x5fa   : > { %v6371_v25 = vpop.eup %6370  ;;  %v3107_v27 = vadd.f32 %v7700_v2, %v3106_v24  ;;  %5774 = vmatprep.mubr.msk.bf16.mxu1 %vm1931_vm0, %v6369_v20 }
 0x5fb   : > { %v3275_v28 = vpack.c.bf16 %v3115_v23, %v3112_v21  ;;  %5775 = vmatmul.mubr.msk.bf16.gmra.mrb[252].mxu1 %vm1931_vm0, %v6371_v25 }
 0x5fc   : > { %v3274_v10 = vpack.c.bf16 %v3107_v27, %v3104_v26 }
 0x5fe   : > { %6372 = vtanh.bf16 %v3274_v10 }
 0x5ff   : > { %6374 = vtanh.bf16 %v3275_v28 }
 0x606   : > { %v5712_v33 = vpop.f32.mrb[196].mxu1 }
 0x607   : > { %v3119_v34 = vpop.f32.mrb[197].mxu1  ;;  %v3128_v37 = vadd.f32 %v5712_v33, %v7700_v2 }
 0x608   : > { %v5713_v35 = vpop.f32.mrb[198].mxu1  ;;  %v3120_v41 = vadd.f32 %v7700_v2, %v3119_v34 }
 0x609   : > { %v6373_v36 = vpop.eup %6372  ;;  %v3131_v38 = vadd.f32 %v5713_v35, %v7700_v2  ;;  %v3122_v39 = vpop.f32.mrb[199].mxu1 }
 0x60a   : > { %v6375_v40 = vpop.eup %6374  ;;  %v3123_v42 = vadd.f32 %v7700_v2, %v3122_v39  ;;  %5778 = vmatprep.mubr.msk.bf16.mxu1 %vm1931_vm0, %v6373_v36 }
 0x60b   : > { %v3277_v43 = vpack.c.bf16 %v3131_v38, %v3128_v37  ;;  %5779 = vmatmul.mubr.msk.bf16.gmra.mrb[0].mxu1 %vm1931_vm0, %v6375_v40 }
 0x60c   : > { %v3276_v44 = vpack.c.bf16 %v3123_v42, %v3120_v41 }
 0x60e   : > { %6376 = vtanh.bf16 %v3276_v44 }
 0x60f   : > { %6378 = vtanh.bf16 %v3277_v43 }
 0x616   : > { %v5716_v49 = vpop.f32.mrb[200].mxu1 }
 0x617   : > { %v3135_v53 = vpop.f32.mrb[201].mxu1  ;;  %v3144_v22 = vadd.f32 %v5716_v49, %v7700_v2 }
 0x618   : > { %v5717_v54 = vpop.f32.mrb[202].mxu1  ;;  %v3136_v59 = vadd.f32 %v7700_v2, %v3135_v53 }
 0x619   : > { %v6377_v55 = vpop.eup %6376  ;;  %v3147_v57 = vadd.f32 %v5717_v54, %v7700_v2  ;;  %v3138_v58 = vpop.f32.mrb[203].mxu1 }
 0x61a   : > { %v6379_v17 = vpop.eup %6378  ;;  %v3139_v60 = vadd.f32 %v7700_v2, %v3138_v58  ;;  %5782 = vmatprep.mubr.msk.bf16.mxu1 %vm1931_vm0, %v6377_v55 }
 0x61b   : > { %v3279_v50 = vpack.c.bf16 %v3147_v57, %v3144_v22  ;;  %5783 = vmatmul.mubr.msk.bf16.gmra.mrb[4].mxu1 %vm1931_vm0, %v6379_v17 }
 0x61c   : > { %v3278_v61 = vpack.c.bf16 %v3139_v60, %v3136_v59 }
 0x61e   : > { %6380 = vtanh.bf16 %v3278_v61 }
 0x61f   : > { %6382 = vtanh.bf16 %v3279_v50 }
 0x626   : > { %v5720_v1 = vpop.f32.mrb[204].mxu1 }
 0x627   : > { %v3151_v3 = vpop.f32.mrb[205].mxu1  ;;  %v3160_v56 = vadd.f32 %v5720_v1, %v7700_v2 }
 0x628   : > { %v5721_v4 = vpop.f32.mrb[206].mxu1  ;;  %v3152_v9 = vadd.f32 %v7700_v2, %v3151_v3 }
 0x629   : > { %v6381_v5 = vpop.eup %6380  ;;  %v3163_v6 = vadd.f32 %v5721_v4, %v7700_v2  ;;  %v3154_v7 = vpop.f32.mrb[207].mxu1 }
 0x62a   : > { %v6383_v8 = vpop.eup %6382  ;;  %v3155_v11 = vadd.f32 %v7700_v2, %v3154_v7  ;;  %5786 = vmatprep.mubr.msk.bf16.mxu1 %vm1931_vm0, %v6381_v5 }
 0x62b   : > { %v3281_v12 = vpack.c.bf16 %v3163_v6, %v3160_v56  ;;  %5787 = vmatmul.mubr.msk.bf16.gmra.mrb[8].mxu1 %vm1931_vm0, %v6383_v8 }
 0x62c   : > { %v3280_v13 = vpack.c.bf16 %v3155_v11, %v3152_v9 }
 0x62e   : > { %6384 = vtanh.bf16 %v3280_v13 }
 0x62f   : > { %6386 = vtanh.bf16 %v3281_v12 }
 0x636   : > { %v5724_v14 = vpop.f32.mrb[208].mxu1 }
 0x637   : > { %v3167_v15 = vpop.f32.mrb[209].mxu1  ;;  %v3176_v19 = vadd.f32 %v5724_v14, %v7700_v2 }
 0x638   : > { %v5725_v16 = vpop.f32.mrb[210].mxu1  ;;  %v3168_v24 = vadd.f32 %v7700_v2, %v3167_v15 }
 0x639   : > { %v6385_v18 = vpop.eup %6384  ;;  %v3179_v20 = vadd.f32 %v5725_v16, %v7700_v2  ;;  %v3170_v21 = vpop.f32.mrb[211].mxu1 }
 0x63a   : > { %v6387_v23 = vpop.eup %6386  ;;  %v3171_v25 = vadd.f32 %v7700_v2, %v3170_v21  ;;  %5790 = vmatprep.mubr.msk.bf16.mxu1 %vm1931_vm0, %v6385_v18 }
 0x63b   : > { %v3283_v26 = vpack.c.bf16 %v3179_v20, %v3176_v19  ;;  %5791 = vmatmul.mubr.msk.bf16.gmra.mrb[12].mxu1 %vm1931_vm0, %v6387_v23 }
 0x63c   : > { %v3282_v27 = vpack.c.bf16 %v3171_v25, %v3168_v24 }
 0x63e   : > { %6388 = vtanh.bf16 %v3282_v27  ;;  %v7801_v27 = vld [vmem:[%s8209_s12] ss:$0 sm:$0xff]  ;;  %s8106_s12 = scalar_lea.hbm %s8211_s26, %s5277_s23 }
 0x63f   : > { %6390 = vtanh.bf16 %v3283_v26 }
 0x646   : > { %v5728_v28 = vpop.f32.mrb[212].mxu1 }
 0x647   : > { %v3183_v10 = vpop.f32.mrb[213].mxu1  ;;  %v3192_v31 = vadd.f32 %v5728_v28, %v7700_v2 }
 0x648   : > { %v5729_v29 = vpop.f32.mrb[214].mxu1  ;;  %v3184_v35 = vadd.f32 %v7700_v2, %v3183_v10 }
 0x649   : > { %v6389_v30 = vpop.eup %6388  ;;  %v3195_v32 = vadd.f32 %v5729_v29, %v7700_v2  ;;  %v3186_v33 = vpop.f32.mrb[215].mxu1 }
 0x64a   : > { %v6391_v34 = vpop.eup %6390  ;;  %v3187_v36 = vadd.f32 %v7700_v2, %v3186_v33  ;;  %5794 = vmatprep.mubr.msk.bf16.mxu1 %vm1931_vm0, %v6389_v30 }
 0x64b   : > { %v3285_v37 = vpack.c.bf16 %v3195_v32, %v3192_v31  ;;  %5795 = vmatmul.mubr.msk.bf16.gmra.mrb[16].mxu1 %vm1931_vm0, %v6391_v34 }
 0x64c   : > { %v3284_v38 = vpack.c.bf16 %v3187_v36, %v3184_v35 }
 0x64e   : > { %6392 = vtanh.bf16 %v3284_v38 }
 0x64f   : > { %6394 = vtanh.bf16 %v3285_v37 }
 0x656   : > { %v5732_v39 = vpop.f32.mrb[216].mxu1 }
 0x657   : > { %v3199_v40 = vpop.f32.mrb[217].mxu1  ;;  %v3208_v43 = vadd.f32 %v5732_v39, %v7700_v2 }
 0x658   : > { %v5733_v41 = vpop.f32.mrb[218].mxu1  ;;  %v3200_v47 = vadd.f32 %v7700_v2, %v3199_v40 }
 0x659   : > { %v6393_v42 = vpop.eup %6392  ;;  %v3211_v44 = vadd.f32 %v5733_v41, %v7700_v2  ;;  %v3202_v45 = vpop.f32.mrb[219].mxu1 }
 0x65a   : > { %v6395_v46 = vpop.eup %6394  ;;  %v3203_v48 = vadd.f32 %v7700_v2, %v3202_v45  ;;  %5798 = vmatprep.mubr.msk.bf16.mxu1 %vm1931_vm0, %v6393_v42 }
 0x65b   : > { %v3287_v49 = vpack.c.bf16 %v3211_v44, %v3208_v43  ;;  %5799 = vmatmul.mubr.msk.bf16.gmra.mrb[20].mxu1 %vm1931_vm0, %v6395_v46 }
 0x65c   : > { %v3286_v51 = vpack.c.bf16 %v3203_v48, %v3200_v47 }
 0x65e   : > { %6396 = vtanh.bf16 %v3286_v51 }
 0x65f   : > { %6398 = vtanh.bf16 %v3287_v49 }
 0x666   : > { %v5736_v52 = vpop.f32.mrb[220].mxu1 }
 0x667   : > { %v3215_v53 = vpop.f32.mrb[221].mxu1  ;;  %v3224_v22 = vadd.f32 %v5736_v52, %v7700_v2 }
 0x668   : > { %v5737_v54 = vpop.f32.mrb[222].mxu1  ;;  %v3216_v59 = vadd.f32 %v7700_v2, %v3215_v53 }
 0x669   : > { %v6397_v55 = vpop.eup %6396  ;;  %v3227_v57 = vadd.f32 %v5737_v54, %v7700_v2  ;;  %v3218_v58 = vpop.f32.mrb[223].mxu1 }
 0x66a   : > { %v6399_v17 = vpop.eup %6398  ;;  %v3219_v60 = vadd.f32 %v7700_v2, %v3218_v58  ;;  %5802 = vmatprep.mubr.msk.bf16.mxu1 %vm1931_vm0, %v6397_v55 }
 0x66b   : > { %v3289_v50 = vpack.c.bf16 %v3227_v57, %v3224_v22  ;;  %5803 = vmatmul.mubr.msk.bf16.gmra.mrb[24].mxu1 %vm1931_vm0, %v6399_v17 }
 0x66c   : > { %v3288_v61 = vpack.c.bf16 %v3219_v60, %v3216_v59 }
 0x66e   : > { %6400 = vtanh.bf16 %v3288_v61 }
 0x66f   : > { %6402 = vtanh.bf16 %v3289_v50 }
 0x676   : > { %v5740_v62 = vpop.f32.mrb[224].mxu1 }
 0x677   : > { %v3231_v63 = vpop.f32.mrb[225].mxu1  ;;  %v3240_v4 = vadd.f32 %v5740_v62, %v7700_v2 }
 0x678   : > { %v5741_v1 = vpop.f32.mrb[226].mxu1  ;;  %v3232_v7 = vadd.f32 %v7700_v2, %v3231_v63 }
 0x679   : > { %v6401_v3 = vpop.eup %6400  ;;  %v3243_v5 = vadd.f32 %v5741_v1, %v7700_v2  ;;  %v3234_v56 = vpop.f32.mrb[227].mxu1 }
 0x67a   : > { %v6403_v6 = vpop.eup %6402  ;;  %v3235_v8 = vadd.f32 %v7700_v2, %v3234_v56  ;;  %5806 = vmatprep.mubr.msk.bf16.mxu1 %vm1931_vm0, %v6401_v3 }
 0x67b   : > { %v3291_v9 = vpack.c.bf16 %v3243_v5, %v3240_v4  ;;  %5807 = vmatmul.mubr.msk.bf16.gmra.mrb[28].mxu1 %vm1931_vm0, %v6403_v6 }
 0x67c   : > { %v3290_v11 = vpack.c.bf16 %v3235_v8, %v3232_v7 }
 0x67e   : > { %6404 = vtanh.bf16 %v3290_v11 }
 0x67f   : > { %6406 = vtanh.bf16 %v3291_v9 }
 0x686   : > { %v5744_v12 = vpop.f32.mrb[228].mxu1 }
 0x687   : > { %v3247_v13 = vpop.f32.mrb[229].mxu1  ;;  %v3256_v16 = vadd.f32 %v5744_v12, %v7700_v2 }
 0x688   : > { %v5745_v14 = vpop.f32.mrb[230].mxu1  ;;  %v3248_v21 = vadd.f32 %v7700_v2, %v3247_v13 }
 0x689   : > { %v6405_v15 = vpop.eup %6404  ;;  %v3259_v18 = vadd.f32 %v5745_v14, %v7700_v2  ;;  %v3250_v19 = vpop.f32.mrb[231].mxu1 }
 0x68a   : > { %v6407_v20 = vpop.eup %6406  ;;  %v3251_v23 = vadd.f32 %v7700_v2, %v3250_v19  ;;  %5810 = vmatprep.mubr.msk.bf16.mxu1 %vm1931_vm0, %v6405_v15 }
 0x68b   : > { %v3293_v24 = vpack.c.bf16 %v3259_v18, %v3256_v16  ;;  %5811 = vmatmul.mubr.msk.bf16.gmra.mrb[32].mxu1 %vm1931_vm0, %v6407_v20 }
 0x68c   : > { %v3292_v25 = vpack.c.bf16 %v3251_v23, %v3248_v21 }
 0x68e   : > { %6408 = vtanh.bf16 %v3292_v25  ;;  %v5756_v26 = vpop.f32.mrb[232].mxu1 }
 0x68f   : > { %6410 = vtanh.bf16 %v3293_v24  ;;  %v3495_v28 = vpop.f32.mrb[233].mxu1  ;;  %v3504_v29 = vadd.f32 %v5756_v26, %v7801_v27 }
 0x690   : > { %v5757_v10 = vpop.f32.mrb[234].mxu1  ;;  %v3496_v31 = vadd.f32 %v7801_v27, %v3495_v28 }
 0x691   : > { %v3507_v2 = vadd.f32 %v5757_v10, %v7801_v27  ;;  %v3498_v30 = vpop.f32.mrb[235].mxu1 }
 0x692   : > { %v3499_v32 = vadd.f32 %v7801_v27, %v3498_v30 }
 0x693   : > { %v3751_v33 = vpack.c.bf16 %v3507_v2, %v3504_v29 }
 0x694   : > { %v3750_v34 = vpack.c.bf16 %v3499_v32, %v3496_v31 }
 0x696   : > { %6412 = vtanh.bf16 %v3750_v34  ;;  %v5760_v35 = vpop.f32.mrb[236].mxu1 }
 0x697   : > { %v3511_v36 = vpop.f32.mrb[237].mxu1  ;;  %v3520_v39 = vadd.f32 %v5760_v35, %v7801_v27  ;;  %6414 = vtanh.bf16 %v3751_v33 }
 0x698   : > { %v5761_v37 = vpop.f32.mrb[238].mxu1  ;;  %v3512_v43 = vadd.f32 %v7801_v27, %v3511_v36 }
 0x699   : > { %v6409_v38 = vpop.eup %6408  ;;  %v3523_v40 = vadd.f32 %v5761_v37, %v7801_v27  ;;  %v3514_v41 = vpop.f32.mrb[239].mxu1 }
 0x69a   : > { %v6411_v42 = vpop.eup %6410  ;;  %v3515_v44 = vadd.f32 %v7801_v27, %v3514_v41  ;;  %5814 = vmatprep.mubr.msk.bf16.mxu1 %vm1931_vm0, %v6409_v38 }
 0x69b   : > { %v3753_v45 = vpack.c.bf16 %v3523_v40, %v3520_v39  ;;  %5815 = vmatmul.mubr.msk.bf16.gmra.mrb[36].mxu1 %vm1931_vm0, %v6411_v42 }
 0x69c   : > { %v3752_v46 = vpack.c.bf16 %v3515_v44, %v3512_v43 }
 0x69e   : > { %v5764_v47 = vpop.f32.mrb[240].mxu1  ;;  %6416 = vtanh.bf16 %v3752_v46 }
 0x69f   : > { %v3527_v48 = vpop.f32.mrb[241].mxu1  ;;  %v3536_v52 = vadd.f32 %v5764_v47, %v7801_v27  ;;  %6418 = vtanh.bf16 %v3753_v45 }
 0x6a0   : > { %v5765_v49 = vpop.f32.mrb[242].mxu1  ;;  %v3528_v55 = vadd.f32 %v7801_v27, %v3527_v48 }
 0x6a1   : > { %v6413_v51 = vpop.eup %6412  ;;  %v3539_v53 = vadd.f32 %v5765_v49, %v7801_v27  ;;  %v3530_v54 = vpop.f32.mrb[243].mxu1 }
 0x6a2   : > { %v3531_v22 = vadd.f32 %v7801_v27, %v3530_v54  ;;  %3955 = vmatmul.mubr.bf16.vlgmr.msra.gmra.mrb[152].mxu0 %v6413_v51  ;;  %v6415_v17 = vpop.eup %6414 }
 0x6a3   : > { %v3755_v57 = vpack.c.bf16 %v3539_v53, %v3536_v52  ;;  %3964 = vmatprep.mubr.bf16.mxu0 %v6765_v0 }
 0x6a4   : > { %v3754_v58 = vpack.c.bf16 %v3531_v22, %v3528_v55 }
 0x6a6   : > { %6420 = vtanh.bf16 %v3754_v58 }
 0x6a7   : > { %6422 = vtanh.bf16 %v3755_v57 }
 0x6a9   : > { %v6417_v61 = vpop.eup %6416 }
 0x6aa   : > { %3965 = vmatmul.mubr.bf16.gmra.mrb[156].mxu0 %v6415_v17  ;;  %v6419_v6 = vpop.eup %6418 }
 0x6ab   : > { %3974 = vmatprep.mubr.bf16.mxu0 %v6765_v0 }
 0x6ae   : > { %v5768_v59 = vpop.f32.mrb[244].mxu1 }
 0x6af   : > { %v3543_v60 = vpop.f32.mrb[245].mxu1  ;;  %v3552_v62 = vadd.f32 %v5768_v59, %v7801_v27 }
 0x6b0   : > { %v5769_v50 = vpop.f32.mrb[246].mxu1  ;;  %v3544_v3 = vadd.f32 %v7801_v27, %v3543_v60 }
 0x6b1   : > { %v3555_v63 = vadd.f32 %v5769_v50, %v7801_v27  ;;  %v3546_v1 = vpop.f32.mrb[247].mxu1  ;;  %v6421_v11 = vpop.eup %6420 }
 0x6b2   : > { %v3547_v4 = vadd.f32 %v7801_v27, %v3546_v1  ;;  %3975 = vmatmul.mubr.bf16.gmra.mrb[160].mxu0 %v6417_v61  ;;  %v6423_v20 = vpop.eup %6422 }
 0x6b3   : > { %v3757_v5 = vpack.c.bf16 %v3555_v63, %v3552_v62  ;;  %3984 = vmatprep.mubr.bf16.mxu0 %v6765_v0 }
 0x6b4   : > { %v3756_v56 = vpack.c.bf16 %v3547_v4, %v3544_v3 }
 0x6b6   : > { %6424 = vtanh.bf16 %v3756_v56 }
 0x6b7   : > { %6426 = vtanh.bf16 %v3757_v5 }
 0x6ba   : > { %3985 = vmatmul.mubr.bf16.gmra.mrb[164].mxu0 %v6419_v6 }
 0x6bb   : > { %3994 = vmatprep.mubr.bf16.mxu0 %v6765_v0 }
 0x6be   : > { %v5772_v7 = vpop.f32.mrb[248].mxu1 }
 0x6bf   : > { %v3559_v8 = vpop.f32.mrb[249].mxu1  ;;  %v3568_v12 = vadd.f32 %v5772_v7, %v7801_v27 }
 0x6c0   : > { %v5773_v9 = vpop.f32.mrb[250].mxu1  ;;  %v3560_v15 = vadd.f32 %v7801_v27, %v3559_v8 }
 0x6c1   : > { %v3571_v13 = vadd.f32 %v5773_v9, %v7801_v27  ;;  %v3562_v14 = vpop.f32.mrb[251].mxu1  ;;  %v6425_v25 = vpop.eup %6424 }
 0x6c2   : > { %v3563_v16 = vadd.f32 %v7801_v27, %v3562_v14  ;;  %3995 = vmatmul.mubr.bf16.gmra.mrb[168].mxu0 %v6421_v11  ;;  %v6427_v32 = vpop.eup %6426 }
 0x6c3   : > { %v3759_v18 = vpack.c.bf16 %v3571_v13, %v3568_v12  ;;  %4004 = vmatprep.mubr.bf16.mxu0 %v6765_v0 }
 0x6c4   : > { %v3758_v19 = vpack.c.bf16 %v3563_v16, %v3560_v15 }
 0x6c6   : > { %6428 = vtanh.bf16 %v3758_v19 }
 0x6c7   : > { %6430 = vtanh.bf16 %v3759_v18 }
 0x6ca   : > { %4005 = vmatmul.mubr.bf16.gmra.mrb[172].mxu0 %v6423_v20 }
 0x6cb   : > { %4014 = vmatprep.mubr.bf16.mxu0 %v6765_v0 }
 0x6ce   : > { %v5776_v21 = vpop.f32.mrb[252].mxu1 }
 0x6cf   : > { %v3575_v23 = vpop.f32.mrb[253].mxu1  ;;  %v3584_v26 = vadd.f32 %v5776_v21, %v7801_v27 }
 0x6d0   : > { %v5777_v24 = vpop.f32.mrb[254].mxu1  ;;  %v3576_v29 = vadd.f32 %v7801_v27, %v3575_v23 }
 0x6d1   : > { %v3587_v28 = vadd.f32 %v5777_v24, %v7801_v27  ;;  %v3578_v10 = vpop.f32.mrb[255].mxu1  ;;  %v6429_v36 = vpop.eup %6428 }
 0x6d2   : > { %v3579_v2 = vadd.f32 %v7801_v27, %v3578_v10  ;;  %4015 = vmatmul.mubr.bf16.gmra.mrb[176].mxu0 %v6425_v25  ;;  %v6431_v44 = vpop.eup %6430 }
 0x6d3   : > { %v3761_v30 = vpack.c.bf16 %v3587_v28, %v3584_v26  ;;  %4024 = vmatprep.mubr.bf16.mxu0 %v6765_v0 }
 0x6d4   : > { %v3760_v31 = vpack.c.bf16 %v3579_v2, %v3576_v29 }
 0x6d6   : > { %6432 = vtanh.bf16 %v3760_v31 }
 0x6d7   : > { %6434 = vtanh.bf16 %v3761_v30 }
 0x6da   : > { %4025 = vmatmul.mubr.bf16.gmra.mrb[180].mxu0 %v6427_v32 }
 0x6db   : > { %4034 = vmatprep.mubr.bf16.mxu0 %v6765_v0 }
 0x6de   : > { %v5780_v33 = vpop.f32.mrb[0].mxu1 }
 0x6df   : > { %v3591_v34 = vpop.f32.mrb[1].mxu1  ;;  %v3600_v37 = vadd.f32 %v5780_v33, %v7801_v27 }
 0x6e0   : > { %v5781_v35 = vpop.f32.mrb[2].mxu1  ;;  %v3592_v40 = vadd.f32 %v7801_v27, %v3591_v34 }
 0x6e1   : > { %v3603_v38 = vadd.f32 %v5781_v35, %v7801_v27  ;;  %v3594_v39 = vpop.f32.mrb[3].mxu1  ;;  %v6433_v48 = vpop.eup %6432 }
 0x6e2   : > { %v3595_v41 = vadd.f32 %v7801_v27, %v3594_v39  ;;  %4035 = vmatmul.mubr.bf16.gmra.mrb[184].mxu0 %v6429_v36  ;;  %v6435_v57 = vpop.eup %6434 }
 0x6e3   : > { %v3763_v42 = vpack.c.bf16 %v3603_v38, %v3600_v37  ;;  %4044 = vmatprep.mubr.bf16.mxu0 %v6765_v0 }
 0x6e4   : > { %v3762_v43 = vpack.c.bf16 %v3595_v41, %v3592_v40 }
 0x6e6   : > { %6436 = vtanh.bf16 %v3762_v43 }
 0x6e7   : > { %6438 = vtanh.bf16 %v3763_v42 }
 0x6ea   : > { %4045 = vmatmul.mubr.bf16.gmra.mrb[188].mxu0 %v6431_v44 }
 0x6eb   : > { %4054 = vmatprep.mubr.bf16.mxu0 %v6765_v0 }
 0x6ee   : > { %v5784_v45 = vpop.f32.mrb[4].mxu1 }
 0x6ef   : > { %v3607_v46 = vpop.f32.mrb[5].mxu1  ;;  %v3616_v49 = vadd.f32 %v5784_v45, %v7801_v27 }
 0x6f0   : > { %v5785_v47 = vpop.f32.mrb[6].mxu1  ;;  %v3608_v53 = vadd.f32 %v7801_v27, %v3607_v46 }
 0x6f1   : > { %v3619_v51 = vadd.f32 %v5785_v47, %v7801_v27  ;;  %v3610_v52 = vpop.f32.mrb[7].mxu1  ;;  %v6437_v60 = vpop.eup %6436 }
 0x6f2   : > { %v3611_v54 = vadd.f32 %v7801_v27, %v3610_v52  ;;  %4055 = vmatmul.mubr.bf16.gmra.mrb[192].mxu0 %v6433_v48  ;;  %v6439_v5 = vpop.eup %6438 }
 0x6f3   : > { %v3765_v55 = vpack.c.bf16 %v3619_v51, %v3616_v49  ;;  %4064 = vmatprep.mubr.bf16.mxu0 %v6765_v0 }
 0x6f4   : > { %v3764_v22 = vpack.c.bf16 %v3611_v54, %v3608_v53 }
 0x6f6   : > { %6440 = vtanh.bf16 %v3764_v22 }
 0x6f7   : > { %6442 = vtanh.bf16 %v3765_v55 }
 0x6fa   : > { %4065 = vmatmul.mubr.bf16.gmra.mrb[196].mxu0 %v6435_v57 }
 0x6fb   : > { %4074 = vmatprep.mubr.bf16.mxu0 %v6765_v0 }
 0x6fe   : > { %v5788_v58 = vpop.f32.mrb[8].mxu1 }
 0x6ff   : > { %v3623_v17 = vpop.f32.mrb[9].mxu1  ;;  %v3632_v50 = vadd.f32 %v5788_v58, %v7801_v27 }
 0x700   : > { %v5789_v59 = vpop.f32.mrb[10].mxu1  ;;  %v3624_v63 = vadd.f32 %v7801_v27, %v3623_v17 }
 0x701   : > { %v3635_v61 = vadd.f32 %v5789_v59, %v7801_v27  ;;  %v3626_v62 = vpop.f32.mrb[11].mxu1  ;;  %v6441_v8 = vpop.eup %6440 }
 0x702   : > { %v3627_v1 = vadd.f32 %v7801_v27, %v3626_v62  ;;  %4075 = vmatmul.mubr.bf16.gmra.mrb[200].mxu0 %v6437_v60  ;;  %v6443_v18 = vpop.eup %6442 }
 0x703   : > { %v3767_v3 = vpack.c.bf16 %v3635_v61, %v3632_v50  ;;  %4084 = vmatprep.mubr.bf16.mxu0 %v6765_v0 }
 0x704   : > { %v3766_v4 = vpack.c.bf16 %v3627_v1, %v3624_v63 }
 0x706   : > { %6444 = vtanh.bf16 %v3766_v4 }
 0x707   : > { %6446 = vtanh.bf16 %v3767_v3 }
 0x70a   : > { %4085 = vmatmul.mubr.bf16.gmra.mrb[204].mxu0 %v6439_v5 }
 0x70b   : > { %4094 = vmatprep.mubr.bf16.mxu0 %v6765_v0 }
 0x70e   : > { %v5792_v56 = vpop.f32.mrb[12].mxu1 }
 0x70f   : > { %v3639_v6 = vpop.f32.mrb[13].mxu1  ;;  %v3648_v9 = vadd.f32 %v5792_v56, %v7801_v27 }
 0x710   : > { %v5793_v7 = vpop.f32.mrb[14].mxu1  ;;  %v3640_v13 = vadd.f32 %v7801_v27, %v3639_v6 }
 0x711   : > { %v3651_v11 = vadd.f32 %v5793_v7, %v7801_v27  ;;  %v3642_v12 = vpop.f32.mrb[15].mxu1  ;;  %v6445_v23 = vpop.eup %6444 }
 0x712   : > { %v3643_v14 = vadd.f32 %v7801_v27, %v3642_v12  ;;  %4095 = vmatmul.mubr.bf16.gmra.mrb[208].mxu0 %v6441_v8  ;;  %v6447_v30 = vpop.eup %6446 }
 0x713   : > { %v3769_v15 = vpack.c.bf16 %v3651_v11, %v3648_v9  ;;  %4104 = vmatprep.mubr.bf16.mxu0 %v6765_v0 }
 0x714   : > { %v3768_v16 = vpack.c.bf16 %v3643_v14, %v3640_v13 }
 0x716   : > { %6448 = vtanh.bf16 %v3768_v16 }
 0x717   : > { %6450 = vtanh.bf16 %v3769_v15  ;;  %v3832_v15 = vlaneseq }
 0x71a   : > { %4105 = vmatmul.mubr.bf16.gmra.mrb[212].mxu0 %v6443_v18  ;;  %v3833_v18 = vshrl.u32 %v3832_v15, 7 }
 0x71b   : > { %4114 = vmatprep.mubr.bf16.mxu0 %v6765_v0 }
 0x71e   : > { %v5796_v19 = vpop.f32.mrb[16].mxu1 }
 0x71f   : > { %v3655_v20 = vpop.f32.mrb[17].mxu1  ;;  %v3664_v24 = vadd.f32 %v5796_v19, %v7801_v27 }
 0x720   : > { %v5797_v21 = vpop.f32.mrb[18].mxu1  ;;  %v3656_v28 = vadd.f32 %v7801_v27, %v3655_v20  ;;  %v3834_v20 = vsub.s32 0, %v3833_v18 }
 0x721   : > { %v3667_v25 = vadd.f32 %v5797_v21, %v7801_v27  ;;  %v3658_v26 = vpop.f32.mrb[19].mxu1  ;;  %v6449_v34 = vpop.eup %6448 }
 0x722   : > { %v3659_v10 = vadd.f32 %v7801_v27, %v3658_v26  ;;  %4115 = vmatmul.mubr.bf16.gmra.mrb[216].mxu0 %v6445_v23  ;;  %v6451_v42 = vpop.eup %6450  ;;  %v3830_v23 = vld [vmem:[%s8210_s15] sm:$0x3]  ;;  %s6678_s15 = sshll.u32 %s6766_s11, 4  ;;  %s6679_s15 = int_to_ptr.vmem [resolvable:$false] %s6678_s15 }
 0x723   : > { %v3771_v29 = vpack.c.bf16 %v3667_v25, %v3664_v24  ;;  %4124 = vmatprep.mubr.bf16.mxu0 %v6765_v0  ;;  %v3838_v24 = vsub.s32 1, %v3833_v18  ;;  %s6680_s25 = scalar_lea.vmem %s6679_s15, 16384  ;;  %p6681_p1 = scmp.lt.s32.totalorder %s8108_s17, %s6679_s15 }
 0x724   : > { %v3770_v2 = vpack.c.bf16 %v3659_v10, %v3656_v28  ;;  %p6682_p3 = scmp.lt.s32.totalorder %s6680_s25, %s6674_s22 }
 0x726   : > { %6452 = vtanh.bf16 %v3770_v2  ;;  %p6683_p2 = por %p6682_p3, %p6681_p1 }
 0x727   : > { %6454 = vtanh.bf16 %v3771_v29 }
 0x728   : > { %p6684_p8 = pnand %p6683_p2, %p6677_p13 }
 0x72a   : > { %4125 = vmatmul.mubr.bf16.gmra.mrb[220].mxu0 %v6447_v30 }
 0x72b   : > { %4134 = vmatprep.mubr.bf16.mxu0 %v6765_v0 }
 0x72e   : > { %v5800_v31 = vpop.f32.mrb[20].mxu1 }
 0x72f   : > { %v3671_v32 = vpop.f32.mrb[21].mxu1  ;;  %v3680_v35 = vadd.f32 %v5800_v31, %v7801_v27  ;;  %v7898_v31 = vrot.slane %v3830_v23, %v3834_v20 }
 0x730   : > { %v5801_v33 = vpop.f32.mrb[22].mxu1  ;;  %v3672_v38 = vadd.f32 %v7801_v27, %v3671_v32 }
 0x731   : > { %v3683_v36 = vadd.f32 %v5801_v33, %v7801_v27  ;;  %v3674_v37 = vpop.f32.mrb[23].mxu1  ;;  %v6453_v46 = vpop.eup %6452  ;;  %v7900_v33 = vrot.slane %v3830_v23, %v3838_v24 }
 0x732   : > { %v3675_v39 = vadd.f32 %v7801_v27, %v3674_v37  ;;  %4135 = vmatmul.mubr.bf16.gmra.mrb[224].mxu0 %v6449_v34  ;;  %v6455_v55 = vpop.eup %6454 }
 0x733   : > { %v3773_v40 = vpack.c.bf16 %v3683_v36, %v3680_v35  ;;  %4144 = vmatprep.mubr.bf16.mxu0 %v6765_v0 }
 0x734   : > { %v3772_v41 = vpack.c.bf16 %v3675_v39, %v3672_v38 }
 0x736   : > { %6456 = vtanh.bf16 %v3772_v41 }
 0x737   : > { %6458 = vtanh.bf16 %v3773_v40 }
 0x73a   : > { %4145 = vmatmul.mubr.bf16.gmra.mrb[228].mxu0 %v6451_v42 }
 0x73b   : > { %4154 = vmatprep.mubr.bf16.mxu0 %v6765_v0 }
 0x73e   : > { %v5804_v43 = vpop.f32.mrb[24].mxu1 }
 0x73f   : > { %v3687_v44 = vpop.f32.mrb[25].mxu1  ;;  %v3696_v47 = vadd.f32 %v5804_v43, %v7801_v27 }
 0x740   : > { %v5805_v45 = vpop.f32.mrb[26].mxu1  ;;  %v3688_v51 = vadd.f32 %v7801_v27, %v3687_v44 }
 0x741   : > { %v3699_v48 = vadd.f32 %v5805_v45, %v7801_v27  ;;  %v3690_v49 = vpop.f32.mrb[27].mxu1  ;;  %v6457_v17 = vpop.eup %6456 }
 0x742   : > { %v3691_v52 = vadd.f32 %v7801_v27, %v3690_v49  ;;  %4155 = vmatmul.mubr.bf16.gmra.mrb[232].mxu0 %v6453_v46  ;;  %v6459_v3 = vpop.eup %6458 }
 0x743   : > { %v3775_v53 = vpack.c.bf16 %v3699_v48, %v3696_v47  ;;  %4164 = vmatprep.mubr.bf16.mxu0 %v6765_v0 }
 0x744   : > { %v3774_v54 = vpack.c.bf16 %v3691_v52, %v3688_v51 }
 0x746   : > { %6460 = vtanh.bf16 %v3774_v54 }
 0x747   : > { %6462 = vtanh.bf16 %v3775_v53 }
 0x74a   : > { %4165 = vmatmul.mubr.bf16.gmra.mrb[236].mxu0 %v6455_v55 }
 0x74b   : > { %4174 = vmatprep.mubr.bf16.mxu0 %v6765_v0 }
 0x74e   : > { %v5808_v22 = vpop.f32.mrb[28].mxu1 }
 0x74f   : > { %v3703_v57 = vpop.f32.mrb[29].mxu1  ;;  %v3712_v59 = vadd.f32 %v5808_v22, %v7801_v27 }
 0x750   : > { %v5809_v58 = vpop.f32.mrb[30].mxu1  ;;  %v3704_v61 = vadd.f32 %v7801_v27, %v3703_v57 }
 0x751   : > { %v3715_v60 = vadd.f32 %v5809_v58, %v7801_v27  ;;  %v3706_v50 = vpop.f32.mrb[31].mxu1  ;;  %v6461_v6 = vpop.eup %6460 }
 0x752   : > { %v3707_v62 = vadd.f32 %v7801_v27, %v3706_v50  ;;  %4175 = vmatmul.mubr.bf16.gmra.mrb[240].mxu0 %v6457_v17  ;;  %v6463_v16 = vpop.eup %6462 }
 0x753   : > { %v3777_v63 = vpack.c.bf16 %v3715_v60, %v3712_v59  ;;  %4184 = vmatprep.mubr.bf16.mxu0 %v6765_v0 }
 0x754   : > { %v3776_v1 = vpack.c.bf16 %v3707_v62, %v3704_v61 }
 0x756   : > { %6464 = vtanh.bf16 %v3776_v1 }
 0x757   : > { %6466 = vtanh.bf16 %v3777_v63 }
 0x75a   : > { %4185 = vmatmul.mubr.bf16.gmra.mrb[244].mxu0 %v6459_v3 }
 0x75b   : > { %4194 = vmatprep.mubr.bf16.mxu0 %v6765_v0 }
 0x75e   : > { %v5812_v4 = vpop.f32.mrb[32].mxu1 }
 0x75f   : > { %v3719_v5 = vpop.f32.mrb[33].mxu1  ;;  %v3728_v7 = vadd.f32 %v5812_v4, %v7801_v27 }
 0x760   : > { %v5813_v56 = vpop.f32.mrb[34].mxu1  ;;  %v3720_v11 = vadd.f32 %v7801_v27, %v3719_v5 }
 0x761   : > { %v3731_v8 = vadd.f32 %v5813_v56, %v7801_v27  ;;  %v3722_v9 = vpop.f32.mrb[35].mxu1  ;;  %v6465_v26 = vpop.eup %6464 }
 0x762   : > { %v3723_v12 = vadd.f32 %v7801_v27, %v3722_v9  ;;  %4195 = vmatmul.mubr.bf16.gmra.mrb[248].mxu0 %v6461_v6  ;;  %v6467_v41 = vpop.eup %6466 }
 0x763   : > { %v3779_v13 = vpack.c.bf16 %v3731_v8, %v3728_v7  ;;  %4204 = vmatprep.mubr.bf16.mxu0 %v6765_v0 }
 0x764   : > { %v3778_v14 = vpack.c.bf16 %v3723_v12, %v3720_v11 }
 0x766   : > { %6468 = vtanh.bf16 %v3778_v14 }
 0x767   : > { %6470 = vtanh.bf16 %v3779_v13 }
 0x76a   : > { %4205 = vmatmul.mubr.bf16.gmra.mrb[252].mxu0 %v6463_v16 }
 0x76b   : > { %4214 = vmatprep.mubr.bf16.mxu0 %v6765_v0 }
 0x76e   : > { %v5816_v19 = vpop.f32.mrb[36].mxu1 }
 0x76f   : > { %v3735_v21 = vpop.f32.mrb[37].mxu1  ;;  %v3744_v28 = vadd.f32 %v5816_v19, %v7801_v27 }
 0x770   : > { %v5817_v25 = vpop.f32.mrb[38].mxu1  ;;  %v3736_v2 = vadd.f32 %v7801_v27, %v3735_v21 }
 0x771   : > { %v3747_v10 = vadd.f32 %v5817_v25, %v7801_v27  ;;  %v3738_v29 = vpop.f32.mrb[39].mxu1  ;;  %v6469_v53 = vpop.eup %6468 }
 0x772   : > { %v3739_v30 = vadd.f32 %v7801_v27, %v3738_v29  ;;  %4215 = vmatmul.mubr.bf16.gmra.mrb[0].mxu0 %v6465_v26  ;;  %v6471_v62 = vpop.eup %6470 }
 0x773   : > { %v3781_v32 = vpack.c.bf16 %v3747_v10, %v3744_v28  ;;  %4224 = vmatprep.mubr.bf16.mxu0 %v6765_v0 }
 0x774   : > { %v3780_v34 = vpack.c.bf16 %v3739_v30, %v3736_v2 }
 0x775   : > { %v3956_v35 = vpop.f32.mrb[152].mxu0 }
 0x776   : > { %v3957_v36 = vadd.f32 %v3956_v35, %v7898_v31  ;;  %v3958_v37 = vpop.f32.mrb[153].mxu0  ;;  %6472 = vtanh.bf16 %v3780_v34 }
 0x777   : > { %v3959_v38 = vadd.f32 %v3958_v37, %v7900_v33  ;;  %v3960_v39 = vpop.f32.mrb[154].mxu0  ;;  %6474 = vtanh.bf16 %v3781_v32 }
 0x778   : > { %v3961_v27 = vadd.f32 %v3960_v39, %v7898_v31  ;;  %v3962_v40 = vpop.f32.mrb[155].mxu0 }
 0x779   : > { %v5212_v42 = vpack.c.bf16 %v3959_v38, %v3957_v36  ;;  %v3963_v43 = vadd.f32 %v3962_v40, %v7900_v33 }
 0x77a   : > { %4225 = vmatmul.mubr.bf16.gmra.mrb[4].mxu0 %v6467_v41 }
 0x77b   : > { %4659 = vst [vmem:[%s7909_s29] sm:$0xff] %v5212_v42  ;;  %v5213_v44 = vpack.c.bf16 %v3963_v43, %v3961_v27  ;;  %4234 = vmatprep.mubr.bf16.mxu0 %v6765_v0 }
 0x77d   : > { %4660 = vst [vmem:[%s7909_s29 + $0x8] sm:$0xff] %v5213_v44  ;;  %v3966_v45 = vpop.f32.mrb[156].mxu0 }
 0x77e   : > { %v3967_v46 = vadd.f32 %v3966_v45, %v7898_v31  ;;  %v3968_v47 = vpop.f32.mrb[157].mxu0 }
 0x77f   : > { %v3969_v48 = vadd.f32 %v3968_v47, %v7900_v33  ;;  %v3970_v49 = vpop.f32.mrb[158].mxu0 }
 0x780   : > { %v3971_v51 = vadd.f32 %v3970_v49, %v7898_v31  ;;  %v3972_v52 = vpop.f32.mrb[159].mxu0 }
 0x781   : > { %v5214_v54 = vpack.c.bf16 %v3969_v48, %v3967_v46  ;;  %v3973_v55 = vadd.f32 %v3972_v52, %v7900_v33  ;;  %v6473_v11 = vpop.eup %6472 }
 0x782   : > { %4235 = vmatmul.mubr.bf16.gmra.mrb[8].mxu0 %v6469_v53  ;;  %v6475_v24 = vpop.eup %6474 }
 0x783   : > { %4661 = vst [vmem:[%s7909_s29 + $0x10] sm:$0xff] %v5214_v54  ;;  %v5215_v22 = vpack.c.bf16 %v3973_v55, %v3971_v51  ;;  %4244 = vmatprep.mubr.bf16.mxu0 %v6765_v0 }
 0x785   : > { %4662 = vst [vmem:[%s7909_s29 + $0x18] sm:$0xff] %v5215_v22  ;;  %v3976_v57 = vpop.f32.mrb[160].mxu0 }
 0x786   : > { %v3977_v58 = vadd.f32 %v3976_v57, %v7898_v31  ;;  %v3978_v17 = vpop.f32.mrb[161].mxu0 }
 0x787   : > { %v3979_v59 = vadd.f32 %v3978_v17, %v7900_v33  ;;  %v3980_v60 = vpop.f32.mrb[162].mxu0 }
 0x788   : > { %v3981_v50 = vadd.f32 %v3980_v60, %v7898_v31  ;;  %v3982_v61 = vpop.f32.mrb[163].mxu0 }
 0x789   : > { %v5216_v63 = vpack.c.bf16 %v3979_v59, %v3977_v58  ;;  %v3983_v1 = vadd.f32 %v3982_v61, %v7900_v33 }
 0x78a   : > { %4245 = vmatmul.mubr.bf16.gmra.mrb[12].mxu0 %v6471_v62 }
 0x78b   : > { %4663 = vst [vmem:[%s7909_s29 + $0x20] sm:$0xff] %v5216_v63  ;;  %v5217_v3 = vpack.c.bf16 %v3983_v1, %v3981_v50  ;;  %4254 = vmatprep.mubr.bf16.mxu0 %v6765_v0 }
 0x78d   : > { %4664 = vst [vmem:[%s7909_s29 + $0x28] sm:$0xff] %v5217_v3  ;;  %v3986_v4 = vpop.f32.mrb[164].mxu0 }
 0x78e   : > { %v3987_v5 = vadd.f32 %v3986_v4, %v7898_v31  ;;  %v3988_v56 = vpop.f32.mrb[165].mxu0 }
 0x78f   : > { %v3989_v6 = vadd.f32 %v3988_v56, %v7900_v33  ;;  %v3990_v7 = vpop.f32.mrb[166].mxu0 }
 0x790   : > { %v3991_v8 = vadd.f32 %v3990_v7, %v7898_v31  ;;  %v3992_v9 = vpop.f32.mrb[167].mxu0 }
 0x791   : > { %v5218_v12 = vpack.c.bf16 %v3989_v6, %v3987_v5  ;;  %v3993_v13 = vadd.f32 %v3992_v9, %v7900_v33 }
 0x792   : > { %4255 = vmatmul.mubr.bf16.gmra.mrb[16].mxu0 %v6473_v11 }
 0x793   : > { %4665 = vst [vmem:[%s7909_s29 + $0x30] sm:$0xff] %v5218_v12  ;;  %v5219_v14 = vpack.c.bf16 %v3993_v13, %v3991_v8  ;;  %4264 = vmatprep.mubr.bf16.mxu0 %v6765_v0 }
 0x795   : > { %4666 = vst [vmem:[%s7909_s29 + $0x38] sm:$0xff] %v5219_v14  ;;  %v3996_v15 = vpop.f32.mrb[168].mxu0 }
 0x796   : > { %v3997_v16 = vadd.f32 %v3996_v15, %v7898_v31  ;;  %v3998_v18 = vpop.f32.mrb[169].mxu0 }
 0x797   : > { %v3999_v19 = vadd.f32 %v3998_v18, %v7900_v33  ;;  %v4000_v20 = vpop.f32.mrb[170].mxu0 }
 0x798   : > { %v4001_v21 = vadd.f32 %v4000_v20, %v7898_v31  ;;  %v4002_v23 = vpop.f32.mrb[171].mxu0 }
 0x799   : > { %v5220_v25 = vpack.c.bf16 %v3999_v19, %v3997_v16  ;;  %v4003_v26 = vadd.f32 %v4002_v23, %v7900_v33 }
 0x79a   : > { %4265 = vmatmul.mubr.bf16.gmra.mrb[20].mxu0 %v6475_v24 }
 0x79b   : > { %4667 = vst [vmem:[%s7909_s29 + $0x40] sm:$0xff] %v5220_v25  ;;  %v5221_v0 = vpack.c.bf16 %v4003_v26, %v4001_v21 }
 0x79d   : > { %4668 = vst [vmem:[%s7909_s29 + $0x48] sm:$0xff] %v5221_v0  ;;  %v4006_v28 = vpop.f32.mrb[172].mxu0 }
 0x79e   : > { %v4007_v10 = vadd.f32 %v4006_v28, %v7898_v31  ;;  %v4008_v29 = vpop.f32.mrb[173].mxu0 }
 0x79f   : > { %v4009_v2 = vadd.f32 %v4008_v29, %v7900_v33  ;;  %v4010_v30 = vpop.f32.mrb[174].mxu0 }
 0x7a0   : > { %v4011_v32 = vadd.f32 %v4010_v30, %v7898_v31  ;;  %v4012_v34 = vpop.f32.mrb[175].mxu0 }
 0x7a1   : > { %v5222_v35 = vpack.c.bf16 %v4009_v2, %v4007_v10  ;;  %v4013_v36 = vadd.f32 %v4012_v34, %v7900_v33 }
 0x7a3   : > { %4669 = vst [vmem:[%s7909_s29 + $0x50] sm:$0xff] %v5222_v35  ;;  %v5223_v37 = vpack.c.bf16 %v4013_v36, %v4011_v32 }
 0x7a5   : > { %4670 = vst [vmem:[%s7909_s29 + $0x58] sm:$0xff] %v5223_v37  ;;  %v4016_v38 = vpop.f32.mrb[176].mxu0 }
 0x7a6   : > { %v4017_v39 = vadd.f32 %v4016_v38, %v7898_v31  ;;  %v4018_v27 = vpop.f32.mrb[177].mxu0 }
 0x7a7   : > { %v4019_v40 = vadd.f32 %v4018_v27, %v7900_v33  ;;  %v4020_v41 = vpop.f32.mrb[178].mxu0 }
 0x7a8   : > { %v4021_v42 = vadd.f32 %v4020_v41, %v7898_v31  ;;  %v4022_v43 = vpop.f32.mrb[179].mxu0 }
 0x7a9   : > { %v5224_v44 = vpack.c.bf16 %v4019_v40, %v4017_v39  ;;  %v4023_v45 = vadd.f32 %v4022_v43, %v7900_v33 }
 0x7ab   : > { %4671 = vst [vmem:[%s7909_s29 + $0x60] sm:$0xff] %v5224_v44  ;;  %v5225_v46 = vpack.c.bf16 %v4023_v45, %v4021_v42 }
 0x7ad   : > { %4672 = vst [vmem:[%s7909_s29 + $0x68] sm:$0xff] %v5225_v46  ;;  %v4026_v47 = vpop.f32.mrb[180].mxu0 }
 0x7ae   : > { %v4027_v48 = vadd.f32 %v4026_v47, %v7898_v31  ;;  %v4028_v49 = vpop.f32.mrb[181].mxu0 }
 0x7af   : > { %v4029_v51 = vadd.f32 %v4028_v49, %v7900_v33  ;;  %v4030_v52 = vpop.f32.mrb[182].mxu0 }
 0x7b0   : > { %v4031_v53 = vadd.f32 %v4030_v52, %v7898_v31  ;;  %v4032_v54 = vpop.f32.mrb[183].mxu0 }
 0x7b1   : > { %v5226_v55 = vpack.c.bf16 %v4029_v51, %v4027_v48  ;;  %v4033_v22 = vadd.f32 %v4032_v54, %v7900_v33 }
 0x7b3   : > { %4673 = vst [vmem:[%s7909_s29 + $0x70] sm:$0xff] %v5226_v55  ;;  %v5227_v57 = vpack.c.bf16 %v4033_v22, %v4031_v53 }
 0x7b5   : > { %4674 = vst [vmem:[%s7909_s29 + $0x78] sm:$0xff] %v5227_v57  ;;  %v4036_v58 = vpop.f32.mrb[184].mxu0 }
 0x7b6   : > { %v4037_v17 = vadd.f32 %v4036_v58, %v7898_v31  ;;  %v4038_v59 = vpop.f32.mrb[185].mxu0 }
 0x7b7   : > { %v4039_v60 = vadd.f32 %v4038_v59, %v7900_v33  ;;  %v4040_v50 = vpop.f32.mrb[186].mxu0 }
 0x7b8   : > { %v4041_v61 = vadd.f32 %v4040_v50, %v7898_v31  ;;  %v4042_v62 = vpop.f32.mrb[187].mxu0 }
 0x7b9   : > { %v5228_v63 = vpack.c.bf16 %v4039_v60, %v4037_v17  ;;  %v4043_v1 = vadd.f32 %v4042_v62, %v7900_v33 }
 0x7bb   : > { %4675 = vst [vmem:[%s7909_s29 + $0x80] sm:$0xff] %v5228_v63  ;;  %v5229_v3 = vpack.c.bf16 %v4043_v1, %v4041_v61 }
 0x7bd   : > { %4676 = vst [vmem:[%s7909_s29 + $0x88] sm:$0xff] %v5229_v3  ;;  %v4046_v4 = vpop.f32.mrb[188].mxu0 }
 0x7be   : > { %v4047_v5 = vadd.f32 %v4046_v4, %v7898_v31  ;;  %v4048_v56 = vpop.f32.mrb[189].mxu0 }
 0x7bf   : > { %v4049_v6 = vadd.f32 %v4048_v56, %v7900_v33  ;;  %v4050_v7 = vpop.f32.mrb[190].mxu0 }
 0x7c0   : > { %v4051_v8 = vadd.f32 %v4050_v7, %v7898_v31  ;;  %v4052_v9 = vpop.f32.mrb[191].mxu0 }
 0x7c1   : > { %v5230_v11 = vpack.c.bf16 %v4049_v6, %v4047_v5  ;;  %v4053_v12 = vadd.f32 %v4052_v9, %v7900_v33 }
 0x7c3   : > { %4677 = vst [vmem:[%s7909_s29 + $0x90] sm:$0xff] %v5230_v11  ;;  %v5231_v13 = vpack.c.bf16 %v4053_v12, %v4051_v8 }
 0x7c5   : > { %4678 = vst [vmem:[%s7909_s29 + $0x98] sm:$0xff] %v5231_v13  ;;  %v4056_v14 = vpop.f32.mrb[192].mxu0 }
 0x7c6   : > { %v4057_v15 = vadd.f32 %v4056_v14, %v7898_v31  ;;  %v4058_v16 = vpop.f32.mrb[193].mxu0 }
 0x7c7   : > { %v4059_v18 = vadd.f32 %v4058_v16, %v7900_v33  ;;  %v4060_v19 = vpop.f32.mrb[194].mxu0 }
 0x7c8   : > { %v4061_v20 = vadd.f32 %v4060_v19, %v7898_v31  ;;  %v4062_v21 = vpop.f32.mrb[195].mxu0 }
 0x7c9   : > { %v5232_v23 = vpack.c.bf16 %v4059_v18, %v4057_v15  ;;  %v4063_v24 = vadd.f32 %v4062_v21, %v7900_v33 }
 0x7cb   : > { %4679 = vst [vmem:[%s7909_s29 + $0xa0] sm:$0xff] %v5232_v23  ;;  %v5233_v25 = vpack.c.bf16 %v4063_v24, %v4061_v20 }
 0x7cd   : > { %4680 = vst [vmem:[%s7909_s29 + $0xa8] sm:$0xff] %v5233_v25  ;;  %v4066_v26 = vpop.f32.mrb[196].mxu0 }
 0x7ce   : > { %v4067_v0 = vadd.f32 %v4066_v26, %v7898_v31  ;;  %v4068_v28 = vpop.f32.mrb[197].mxu0 }
 0x7cf   : > { %v4069_v10 = vadd.f32 %v4068_v28, %v7900_v33  ;;  %v4070_v29 = vpop.f32.mrb[198].mxu0 }
 0x7d0   : > { %v4071_v2 = vadd.f32 %v4070_v29, %v7898_v31  ;;  %v4072_v30 = vpop.f32.mrb[199].mxu0 }
 0x7d1   : > { %v5234_v32 = vpack.c.bf16 %v4069_v10, %v4067_v0  ;;  %v4073_v34 = vadd.f32 %v4072_v30, %v7900_v33 }
 0x7d3   : > { %4681 = vst [vmem:[%s7909_s29 + $0xb0] sm:$0xff] %v5234_v32  ;;  %v5235_v35 = vpack.c.bf16 %v4073_v34, %v4071_v2 }
 0x7d5   : > { %4682 = vst [vmem:[%s7909_s29 + $0xb8] sm:$0xff] %v5235_v35  ;;  %v4076_v36 = vpop.f32.mrb[200].mxu0 }
 0x7d6   : > { %v4077_v37 = vadd.f32 %v4076_v36, %v7898_v31  ;;  %v4078_v38 = vpop.f32.mrb[201].mxu0 }
 0x7d7   : > { %v4079_v39 = vadd.f32 %v4078_v38, %v7900_v33  ;;  %v4080_v27 = vpop.f32.mrb[202].mxu0 }
 0x7d8   : > { %v4081_v40 = vadd.f32 %v4080_v27, %v7898_v31  ;;  %v4082_v41 = vpop.f32.mrb[203].mxu0 }
 0x7d9   : > { %v5236_v42 = vpack.c.bf16 %v4079_v39, %v4077_v37  ;;  %v4083_v43 = vadd.f32 %v4082_v41, %v7900_v33 }
 0x7db   : > { %4683 = vst [vmem:[%s7909_s29 + $0xc0] sm:$0xff] %v5236_v42  ;;  %v5237_v44 = vpack.c.bf16 %v4083_v43, %v4081_v40 }
 0x7dd   : > { %4684 = vst [vmem:[%s7909_s29 + $0xc8] sm:$0xff] %v5237_v44  ;;  %v4086_v45 = vpop.f32.mrb[204].mxu0 }
 0x7de   : > { %v4087_v46 = vadd.f32 %v4086_v45, %v7898_v31  ;;  %v4088_v47 = vpop.f32.mrb[205].mxu0 }
 0x7df   : > { %v4089_v48 = vadd.f32 %v4088_v47, %v7900_v33  ;;  %v4090_v49 = vpop.f32.mrb[206].mxu0 }
 0x7e0   : > { %v4091_v51 = vadd.f32 %v4090_v49, %v7898_v31  ;;  %v4092_v52 = vpop.f32.mrb[207].mxu0 }
 0x7e1   : > { %v5238_v53 = vpack.c.bf16 %v4089_v48, %v4087_v46  ;;  %v4093_v54 = vadd.f32 %v4092_v52, %v7900_v33 }
 0x7e3   : > { %4685 = vst [vmem:[%s7909_s29 + $0xd0] sm:$0xff] %v5238_v53  ;;  %v5239_v55 = vpack.c.bf16 %v4093_v54, %v4091_v51 }
 0x7e5   : > { %4686 = vst [vmem:[%s7909_s29 + $0xd8] sm:$0xff] %v5239_v55  ;;  %v4096_v22 = vpop.f32.mrb[208].mxu0 }
 0x7e6   : > { %v4097_v57 = vadd.f32 %v4096_v22, %v7898_v31  ;;  %v4098_v58 = vpop.f32.mrb[209].mxu0 }
 0x7e7   : > { %v4099_v17 = vadd.f32 %v4098_v58, %v7900_v33  ;;  %v4100_v59 = vpop.f32.mrb[210].mxu0 }
 0x7e8   : > { %v4101_v60 = vadd.f32 %v4100_v59, %v7898_v31  ;;  %v4102_v50 = vpop.f32.mrb[211].mxu0 }
 0x7e9   : > { %v5240_v61 = vpack.c.bf16 %v4099_v17, %v4097_v57  ;;  %v4103_v62 = vadd.f32 %v4102_v50, %v7900_v33 }
 0x7eb   : > { %4687 = vst [vmem:[%s7909_s29 + $0xe0] sm:$0xff] %v5240_v61  ;;  %v5241_v63 = vpack.c.bf16 %v4103_v62, %v4101_v60 }
 0x7ed   : > { %4688 = vst [vmem:[%s7909_s29 + $0xe8] sm:$0xff] %v5241_v63  ;;  %v4106_v1 = vpop.f32.mrb[212].mxu0 }
 0x7ee   : > { %v4107_v3 = vadd.f32 %v4106_v1, %v7898_v31  ;;  %v4108_v4 = vpop.f32.mrb[213].mxu0 }
 0x7ef   : > { %v4109_v5 = vadd.f32 %v4108_v4, %v7900_v33  ;;  %v4110_v56 = vpop.f32.mrb[214].mxu0 }
 0x7f0   : > { %v4111_v6 = vadd.f32 %v4110_v56, %v7898_v31  ;;  %v4112_v7 = vpop.f32.mrb[215].mxu0 }
 0x7f1   : > { %v5242_v8 = vpack.c.bf16 %v4109_v5, %v4107_v3  ;;  %v4113_v9 = vadd.f32 %v4112_v7, %v7900_v33 }
 0x7f3   : > { %4689 = vst [vmem:[%s7909_s29 + $0xf0] sm:$0xff] %v5242_v8  ;;  %v5243_v11 = vpack.c.bf16 %v4113_v9, %v4111_v6 }
 0x7f5   : > { %4690 = vst [vmem:[%s7909_s29 + $0xf8] sm:$0xff] %v5243_v11  ;;  %v4116_v12 = vpop.f32.mrb[216].mxu0 }
 0x7f6   : > { %v4117_v13 = vadd.f32 %v4116_v12, %v7898_v31  ;;  %v4118_v14 = vpop.f32.mrb[217].mxu0 }
 0x7f7   : > { %v4119_v15 = vadd.f32 %v4118_v14, %v7900_v33  ;;  %v4120_v16 = vpop.f32.mrb[218].mxu0 }
 0x7f8   : > { %v4121_v18 = vadd.f32 %v4120_v16, %v7898_v31  ;;  %v4122_v19 = vpop.f32.mrb[219].mxu0 }
 0x7f9   : > { %v5244_v20 = vpack.c.bf16 %v4119_v15, %v4117_v13  ;;  %v4123_v21 = vadd.f32 %v4122_v19, %v7900_v33 }
 0x7fb   : > { %4691 = vst [vmem:[%s7909_s29 + $0x100] sm:$0xff] %v5244_v20  ;;  %v5245_v23 = vpack.c.bf16 %v4123_v21, %v4121_v18 }
 0x7fd   : > { %4692 = vst [vmem:[%s7909_s29 + $0x108] sm:$0xff] %v5245_v23  ;;  %v4126_v24 = vpop.f32.mrb[220].mxu0 }
 0x7fe   : > { %v4127_v25 = vadd.f32 %v4126_v24, %v7898_v31  ;;  %v4128_v26 = vpop.f32.mrb[221].mxu0 }
 0x7ff   : > { %v4129_v0 = vadd.f32 %v4128_v26, %v7900_v33  ;;  %v4130_v28 = vpop.f32.mrb[222].mxu0 }
 0x800   : > { %v4131_v10 = vadd.f32 %v4130_v28, %v7898_v31  ;;  %v4132_v29 = vpop.f32.mrb[223].mxu0 }
 0x801   : > { %v5246_v2 = vpack.c.bf16 %v4129_v0, %v4127_v25  ;;  %v4133_v30 = vadd.f32 %v4132_v29, %v7900_v33 }
 0x803   : > { %4693 = vst [vmem:[%s7909_s29 + $0x110] sm:$0xff] %v5246_v2  ;;  %v5247_v32 = vpack.c.bf16 %v4133_v30, %v4131_v10 }
 0x805   : > { %4694 = vst [vmem:[%s7909_s29 + $0x118] sm:$0xff] %v5247_v32  ;;  %v4136_v34 = vpop.f32.mrb[224].mxu0 }
 0x806   : > { %v4137_v35 = vadd.f32 %v4136_v34, %v7898_v31  ;;  %v4138_v36 = vpop.f32.mrb[225].mxu0 }
 0x807   : > { %v4139_v37 = vadd.f32 %v4138_v36, %v7900_v33  ;;  %v4140_v38 = vpop.f32.mrb[226].mxu0 }
 0x808   : > { %v4141_v39 = vadd.f32 %v4140_v38, %v7898_v31  ;;  %v4142_v27 = vpop.f32.mrb[227].mxu0 }
 0x809   : > { %v5248_v40 = vpack.c.bf16 %v4139_v37, %v4137_v35  ;;  %v4143_v41 = vadd.f32 %v4142_v27, %v7900_v33 }
 0x80b   : > { %4695 = vst [vmem:[%s7909_s29 + $0x120] sm:$0xff] %v5248_v40  ;;  %v5249_v42 = vpack.c.bf16 %v4143_v41, %v4141_v39 }
 0x80d   : > { %4696 = vst [vmem:[%s7909_s29 + $0x128] sm:$0xff] %v5249_v42  ;;  %v4146_v43 = vpop.f32.mrb[228].mxu0 }
 0x80e   : > { %v4147_v44 = vadd.f32 %v4146_v43, %v7898_v31  ;;  %v4148_v45 = vpop.f32.mrb[229].mxu0 }
 0x80f   : > { %v4149_v46 = vadd.f32 %v4148_v45, %v7900_v33  ;;  %v4150_v47 = vpop.f32.mrb[230].mxu0 }
 0x810   : > { %v4151_v48 = vadd.f32 %v4150_v47, %v7898_v31  ;;  %v4152_v49 = vpop.f32.mrb[231].mxu0 }
 0x811   : > { %v5250_v51 = vpack.c.bf16 %v4149_v46, %v4147_v44  ;;  %v4153_v52 = vadd.f32 %v4152_v49, %v7900_v33 }
 0x813   : > { %4697 = vst [vmem:[%s7909_s29 + $0x130] sm:$0xff] %v5250_v51  ;;  %v5251_v53 = vpack.c.bf16 %v4153_v52, %v4151_v48 }
 0x815   : > { %4698 = vst [vmem:[%s7909_s29 + $0x138] sm:$0xff] %v5251_v53  ;;  %v4156_v54 = vpop.f32.mrb[232].mxu0 }
 0x816   : > { %v4157_v55 = vadd.f32 %v4156_v54, %v7898_v31  ;;  %v4158_v22 = vpop.f32.mrb[233].mxu0 }
 0x817   : > { %v4159_v57 = vadd.f32 %v4158_v22, %v7900_v33  ;;  %v4160_v58 = vpop.f32.mrb[234].mxu0 }
 0x818   : > { %v4161_v17 = vadd.f32 %v4160_v58, %v7898_v31  ;;  %v4162_v59 = vpop.f32.mrb[235].mxu0 }
 0x819   : > { %v5252_v60 = vpack.c.bf16 %v4159_v57, %v4157_v55  ;;  %v4163_v50 = vadd.f32 %v4162_v59, %v7900_v33 }
 0x81b   : > { %4699 = vst [vmem:[%s7909_s29 + $0x140] sm:$0xff] %v5252_v60  ;;  %v5253_v61 = vpack.c.bf16 %v4163_v50, %v4161_v17 }
 0x81d   : > { %4700 = vst [vmem:[%s7909_s29 + $0x148] sm:$0xff] %v5253_v61  ;;  %v4166_v62 = vpop.f32.mrb[236].mxu0 }
 0x81e   : > { %v4167_v63 = vadd.f32 %v4166_v62, %v7898_v31  ;;  %v4168_v1 = vpop.f32.mrb[237].mxu0 }
 0x81f   : > { %v4169_v3 = vadd.f32 %v4168_v1, %v7900_v33  ;;  %v4170_v4 = vpop.f32.mrb[238].mxu0 }
 0x820   : > { %v4171_v5 = vadd.f32 %v4170_v4, %v7898_v31  ;;  %v4172_v56 = vpop.f32.mrb[239].mxu0 }
 0x821   : > { %v5254_v6 = vpack.c.bf16 %v4169_v3, %v4167_v63  ;;  %v4173_v7 = vadd.f32 %v4172_v56, %v7900_v33 }
 0x823   : > { %4701 = vst [vmem:[%s7909_s29 + $0x150] sm:$0xff] %v5254_v6  ;;  %v5255_v8 = vpack.c.bf16 %v4173_v7, %v4171_v5 }
 0x825   : > { %4702 = vst [vmem:[%s7909_s29 + $0x158] sm:$0xff] %v5255_v8  ;;  %v4176_v9 = vpop.f32.mrb[240].mxu0 }
 0x826   : > { %v4177_v11 = vadd.f32 %v4176_v9, %v7898_v31  ;;  %v4178_v12 = vpop.f32.mrb[241].mxu0 }
 0x827   : > { %v4179_v13 = vadd.f32 %v4178_v12, %v7900_v33  ;;  %v4180_v14 = vpop.f32.mrb[242].mxu0 }
 0x828   : > { %v4181_v15 = vadd.f32 %v4180_v14, %v7898_v31  ;;  %v4182_v16 = vpop.f32.mrb[243].mxu0 }
 0x829   : > { %v5256_v18 = vpack.c.bf16 %v4179_v13, %v4177_v11  ;;  %v4183_v19 = vadd.f32 %v4182_v16, %v7900_v33 }
 0x82b   : > { %4703 = vst [vmem:[%s7909_s29 + $0x160] sm:$0xff] %v5256_v18  ;;  %v5257_v20 = vpack.c.bf16 %v4183_v19, %v4181_v15 }
 0x82d   : > { %4704 = vst [vmem:[%s7909_s29 + $0x168] sm:$0xff] %v5257_v20  ;;  %v4186_v21 = vpop.f32.mrb[244].mxu0 }
 0x82e   : > { %v4187_v23 = vadd.f32 %v4186_v21, %v7898_v31  ;;  %v4188_v24 = vpop.f32.mrb[245].mxu0 }
 0x82f   : > { %v4189_v25 = vadd.f32 %v4188_v24, %v7900_v33  ;;  %v4190_v26 = vpop.f32.mrb[246].mxu0 }
 0x830   : > { %v4191_v0 = vadd.f32 %v4190_v26, %v7898_v31  ;;  %v4192_v28 = vpop.f32.mrb[247].mxu0 }
 0x831   : > { %v5258_v10 = vpack.c.bf16 %v4189_v25, %v4187_v23  ;;  %v4193_v29 = vadd.f32 %v4192_v28, %v7900_v33 }
 0x833   : > { %4705 = vst [vmem:[%s7909_s29 + $0x170] sm:$0xff] %v5258_v10  ;;  %v5259_v2 = vpack.c.bf16 %v4193_v29, %v4191_v0 }
 0x835   : > { %4706 = vst [vmem:[%s7909_s29 + $0x178] sm:$0xff] %v5259_v2  ;;  %v4196_v30 = vpop.f32.mrb[248].mxu0 }
 0x836   : > { %v4197_v32 = vadd.f32 %v4196_v30, %v7898_v31  ;;  %v4198_v34 = vpop.f32.mrb[249].mxu0 }
 0x837   : > { %v4199_v35 = vadd.f32 %v4198_v34, %v7900_v33  ;;  %v4200_v36 = vpop.f32.mrb[250].mxu0 }
 0x838   : > { %v4201_v37 = vadd.f32 %v4200_v36, %v7898_v31  ;;  %v4202_v38 = vpop.f32.mrb[251].mxu0 }
 0x839   : > { %v5260_v39 = vpack.c.bf16 %v4199_v35, %v4197_v32  ;;  %v4203_v27 = vadd.f32 %v4202_v38, %v7900_v33 }
 0x83b   : > { %4707 = vst [vmem:[%s7909_s29 + $0x180] sm:$0xff] %v5260_v39  ;;  %v5261_v40 = vpack.c.bf16 %v4203_v27, %v4201_v37 }
 0x83d   : > { %4708 = vst [vmem:[%s7909_s29 + $0x188] sm:$0xff] %v5261_v40  ;;  %v4206_v41 = vpop.f32.mrb[252].mxu0 }
 0x83e   : > { %v4207_v42 = vadd.f32 %v4206_v41, %v7898_v31  ;;  %v4208_v43 = vpop.f32.mrb[253].mxu0 }
 0x83f   : > { %v4209_v44 = vadd.f32 %v4208_v43, %v7900_v33  ;;  %v4210_v45 = vpop.f32.mrb[254].mxu0 }
 0x840   : > { %v4211_v46 = vadd.f32 %v4210_v45, %v7898_v31  ;;  %v4212_v47 = vpop.f32.mrb[255].mxu0 }
 0x841   : > { %v5262_v48 = vpack.c.bf16 %v4209_v44, %v4207_v42  ;;  %v4213_v49 = vadd.f32 %v4212_v47, %v7900_v33 }
 0x843   : > { %4709 = vst [vmem:[%s7909_s29 + $0x190] sm:$0xff] %v5262_v48  ;;  %v5263_v51 = vpack.c.bf16 %v4213_v49, %v4211_v46 }
 0x845   : > { %4710 = vst [vmem:[%s7909_s29 + $0x198] sm:$0xff] %v5263_v51  ;;  %v4216_v52 = vpop.f32.mrb[0].mxu0 }
 0x846   : > { %v4217_v53 = vadd.f32 %v4216_v52, %v7898_v31  ;;  %v4218_v54 = vpop.f32.mrb[1].mxu0 }
 0x847   : > { %v4219_v55 = vadd.f32 %v4218_v54, %v7900_v33  ;;  %v4220_v22 = vpop.f32.mrb[2].mxu0 }
 0x848   : > { %v4221_v57 = vadd.f32 %v4220_v22, %v7898_v31  ;;  %v4222_v58 = vpop.f32.mrb[3].mxu0 }
 0x849   : > { %v5264_v17 = vpack.c.bf16 %v4219_v55, %v4217_v53  ;;  %v4223_v59 = vadd.f32 %v4222_v58, %v7900_v33 }
 0x84b   : > { %4711 = vst [vmem:[%s7909_s29 + $0x1a0] sm:$0xff] %v5264_v17  ;;  %v5265_v60 = vpack.c.bf16 %v4223_v59, %v4221_v57 }
 0x84d   : > { %4712 = vst [vmem:[%s7909_s29 + $0x1a8] sm:$0xff] %v5265_v60  ;;  %v4226_v50 = vpop.f32.mrb[4].mxu0 }
 0x84e   : > { %v4227_v61 = vadd.f32 %v4226_v50, %v7898_v31  ;;  %v4228_v62 = vpop.f32.mrb[5].mxu0 }
 0x84f   : > { %v4229_v63 = vadd.f32 %v4228_v62, %v7900_v33  ;;  %v4230_v1 = vpop.f32.mrb[6].mxu0 }
 0x850   : > { %v4231_v3 = vadd.f32 %v4230_v1, %v7898_v31  ;;  %v4232_v4 = vpop.f32.mrb[7].mxu0 }
 0x851   : > { %v5266_v5 = vpack.c.bf16 %v4229_v63, %v4227_v61  ;;  %v4233_v56 = vadd.f32 %v4232_v4, %v7900_v33 }
 0x853   : > { %4713 = vst [vmem:[%s7909_s29 + $0x1b0] sm:$0xff] %v5266_v5  ;;  %v5267_v6 = vpack.c.bf16 %v4233_v56, %v4231_v3 }
 0x855   : > { %4714 = vst [vmem:[%s7909_s29 + $0x1b8] sm:$0xff] %v5267_v6  ;;  %v4236_v7 = vpop.f32.mrb[8].mxu0 }
 0x856   : > { %v4237_v8 = vadd.f32 %v4236_v7, %v7898_v31  ;;  %v4238_v9 = vpop.f32.mrb[9].mxu0 }
 0x857   : > { %v4239_v11 = vadd.f32 %v4238_v9, %v7900_v33  ;;  %v4240_v12 = vpop.f32.mrb[10].mxu0 }
 0x858   : > { %v4241_v13 = vadd.f32 %v4240_v12, %v7898_v31  ;;  %v4242_v14 = vpop.f32.mrb[11].mxu0 }
 0x859   : > { %v5268_v15 = vpack.c.bf16 %v4239_v11, %v4237_v8  ;;  %v4243_v16 = vadd.f32 %v4242_v14, %v7900_v33 }
 0x85b   : > { %4715 = vst [vmem:[%s7909_s29 + $0x1c0] sm:$0xff] %v5268_v15  ;;  %v5269_v18 = vpack.c.bf16 %v4243_v16, %v4241_v13 }
 0x85d   : > { %4716 = vst [vmem:[%s7909_s29 + $0x1c8] sm:$0xff] %v5269_v18  ;;  %v4246_v19 = vpop.f32.mrb[12].mxu0 }
 0x85e   : > { %v4247_v20 = vadd.f32 %v4246_v19, %v7898_v31  ;;  %v4248_v21 = vpop.f32.mrb[13].mxu0 }
 0x85f   : > { %v4249_v23 = vadd.f32 %v4248_v21, %v7900_v33  ;;  %v4250_v24 = vpop.f32.mrb[14].mxu0 }
 0x860   : > { %v4251_v25 = vadd.f32 %v4250_v24, %v7898_v31  ;;  %v4252_v26 = vpop.f32.mrb[15].mxu0 }
 0x861   : > { %v5270_v0 = vpack.c.bf16 %v4249_v23, %v4247_v20  ;;  %v4253_v28 = vadd.f32 %v4252_v26, %v7900_v33 }
 0x863   : > { %4717 = vst [vmem:[%s7909_s29 + $0x1d0] sm:$0xff] %v5270_v0  ;;  %v5271_v10 = vpack.c.bf16 %v4253_v28, %v4251_v25 }
 0x865   : > { %4718 = vst [vmem:[%s7909_s29 + $0x1d8] sm:$0xff] %v5271_v10  ;;  %v4256_v29 = vpop.f32.mrb[16].mxu0 }
 0x866   : > { %v4257_v2 = vadd.f32 %v4256_v29, %v7898_v31  ;;  %v4258_v30 = vpop.f32.mrb[17].mxu0 }
 0x867   : > { %v4259_v32 = vadd.f32 %v4258_v30, %v7900_v33  ;;  %v4260_v34 = vpop.f32.mrb[18].mxu0 }
 0x868   : > { %v4261_v35 = vadd.f32 %v4260_v34, %v7898_v31  ;;  %v4262_v36 = vpop.f32.mrb[19].mxu0 }
 0x869   : > { %v5272_v37 = vpack.c.bf16 %v4259_v32, %v4257_v2  ;;  %v4263_v38 = vadd.f32 %v4262_v36, %v7900_v33 }
 0x86b   : > { %4719 = vst [vmem:[%s7909_s29 + $0x1e0] sm:$0xff] %v5272_v37  ;;  %v5273_v39 = vpack.c.bf16 %v4263_v38, %v4261_v35 }
 0x86d   : > { %4720 = vst [vmem:[%s7909_s29 + $0x1e8] sm:$0xff] %v5273_v39  ;;  %v4266_v27 = vpop.f32.mrb[20].mxu0 }
 0x86e   : > { %v4267_v40 = vadd.f32 %v4266_v27, %v7898_v31  ;;  %v4268_v41 = vpop.f32.mrb[21].mxu0 }
 0x86f   : > { %v4269_v42 = vadd.f32 %v4268_v41, %v7900_v33  ;;  %v4270_v43 = vpop.f32.mrb[22].mxu0 }
 0x870   : > { %v4271_v44 = vadd.f32 %v4270_v43, %v7898_v31  ;;  %v4272_v45 = vpop.f32.mrb[23].mxu0 }
 0x871   : > { %v5274_v46 = vpack.c.bf16 %v4269_v42, %v4267_v40  ;;  %v4273_v47 = vadd.f32 %v4272_v45, %v7900_v33 }
 0x873   : > { %4721 = vst [vmem:[%s7909_s29 + $0x1f0] sm:$0xff] %v5274_v46  ;;  %v5275_v48 = vpack.c.bf16 %v4273_v47, %v4271_v44 }
 0x875   : > { %4722 = vst [vmem:[%s7909_s29 + $0x1f8] sm:$0xff] %v5275_v48 }
 0x876   : > { %6687 = shalt.err (!%p6684_p8)
}
 0x877   : > { %s6688_s29 = scalar_lea.hbm %s8106_s12, 8192  ;;  %s6692_s11 = scalar_lea.hbm %s8211_s26, 16384 }
 0x878   : > { %p6689_p10 = scmp.ne.s32.totalorder %s8106_s12, %s6688_s29  ;;  %p6693_p0 = scmp.lt.u32.totalorder %s8106_s12, %s8211_s26 }
 0x879   : > { %p6694_p5 = scmp.lt.u32.totalorder %s6692_s11, %s6688_s29  ;;  %p6696_p6 = scmp.lt.u32.totalorder %s6688_s29, %s8106_s12 }
 0x87a   : > { %p6690_p11 = pnand %p6689_p10, %p8212_p9 }
 0x87b   : > { %p6695_p7 = por %p6694_p5, %p6693_p0 }
 0x87c   : > { %p6691_p12 = pneg %p6690_p11 }
 0x87d   : > { %p6697_p4 = por %p6696_p6, %p6695_p7 }
 0x87f   : > { %p6698_p13 = pnand %p6697_p4, %p6691_p12 }
 0x881   : > { %6701 = shalt.err (!%p6698_p13)
}
 0x882   : > { %s6767_s22 = smov 128   ;;  %s6768_s25 = smov 8  }
 0x883   : > { %s8213_s0 = scalar_lea.sflag [#allocation4], %s7116_s10 }
 0x884   : > { %5848 = dma.vmem_to_hbm [thread:$0]  (%p8212_p9), %s8108_s17, 8192, %s8106_s12, %s8213_s0, %s6767_s22, %s6767_s22, %s6768_s25  }
 0x885 PF: > { %s4753_s24 = sand.u32 1, %s6740_s18   ;;  %p8214_p1 = scmp.ne.s32.totalorder %s8194_s9, 0 }
 0x886   : > { %p8215_p3 = scmp.ge.s32.totalorder %s6752_s21, 2  ;;  %s4754_s29 = scalar_lea.sflag [#allocation4], %s4753_s24 }
 0x888   : > { %p5874_p2 = pnand %p8215_p3, %p8214_p1 }
 0x88a   : > { %6735 = dma.done.wait (!%p5874_p2), %s4754_s29, 8192  }
 0x88b   : > { %6737 = vsyncadd (!%p5874_p2), %s4754_s29, 4294959104  ;;  %p31_p8 = scmp.ge.s32.totalorder %s7034_s14, 4   ;;  %s8216_s18 = smov %s6744_s19 }
 0x88c   : > { %s8217_s19 = smov %s6748_s20  ;;  %s8218_s20 = smov %s7045_s30 }
 0x88d   : > { %s8219_s21 = smov %s7034_s14  ;;  %33 = sbr.rel (!%p31_p8) target bundleno = 17 (0x11), region = 149 }
 0x894   :  { %4759 = vsyncpa [#allocation3], 1 }
 0x895   :  { %4761 = vsyncpa [#allocation3 + $0x1], 1 }
 0x896   :  { %4762 = vsyncpa [#allocation6], 1 }
 0x897   :  { %4763 = vsyncpa [#allocation9], 1 }
 0x898   :  { %4764 = vsyncpa [#allocation12], 1 }
 0x899   :  { %4765 = vsyncpa [#allocation4], 1 }
 0x89a   :  { %4767 = vsyncpa [#allocation4 + $0x1], 1 }

</bundles_post_ra>
